<compile_context>
chip_gen: v7x
topology: tpu7x:2x2x1
jax: 0.10.0
libtpu: 0.0.40
codegen_flags: <defaults>
</compile_context>

<pallas_src>
import math

import jax
import jax.numpy as jnp
from jax import lax
from jax.experimental import pallas as pl
from jax.experimental.pallas import tpu as pltpu


# ---------------------------------------------------------------------------
# Kernel 1a: un-weighted feature embedding for x1 (bf16 output, (N1, L)).
#   phi1[r, l] = cos(<x1[r, :], omega[:, l]> + phase[l])
# ---------------------------------------------------------------------------
def _feature_kernel(x_ref, omega_ref, phase_ref, out_ref):
    # x_ref: (TR, D), omega_ref: (D, TC), phase_ref: (1, TC), out_ref: (TR, TC)
    z = jnp.dot(x_ref[...], omega_ref[...], preferred_element_type=jnp.float32)
    out_ref[...] = jnp.cos(z + phase_ref[...]).astype(out_ref.dtype)


def _compute_features(x, omega, phase, tr, tc):
    n, d = x.shape
    lp = omega.shape[1]
    cost = pl.CostEstimate(
        flops=2 * n * d * lp,
        transcendentals=n * lp,
        bytes_accessed=4 * (n * d + d * lp + lp) + 2 * n * lp)
    return pl.pallas_call(
        _feature_kernel,
        out_shape=jax.ShapeDtypeStruct((n, lp), jnp.bfloat16),
        grid_spec=pltpu.PrefetchScalarGridSpec(
            num_scalar_prefetch=0,
            grid=(n // tr, lp // tc),
            in_specs=[
                pl.BlockSpec((tr, d), lambda i, k: (i, 0)),   # point rows
                pl.BlockSpec((d, tc), lambda i, k: (0, k)),   # omega cols
                pl.BlockSpec((1, tc), lambda i, k: (0, k)),   # phases
            ],
            out_specs=pl.BlockSpec((tr, tc), lambda i, k: (i, k)),
        ),
        compiler_params=pltpu.CompilerParams(
            dimension_semantics=("parallel", "parallel")),
        cost_estimate=cost,
    )(x, omega, phase)


# ---------------------------------------------------------------------------
# Kernel 1b: weighted feature embedding for x2, emitted TRANSPOSED (L, N2),
# bf16 output.  Spectral measure, 2/L and variance/normalizer are folded in.
#   phi2t[l, r] = w[l] * cos(<x2[r, :], omega[:, l]> + phase[l])
# ---------------------------------------------------------------------------
def _feature_t_kernel(x_ref, omega_t_ref, phase_t_ref, weight_t_ref, out_ref):
    # x_ref:       (TR, D)   rows of x2
    # omega_t_ref: (TC, D)   frequencies in transposed layout
    # phase_t_ref: (TC, 1), weight_t_ref: (TC, 1)
    # out_ref:     (TC, TR)  bf16
    z_t = lax.dot_general(
        omega_t_ref[...], x_ref[...],
        dimension_numbers=(((1,), (1,)), ((), ())),
        preferred_element_type=jnp.float32)                    # (TC, TR)
    feat = weight_t_ref[...] * jnp.cos(z_t + phase_t_ref[...])  # f32
    out_ref[...] = feat.astype(out_ref.dtype)


def _compute_features_t(x, omega_t, phase_t, weight_t, tr, tc):
    n, d = x.shape
    lp = omega_t.shape[0]
    cost = pl.CostEstimate(
        flops=2 * n * d * lp + 2 * n * lp,
        transcendentals=n * lp,
        bytes_accessed=4 * (n * d + d * lp + 2 * lp) + 2 * n * lp)
    return pl.pallas_call(
        _feature_t_kernel,
        out_shape=jax.ShapeDtypeStruct((lp, n), jnp.bfloat16),
        grid_spec=pltpu.PrefetchScalarGridSpec(
            num_scalar_prefetch=0,
            grid=(n // tr, lp // tc),
            in_specs=[
                pl.BlockSpec((tr, d), lambda i, k: (i, 0)),   # x2 rows
                pl.BlockSpec((tc, d), lambda i, k: (k, 0)),   # omega^T rows
                pl.BlockSpec((tc, 1), lambda i, k: (k, 0)),   # phases
                pl.BlockSpec((tc, 1), lambda i, k: (k, 0)),   # weights
            ],
            out_specs=pl.BlockSpec((tc, tr), lambda i, k: (k, i)),
        ),
        compiler_params=pltpu.CompilerParams(
            dimension_semantics=("parallel", "parallel")),
        cost_estimate=cost,
    )(x, omega_t, phase_t, weight_t)


# ---------------------------------------------------------------------------
# Kernel 2: Gram matrix — plain tiled (M,K)x(K,N) bf16 matmul, f32 accumulate
# directly in the (VMEM-resident) output block across the K (=L) grid axis.
# ---------------------------------------------------------------------------
def _gram_kernel(phi1_ref, phi2t_ref, out_ref):
    k = pl.program_id(2)
    prod = jnp.dot(phi1_ref[...], phi2t_ref[...],
                   preferred_element_type=jnp.float32)

    @pl.when(k == 0)
    def _():
        out_ref[...] = prod

    @pl.when(k != 0)
    def _():
        out_ref[...] += prod


def _compute_gram(phi1, phi2t, tm, tn, tk, vmem_limit_bytes):
    n1p, lp = phi1.shape
    n2p = phi2t.shape[1]
    cost = pl.CostEstimate(
        flops=2 * n1p * n2p * lp,
        transcendentals=0,
        bytes_accessed=(2 * n1p * lp * (n2p // tn)
                        + 2 * lp * n2p * (n1p // tm)
                        + 4 * n1p * n2p))
    return pl.pallas_call(
        _gram_kernel,
        out_shape=jax.ShapeDtypeStruct((n1p, n2p), jnp.float32),
        grid_spec=pltpu.PrefetchScalarGridSpec(
            num_scalar_prefetch=0,
            grid=(n1p // tm, n2p // tn, lp // tk),
            in_specs=[
                pl.BlockSpec((tm, tk), lambda i, j, k: (i, k)),
                pl.BlockSpec((tk, tn), lambda i, j, k: (k, j)),
            ],
            out_specs=pl.BlockSpec((tm, tn), lambda i, j, k: (i, j)),
        ),
        compiler_params=pltpu.CompilerParams(
            dimension_semantics=("parallel", "parallel", "arbitrary"),
            vmem_limit_bytes=vmem_limit_bytes),
        cost_estimate=cost,
    )(phi1, phi2t)


# ---------------------------------------------------------------------------
# Wrapper: tile/padding selection + the three pallas calls.
# ---------------------------------------------------------------------------
def _round_up(a, b):
    return -(-a // b) * b


def _pad2(a, shape):
    pads = [(0, s - d) for d, s in zip(a.shape, shape)]
    if all(p == (0, 0) for p in pads):
        return a
    return jnp.pad(a, pads)


def _pick_tile(n, max_tile, quantum):
    """Tile size (multiple of `quantum`, <= max_tile) and padded extent that
    minimize padding waste. Returns (tile, padded) with tile | padded."""
    n_q = _round_up(n, quantum)
    max_t = max(quantum, (max_tile // quantum) * quantum)
    if n_q <= max_t:
        return n_q, n_q
    floor = max(quantum, (max_t // 2 // quantum) * quantum)
    best_t, best_pad = None, None
    t = max_t
    while t >= floor:
        padded = _round_up(n_q, t)
        if best_pad is None or padded < best_pad:
            best_t, best_pad = t, padded
        t -= quantum
    return best_t, best_pad


def _divisor_tile(n, cap, quantum):
    """Largest multiple of `quantum` dividing n (n % quantum == 0), <= cap."""
    t = max(quantum, (min(cap, n) // quantum) * quantum)
    while t > quantum:
        if n % t == 0:
            return t
        t -= quantum
    return quantum


def spectral_kernel_forward(x1, x2, omega, phase, measure, *,
                            variance=1.0, normalizer=1.0,
                            tm=512, tn=1024, tk_max=2048,
                            vmem_budget=24 * 1024 * 1024):
    """K[i,j] = (variance/normalizer)*(2/L)*sum_l S_l cos(<x1_i,w_l>+b_l)cos(<x2_j,w_l>+b_l)."""
    n1, d = x1.shape
    n2, _ = x2.shape
    _, l = omega.shape

    # Tile / padding selection with minimal padding waste.
    #   N1 rows: sublane axis of bf16 phi1  -> quantum 16.
    #   N2 cols and L: lane axes somewhere  -> quantum 128 (lane-dense stores).
    # Tiles are clamped to the problem, so on large problems the two parallel
    # grid axes have >= 2 steps (v7x megacore sharding stays effective).
    tm_e, n1p = _pick_tile(n1, tm, 16)
    tn_e, n2p = _pick_tile(n2, tn, 128)

    # Reduction (L) tile: single K step whenever the bf16 operand tiles
    # (double-buffered) + f32 output tile fit the VMEM budget.
    lp0 = _round_up(l, 128)
    out_tile_bytes = 2 * tm_e * tn_e * 4

    def gram_vmem(tk):
        return 2 * 2 * tk * (tm_e + tn_e) + out_tile_bytes

    if gram_vmem(lp0) <= vmem_budget:
        tk_e, lp = lp0, lp0                       # single reduction step
    else:
        cap = (vmem_budget - out_tile_bytes) // (4 * (tm_e + tn_e))
        cap = max(128, min(tk_max, (cap // 128) * 128))
        tk_e, lp = _pick_tile(l, cap, 128)
    vmem_limit = int(max(32 * 1024 * 1024,
                         gram_vmem(tk_e) * 1.4 + 2 * 1024 * 1024))

    f32 = jnp.float32
    x1p = _pad2(x1.astype(f32), (n1p, d))
    x2p = _pad2(x2.astype(f32), (n2p, d))
    omegap = _pad2(omega.astype(f32), (d, lp))
    phasep = _pad2(phase.reshape(1, -1).astype(f32), (1, lp))
    # Transposed-layout parameters for the phi2 feature kernel (tiny arrays).
    omega_t = _pad2(omega.T.astype(f32), (lp, d))
    phase_t = _pad2(phase.reshape(-1, 1).astype(f32), (lp, 1))
    # Fold the spectral measure, 2/L and variance/normalizer into the x2
    # features; padded L rows carry zero weight -> they contribute nothing.
    scale = (2.0 / l) * (variance / normalizer)
    weight_t = _pad2((measure.reshape(-1, 1) * scale).astype(f32), (lp, 1))

    # Feature-kernel tiles: modest caps, exact divisors of the padded dims.
    ftr1 = _divisor_tile(n1p, 512, 16)
    ftc1 = _divisor_tile(lp, 512, 128)
    ftr2 = _divisor_tile(n2p, 256, 128)
    ftc2 = _divisor_tile(lp, 512, 128)

    phi1 = _compute_features(x1p, omegap, phasep, ftr1, ftc1)           # (n1p, lp)
    phi2t = _compute_features_t(x2p, omega_t, phase_t, weight_t,
                                ftr2, ftc2)                             # (lp, n2p)

    gram = _compute_gram(phi1, phi2t, tm_e, tn_e, tk_e, vmem_limit)
    return gram[:n1, :n2]


def _reference(x1, x2, omega, phase, measure, variance=1.0, normalizer=1.0):
    l = omega.shape[-1]
    hi = lax.Precision.HIGHEST
    phi1 = jnp.cos(jnp.dot(x1, omega, precision=hi) + phase.reshape(1, -1))
    phi2 = jnp.cos(jnp.dot(x2, omega, precision=hi) + phase.reshape(1, -1))
    cov = (2.0 / l) * jnp.dot(phi1 * measure.reshape(1, -1), phi2.T, precision=hi)
    return (variance / normalizer) * cov


if __name__ == "__main__":
    # Small deterministic setup consistent with forward(x1, x2) -> [N1, N2].
    N1, N2, D, L = 64, 200, 8, 384
    key = jax.random.PRNGKey(0)
    k_x1, k_x2, k_om, k_ph = jax.random.split(key, 4)

    x1 = jax.random.normal(k_x1, (N1, D), dtype=jnp.float32)
    x2 = jax.random.normal(k_x2, (N2, D), dtype=jnp.float32)

    # Deterministic "parameters" of the spectral kernel:
    #   frequencies ~ N(0, I), phases ~ U[0, 2pi),
    #   measure S(lambda_l) = exp(-0.5 * lengthscale^2 * ||omega_l||^2)
    # TODO(synk): manifold.generate_lb_eigenspaces / manifold.rand / the
    # normalizer recomputation are training-time parameter construction (not
    # the forward hot path) and stay in plain JAX.
    omega = jax.random.normal(k_om, (D, L), dtype=jnp.float32)
    phase = (jax.random.uniform(k_ph, (1, L), dtype=jnp.float32)
             * (2.0 * math.pi))
    lengthscale = 0.7
    measure = jnp.exp(
        -0.5 * (lengthscale ** 2) * jnp.sum(omega ** 2, axis=0,
                                            keepdims=True)).astype(jnp.float32)

    ref = _reference(x1, x2, omega, phase, measure)

    # Default path: large tiles, single-step L reduction.
    out = jax.block_until_ready(
        spectral_kernel_forward(x1, x2, omega, phase, measure))
    assert out.shape == (N1, N2)
    assert jnp.allclose(out, ref, atol=1e-2, rtol=5e-2), \
        float(jnp.max(jnp.abs(out - ref)))

    # Forced small-tile path: exercises the multi-tile grid and the
    # multi-step reduction / in-place accumulation branch of the Gram kernel.
    out2 = jax.block_until_ready(
        spectral_kernel_forward(x1, x2, omega, phase, measure,
                                tm=16, tn=128, vmem_budget=64 * 1024))
    assert out2.shape == (N1, N2)
    assert jnp.allclose(out2, ref, atol=1e-2, rtol=5e-2), \
        float(jnp.max(jnp.abs(out2 - ref)))

    print("KERNEL_OK")
</pallas_src>

<mosaic_0001>
module attributes {stable_mosaic.version = 11 : i64} {
  func.func @_feature_kernel(%arg0: i32, %arg1: i32, %arg2: memref<64x8xf32, #tpu.memory_space<vmem>>, %arg3: memref<8x384xf32, #tpu.memory_space<vmem>>, %arg4: memref<1x384xf32, #tpu.memory_space<vmem>>, %arg5: memref<64x384xbf16, #tpu.memory_space<vmem>>) attributes {dimension_semantics = [#tpu.dimension_semantics<parallel>, #tpu.dimension_semantics<parallel>], iteration_bounds = array<i64: 1, 1>, scalar_prefetch = 0 : i64, scratch_operands = 0 : i64, tpu.core_type = #tpu.core_type<tc>, window_params = [{transform_indices = @transform_0, window_bounds = array<i64: 64, 8>}, {transform_indices = @transform_1, window_bounds = array<i64: 8, 384>}, {transform_indices = @transform_2, window_bounds = array<i64: 1, 384>}, {transform_indices = @transform_3, window_bounds = array<i64: 64, 384>}]} {
    %c0 = arith.constant 0 : index
    %c0_0 = arith.constant 0 : index
    %0 = vector.load %arg2[%c0, %c0_0] : memref<64x8xf32, #tpu.memory_space<vmem>>, vector<64x8xf32>
    %c0_1 = arith.constant 0 : index
    %c0_2 = arith.constant 0 : index
    %1 = vector.load %arg3[%c0_1, %c0_2] : memref<8x384xf32, #tpu.memory_space<vmem>>, vector<8x384xf32>
    %cst = arith.constant dense<0.000000e+00> : vector<64x384xf32>
    %2 = tpu.matmul %0, %1, %cst {dimension_numbers = #tpu.dot_dimension_numbers<[1], [0], [0], [1], [0, 0, 1, 1], [], []>} : vector<64x8xf32>, vector<8x384xf32>, vector<64x384xf32> -> vector<64x384xf32>
    %c0_3 = arith.constant 0 : index
    %c0_4 = arith.constant 0 : index
    %3 = vector.load %arg4[%c0_3, %c0_4] : memref<1x384xf32, #tpu.memory_space<vmem>>, vector<1x384xf32>
    %4 = vector.broadcast %3 : vector<1x384xf32> to vector<64x384xf32>
    %5 = arith.addf %2, %4 : vector<64x384xf32>
    %6 = math.cos %5 : vector<64x384xf32>
    %7 = arith.truncf %6 : vector<64x384xf32> to vector<64x384xbf16>
    %c0_5 = arith.constant 0 : index
    %c0_6 = arith.constant 0 : index
    %8 = vector.load %arg5[%c0_5, %c0_6] : memref<64x384xbf16, #tpu.memory_space<vmem>>, vector<64x384xbf16>
    tpu.vector_store %arg5[%c0_5, %c0_6], %7 {strides = array<i32>} : memref<64x384xbf16, #tpu.memory_space<vmem>>, vector<64x384xbf16>,
    return
  }
  func.func @transform_0(%arg0: i32, %arg1: i32) -> (i32, i32) {
    %c0_i32 = arith.constant 0 : i32
    %c0_i32_0 = arith.constant 0 : i32
    return %arg0, %c0_i32 : i32, i32
  }
  func.func @transform_1(%arg0: i32, %arg1: i32) -> (i32, i32) {
    %c0_i32 = arith.constant 0 : i32
    %c0_i32_0 = arith.constant 0 : i32
    return %c0_i32, %arg1 : i32, i32
  }
  func.func @transform_2(%arg0: i32, %arg1: i32) -> (i32, i32) {
    %c0_i32 = arith.constant 0 : i32
    %c0_i32_0 = arith.constant 0 : i32
    return %c0_i32, %arg1 : i32, i32
  }
  func.func @transform_3(%arg0: i32, %arg1: i32) -> (i32, i32) {
    %c0_i32 = arith.constant 0 : i32
    return %arg0, %arg1 : i32, i32
  }
}

</mosaic_0001>

<bundles_post_ra>
// kernel: tpu_custom_call.1
= control target key start
LH: loop header
LB: loop body
LE: loop exit
PB: predicated region body
PF: predicated region fallthrough
CT: control target
= control target key end

     0   :  { %vm43_vm0 = vcmask 64512   ;;  %v3266_v5 = vmov 0.0   ;;  %s5339_s0 = inlined_call_operand.vmem [shape: f32[64,8], index: 0, kind: input, shape index: {}]   ;;  %s5340_s1 = inlined_call_operand.vmem [shape: f32[8,384], index: 1, kind: input, shape index: {}]   ;;  %s5341_s2 = inlined_call_operand.vmem [shape: f32[1,384], index: 2, kind: input, shape index: {}]   ;;  %s5342_s3 = inlined_call_operand.hbm [shape: bf16[64,384], index: 3, kind: output, shape index: {}]  }
   0x1   :  { %v24_v0 = vld [vmem:[%s5340_s1 + $0x8] sm:$0xff]  ;;  %v23_v1 = vld [vmem:[%s5340_s1] sm:$0xff]  ;;  %v21_v3 = vld [vmem:[%s5339_s0 + $0x30] sm:$0xff]  ;;  %132 = vmatprep.mubr.f32.mxu0 %v3266_v5  ;;  %168 = vmatprep.mubr.f32.mxu1 %v3266_v5 }
   0x2   :  { %68 = vmatprep.subr.mxu0 %v24_v0  ;;  %3037 = vmatprep.subr.mxu1 %v24_v0  ;;  %v15_v2 = vld [vmem:[%s5339_s0] sm:$0xff]  ;;  %v25_v4 = vld [vmem:[%s5340_s1 + $0x10] sm:$0xff] }
   0x3   :  { %69 = vmatpush1.msra.mxu0 %v23_v1  ;;  %3038 = vmatpush1.msra.mxu1 %v23_v1 }
   0x4   :  { %2870 = vmatmul.mubr.msk.f32.vlgmr.msra.gmra.mrb[0].mxu0 %vm43_vm0, %v15_v2  ;;  %2876 = vmatmul.mubr.msk.f32.vlgmr.msra.gmra.mrb[0].mxu1 %vm43_vm0, %v21_v3 }
   0x5   :  { %8 = vsyncpa [#allocation3], 0  ;;  %3023 = vmatprep.subr.mxu1 %v25_v4  ;;  %138 = vmatprep.mubr.f32.mxu0 %v3266_v5  ;;  %v16_v6 = vld [vmem:[%s5339_s0 + $0x8] sm:$0xff]  ;;  %v22_v7 = vld [vmem:[%s5339_s0 + $0x38] sm:$0xff]  ;;  %v28_v12 = vlaneseq  ;;  %v3267_v58 = vmov 683565275  }
   0x6   :  { %3024 = vmatpush3.msra.mxu1 %v25_v4  ;;  %174 = vmatprep.mubr.f32.mxu1 %v3266_v5  ;;  %v17_v8 = vld [vmem:[%s5339_s0 + $0x10] sm:$0xff]  ;;  %v18_v9 = vld [vmem:[%s5339_s0 + $0x18] sm:$0xff]  ;;  %v19_v10 = vld [vmem:[%s5339_s0 + $0x20] sm:$0xff]  ;;  %v3268_v62 = vmov 2475754826  }
   0x7   :  { %v20_v11 = vld [vmem:[%s5339_s0 + $0x28] sm:$0xff]  ;;  %v3345_v13 = vshrl.u32 %v28_v12, 7  ;;  %v26_v15 = vld [vmem:[%s5341_s2] sm:$0x7]  ;;  %v3269_v0 = vmov 2131351028  }
   0x8   :  { %2871 = vmatmul.mubr.msk.f32.gmra.mrb[2].mxu0 %vm43_vm0, %v16_v6  ;;  %2877 = vmatmul.mubr.msk.f32.gmra.mrb[2].mxu1 %vm43_vm0, %v22_v7  ;;  %v3271_v4 = vmov 920167782  }
   0x9   :  { %144 = vmatprep.mubr.f32.mxu0 %v3266_v5  ;;  %3025 = vmatprep.mubr.msk.f32.mxu1 %vm43_vm0, %v15_v2  ;;  %v30_v14 = vsub.s32 0, %v3345_v13  ;;  %v34_v16 = vsub.s32 1, %v3345_v13  ;;  %v3270_v2 = vmov 2102212464  }
   0xb   :  { %v3352_v17 = vrot.slane %v26_v15, %v30_v14  ;;  %v3354_v18 = vrot.slane %v26_v15, %v34_v16 }
   0xc   :  { %2872 = vmatmul.mubr.msk.f32.gmra.mrb[4].mxu0 %vm43_vm0, %v17_v8  ;;  %3026 = vmatmul.mubr.msk.f32.vlgmr.msra.gmra.mrb[4].mxu1 %vm43_vm0, %v16_v6 }
   0xd   :  { %150 = vmatprep.mubr.f32.mxu0 %v3266_v5  ;;  %3028 = vmatprep.mubr.msk.f32.mxu1 %vm43_vm0, %v17_v8 }
  0x10   :  { %2873 = vmatmul.mubr.msk.f32.gmra.mrb[6].mxu0 %vm43_vm0, %v18_v9  ;;  %3029 = vmatmul.mubr.msk.f32.gmra.mrb[6].mxu1 %vm43_vm0, %v18_v9 }
  0x11   :  { %156 = vmatprep.mubr.f32.mxu0 %v3266_v5  ;;  %3031 = vmatprep.mubr.msk.f32.mxu1 %vm43_vm0, %v19_v10 }
  0x14   :  { %2874 = vmatmul.mubr.msk.f32.gmra.mrb[8].mxu0 %vm43_vm0, %v19_v10  ;;  %3032 = vmatmul.mubr.msk.f32.gmra.mrb[8].mxu1 %vm43_vm0, %v20_v11 }
  0x15   :  { %162 = vmatprep.mubr.f32.mxu0 %v3266_v5  ;;  %3034 = vmatprep.mubr.msk.f32.mxu1 %vm43_vm0, %v21_v3 }
  0x18   :  { %2875 = vmatmul.mubr.msk.f32.gmra.mrb[10].mxu0 %vm43_vm0, %v20_v11  ;;  %3035 = vmatmul.mubr.msk.f32.gmra.mrb[10].mxu1 %vm43_vm0, %v22_v7  ;;  %v3272_v11 = vmov 1326507024  }
  0xd7   :  { %v134_v19 = vpop.f32.mrb[0].mxu0  ;;  %v170_v20 = vpop.f32.mrb[0].mxu1 }
  0xd8   :  { %v3357_v21 = vadd.f32 %v134_v19, %v3352_v17  ;;  %v3360_v22 = vadd.f32 %v170_v20, %v3352_v17  ;;  %v136_v23 = vpop.f32.mrb[1].mxu0  ;;  %v172_v24 = vpop.f32.mrb[1].mxu1 }
  0xd9   :  { %v3363_v25 = vadd.f32 %v136_v23, %v3354_v18  ;;  %v3384_v52 = vadd.f32 %v172_v24, %v3354_v18 }
  0xda   :  { %v286_v26 = vand.u32 2147483647, %v3357_v21  ;;  %v289_v27 = vand.u32 2139095040, %v3357_v21  ;;  %v2140_v28 = vand.u32 2147483647, %v3360_v22  ;;  %v2143_v29 = vand.u32 2139095040, %v3360_v22 }
  0xdb   :  { %v3369_v30 = vpop.f32.mrb[2].mxu0  ;;  %v3371_v31 = vpop.f32.mrb[2].mxu1  ;;  %v392_v36 = vand.u32 2139095040, %v3363_v25  ;;  %v389_v46 = vand.u32 2147483647, %v3363_v25  ;;  %vm288_vm14 = vcmp.lt.s32.totalorder %v3357_v21, 0 }
  0xdc   :  { %v290_v32 = vshrl.u32 %v289_v27, 23  ;;  %v293_v33 = vand.u32 8388607, %v286_v26  ;;  %v2144_v34 = vshrl.u32 %v2143_v29, 23  ;;  %v2147_v35 = vand.u32 8388607, %v2140_v28 }
  0xdd   :  { %v3378_v38 = vpop.f32.mrb[3].mxu0  ;;  %v3380_v39 = vpop.f32.mrb[3].mxu1  ;;  %v393_v41 = vshrl.u32 %v392_v36, 23  ;;  %v3392_v55 = vand.u32 8388607, %v389_v46 }
  0xde   :  { %v2886_v37 = vadd.s32 4294967169, %v290_v32  ;;  %v2958_v40 = vadd.s32 4294967169, %v2144_v34  ;;  %v294_v42 = vor.u32 8388608, %v293_v33  ;;  %v2148_v44 = vor.u32 8388608, %v2147_v35 }
  0xdf   :  { %v2890_v47 = vadd.s32 4294967169, %v393_v41 }
  0xe0   :  { %v296_v43 = vadd.s32 1, %v2886_v37  ;;  %v2150_v45 = vadd.s32 1, %v2958_v40  ;;  %v3386_v53 = vshll.u32 %v294_v42, 8  ;;  %v3388_v54 = vshll.u32 %v2148_v44, 8 }
  0xe1   :  { %v3394_v56 = vadd.s32 1, %v2890_v47 }
  0xe2   :  { %vm297_vm1 = vcmp.gt.s32.totalorder %v296_v43, 0  ;;  %vm2151_vm2 = vcmp.gt.s32.totalorder %v2150_v45, 0 }
  0xe3   :  { %v298_v48 = vsel %vm297_vm1, %v296_v43, 0  ;;  %v2152_v51 = vsel %vm2151_vm2, %v2150_v45, 0  ;;  %vm400_vm7 = vcmp.gt.s32.totalorder %v3394_v56, 0 }
  0xe4   :  { %v299_v49 = vshrl.u32 %v298_v48, 5  ;;  %v300_v50 = vand.u32 31, %v298_v48  ;;  %v3397_v60 = vshrl.u32 %v2152_v51, 5  ;;  %v2154_v61 = vand.u32 31, %v2152_v51 }
  0xe6   :  { %v301_v57 = vsub.s32 32, %v300_v50  ;;  %v303_v59 = vshll.u32 %v3267_v58, %v300_v50  ;;  %v306_v63 = vshll.u32 %v3268_v62, %v300_v50  ;;  %v309_v1 = vshll.u32 %v3269_v0, %v300_v50 }
  0xe7   :  { %v312_v3 = vshll.u32 %v3270_v2, %v300_v50  ;;  %v315_v5 = vshll.u32 %v3271_v4, %v300_v50  ;;  %vm318_vm3 = vcmp.lt.s32.totalorder %v299_v49, 1  ;;  %vm319_vm4 = vcmp.lt.s32.totalorder %v299_v49, 2 }
  0xe8   :  { %v304_v6 = vshrl.u32 %v3268_v62, %v301_v57  ;;  %v307_v7 = vshrl.u32 %v3269_v0, %v301_v57  ;;  %v310_v8 = vshrl.u32 %v3270_v2, %v301_v57  ;;  %v302_v9 = vshrl.u32 %v3267_v58, %v301_v57 }
  0xe9   :  { %v313_v10 = vshrl.u32 %v3271_v4, %v301_v57  ;;  %v316_v12 = vshrl.u32 %v3272_v11, %v301_v57  ;;  %v2155_v19 = vsub.s32 32, %v2154_v61  ;;  %vm320_vm5 = vcmp.lt.s32.totalorder %v299_v49, 3 }
  0xea   :  { %v305_v14 = vor.u32 %v304_v6, %v303_v59  ;;  %v308_v15 = vor.u32 %v307_v7, %v306_v63  ;;  %v311_v16 = vor.u32 %v310_v8, %v309_v1  ;;  %vm321_vm6 = vcmp.lt.s32.totalorder %v299_v49, 4 }
  0xeb   :  { %v314_v20 = vor.u32 %v313_v10, %v312_v3  ;;  %v317_v23 = vor.u32 %v316_v12, %v315_v5  ;;  %v2157_v36 = vshll.u32 %v3267_v58, %v2154_v61  ;;  %v2158_v41 = vshrl.u32 %v3268_v62, %v2155_v19 }
  0xec   :  { %v322_v24 = vsel %vm318_vm3, %v302_v9, %v305_v14  ;;  %v323_v27 = vsel %vm321_vm6, %v311_v16, 2102212464  ;;  %v326_v29 = vsel %vm318_vm3, %v305_v14, %v308_v15  ;;  %v330_v32 = vsel %vm318_vm3, %v308_v15, %v311_v16 }
  0xed   :  { %v324_v33 = vsel %vm320_vm5, %v308_v15, %v323_v27  ;;  %v327_v34 = vsel %vm321_vm6, %v314_v20, 920167782  ;;  %v331_v35 = vsel %vm321_vm6, %v317_v23, 1326507024  ;;  %v2160_v42 = vshll.u32 %v3268_v62, %v2154_v61 }
  0xee   :  { %v328_v37 = vsel %vm320_vm5, %v311_v16, %v327_v34  ;;  %v332_v40 = vsel %vm320_vm5, %v314_v20, %v331_v35  ;;  %v325_v43 = vsel %vm319_vm4, %v322_v24, %v324_v33  ;;  %v2161_v47 = vshrl.u32 %v3269_v0, %v2155_v19 }
  0xef   :  { %v329_v44 = vsel %vm319_vm4, %v326_v29, %v328_v37  ;;  %v333_v45 = vsel %vm319_vm4, %v330_v32, %v332_v40  ;;  %v2159_v59 = vor.u32 %v2158_v41, %v2157_v36  ;;  %v2163_v1 = vshll.u32 %v3269_v0, %v2154_v61 }
  0xf0   :  { %v3421_v48 = vmul.u32.u64.low %v3386_v53, %v333_v45  ;;  %v3422_v50 = vmul.u32.u64.high %v3386_v53, %v333_v45, %v3421_v48  ;;  %v3425_v51 = vmul.u32.u64.low %v3386_v53, %v329_v44  ;;  %v3426_v57 = vmul.u32.u64.high %v3386_v53, %v329_v44, %v3425_v51 }
  0xf1   :  { %v2162_v63 = vor.u32 %v2161_v47, %v2160_v42  ;;  %v2164_v3 = vshrl.u32 %v3270_v2, %v2155_v19  ;;  %v2156_v49 = vshrl.u32 %v3267_v58, %v2155_v19  ;;  %v2166_v5 = vshll.u32 %v3270_v2, %v2154_v61 }
  0xf2   :  { %v2167_v6 = vshrl.u32 %v3271_v4, %v2155_v19  ;;  %v2170_v7 = vshrl.u32 %v3272_v11, %v2155_v19  ;;  %v341_v8 = vmul.u32 %v3386_v53, %v325_v43  ;;  %v2169_v10 = vshll.u32 %v3271_v4, %v2154_v61 }
  0xf3   :  { %v2165_v9 = vor.u32 %v2164_v3, %v2163_v1  ;;  %vm2172_vm8 = vcmp.lt.s32.totalorder %v3397_v60, 1  ;;  %vm343_vm9 = vc.u32 %v3422_v50, %v3425_v51  ;;  %v344_v12 = vadd.s32 1, %v3426_v57 }
  0xf4   :  { %v2168_v14 = vor.u32 %v2167_v6, %v2166_v5  ;;  %vm2173_vm10 = vcmp.lt.s32.totalorder %v3397_v60, 2  ;;  %v2171_v15 = vor.u32 %v2170_v7, %v2169_v10  ;;  %vm2174_vm11 = vcmp.lt.s32.totalorder %v3397_v60, 3 }
  0xf5   :  { %vm2175_vm12 = vcmp.lt.s32.totalorder %v3397_v60, 4  ;;  %v2180_v16 = vsel %vm2172_vm8, %v2159_v59, %v2162_v63  ;;  %v345_v53 = vsel %vm343_vm9, %v344_v12, %v3426_v57  ;;  %v2184_v20 = vsel %vm2172_vm8, %v2162_v63, %v2165_v9  ;;  %v3467_v57 = vpop.f32.mrb[4].mxu0 }
  0xf6   :  { %v2177_v19 = vsel %vm2175_vm12, %v2165_v9, 2102212464  ;;  %v2181_v61 = vsel %vm2175_vm12, %v2168_v14, 920167782  ;;  %v346_v23 = vadd.s32 %v345_v53, %v341_v8  ;;  %v2176_v24 = vsel %vm2172_vm8, %v2156_v49, %v2159_v59 }
  0xf7   :  { %v2182_v27 = vsel %vm2174_vm11, %v2165_v9, %v2181_v61  ;;  %v2185_v29 = vsel %vm2175_vm12, %v2171_v15, 1326507024  ;;  %v2178_v32 = vsel %vm2174_vm11, %v2162_v63, %v2177_v19  ;;  %v401_v35 = vsel %vm400_vm7, %v3394_v56, 0 }
  0xf8   :  { %v2183_v33 = vsel %vm2173_vm10, %v2180_v16, %v2182_v27  ;;  %v2186_v34 = vsel %vm2174_vm11, %v2168_v14, %v2185_v29  ;;  %v347_v36 = vadd.s32 536870912, %v346_v23  ;;  %v2179_v45 = vsel %vm2173_vm10, %v2176_v24, %v2178_v32 }
  0xf9   :  { %v2187_v37 = vsel %vm2173_vm10, %v2184_v20, %v2186_v34  ;;  %v3453_v40 = vmul.u32.u64.low %v3388_v54, %v2183_v33  ;;  %v3454_v41 = vmul.u32.u64.high %v3388_v54, %v2183_v33, %v3453_v40  ;;  %v403_v47 = vand.u32 31, %v401_v35 }
  0xfa   :  { %v3458_v42 = vmul.u32.u64.low %v3388_v54, %v2187_v37  ;;  %v3459_v43 = vmul.u32.u64.high %v3388_v54, %v2187_v37, %v3458_v42  ;;  %v3461_v44 = vshrl.u32 %v347_v36, 30  ;;  %v2246_v56 = vand.u32 2139095040, %v3384_v52 }
  0xfb   :  { %v2243_v48 = vand.u32 2147483647, %v3384_v52  ;;  %v2198_v63 = vadd.s32 1, %v3454_v41  ;;  %v397_v1 = vor.u32 8388608, %v3392_v55  ;;  %v404_v3 = vsub.s32 32, %v403_v47 }
  0xfc   :  { %v349_v59 = vshll.u32 %v3461_v44, 30  ;;  %v2195_v49 = vmul.u32 %v3388_v54, %v2179_v45  ;;  %vm2197_vm13 = vc.u32 %v3459_v43, %v3453_v40  ;;  %v2247_v6 = vshrl.u32 %v2246_v56, 23 }
  0xfd   :  { %v2199_v5 = vsel %vm2197_vm13, %v2198_v63, %v3454_v41  ;;  %v407_v8 = vshrl.u32 %v3268_v62, %v404_v3  ;;  %v410_v9 = vshrl.u32 %v3269_v0, %v404_v3  ;;  %v3482_v10 = vand.u32 8388607, %v2243_v48 }
  0xfe   :  { %v3475_v60 = vsub.s32 %v346_v23, %v349_v59  ;;  %v2200_v7 = vadd.s32 %v2199_v5, %v2195_v49  ;;  %v406_v54 = vshll.u32 %v3267_v58, %v403_v47  ;;  %v413_v12 = vshrl.u32 %v3270_v2, %v404_v3 }
  0xff   :  { %v3487_v14 = vshll.u32 %v397_v1, 8  ;;  %v342_v15 = vadd.s32 %v3425_v51, %v3422_v50  ;;  %v402_v53 = vshrl.u32 %v401_v35, 5  ;;  %v409_v19 = vshll.u32 %v3268_v62, %v403_v47 }
 0x100   :  { %v352_v55 = vsub.s32 0, %v3475_v60  ;;  %v2201_v16 = vadd.s32 536870912, %v2200_v7  ;;  %v408_v20 = vor.u32 %v407_v8, %v406_v54  ;;  %v412_v23 = vshll.u32 %v3269_v0, %v403_v47 }
 0x101   :  { %v2962_v24 = vadd.s32 4294967169, %v2247_v6  ;;  %v411_v29 = vor.u32 %v410_v9, %v409_v19  ;;  %v415_v32 = vshll.u32 %v3270_v2, %v403_v47  ;;  %v416_v33 = vshrl.u32 %v3271_v4, %v404_v3 }
 0x102   :  { %v2887_v61 = vmin.u32 %v352_v55, %v3475_v60  ;;  %v3495_v27 = vshrl.u32 %v2201_v16, 30  ;;  %v414_v36 = vor.u32 %v413_v12, %v412_v23  ;;  %v418_v50 = vshll.u32 %v3271_v4, %v403_v47 }
 0x103   :  { %v419_v51 = vshrl.u32 %v3272_v11, %v404_v3  ;;  %v417_v37 = vor.u32 %v416_v33, %v415_v32  ;;  %vm421_vm15 = vcmp.lt.s32.totalorder %v402_v53, 1  ;;  %vm422_vm0 = vcmp.lt.s32.totalorder %v402_v53, 2 }
 0x104   :  { %v354_v34 = vclz %v2887_v61  ;;  %v2203_v35 = vshll.u32 %v3495_v27, 30  ;;  %v372_v42 = vsub.s32 4, %v3461_v44  ;;  %vm424_vm1 = vcmp.lt.s32.totalorder %v402_v53, 4 }
 0x105   :  { %v420_v45 = vor.u32 %v419_v51, %v418_v50  ;;  %vm423_vm2 = vcmp.lt.s32.totalorder %v402_v53, 3  ;;  %v429_v59 = vsel %vm421_vm15, %v408_v20, %v411_v29  ;;  %v430_v63 = vsel %vm424_vm1, %v417_v37, 920167782 }
 0x106   :  { %v2888_v41 = vadd.s32 4294967294, %v354_v34  ;;  %v3503_v56 = vsub.s32 %v2200_v7, %v2203_v35  ;;  %v426_v47 = vsel %vm424_vm1, %v414_v36, 2102212464  ;;  %v431_v1 = vsel %vm423_vm2, %v414_v36, %v430_v63 }
 0x107   :  { %v434_v49 = vsel %vm424_vm1, %v420_v45, 1326507024  ;;  %v405_v8 = vshrl.u32 %v3267_v58, %v404_v3  ;;  %v433_v9 = vsel %vm421_vm15, %v411_v29, %v414_v36  ;;  %v373_v7 = vsel %vm288_vm14, %v372_v42, %v3461_v44 }
 0x108   :  { %vm2889_vm3 = vcmp.lt.s32.totalorder %v2888_v41, 0  ;;  %v2206_v6 = vsub.s32 0, %v3503_v56  ;;  %v435_v12 = vsel %vm423_vm2, %v417_v37, %v434_v49  ;;  %v427_v61 = vsel %vm423_vm2, %v411_v29, %v426_v47 }
 0x109   :  { %v357_v5 = vsel %vm2889_vm3, 0, %v2888_v41  ;;  %v425_v19 = vsel %vm421_vm15, %v405_v8, %v408_v20  ;;  %v432_v23 = vsel %vm422_vm0, %v429_v59, %v431_v1  ;;  %v436_v34 = vsel %vm422_vm0, %v433_v9, %v435_v12 }
 0x10a   :  { %v358_v55 = vsub.s32 32, %v357_v5  ;;  %v362_v54 = vsub.s32 4294967266, %v357_v5  ;;  %v2959_v16 = vmin.u32 %v2206_v6, %v3503_v56  ;;  %v359_v3 = vshll.u32 %v3475_v60, %v357_v5 }
 0x10b   :  { %v3521_v50 = vmul.u32.u64.low %v3487_v14, %v436_v34  ;;  %v3522_v44 = vmul.u32.u64.high %v3487_v14, %v436_v34, %v3521_v50  ;;  %v2253_v51 = vadd.s32 1, %v2962_v24  ;;  %vm3531_vm4 = vcmp.le.f32.partialorder %v286_v26, 0.7853982 }
 0x10c   :  { %v360_v32 = vshrl.u32 %v342_v15, %v358_v55  ;;  %v363_v33 = vadd.s32 127, %v362_v54  ;;  %v2208_v36 = vclz %v2959_v16  ;;  %v428_v42 = vsel %vm422_vm0, %v425_v19, %v427_v61 }
 0x10d   :  { %v3525_v20 = vmul.u32.u64.low %v3487_v14, %v432_v23  ;;  %v3526_v41 = vmul.u32.u64.high %v3487_v14, %v432_v23, %v3525_v20  ;;  %vm2254_vm5 = vcmp.gt.s32.totalorder %v2253_v51, 0  ;;  %v2251_v24 = vor.u32 8388608, %v3482_v10 }
 0x10e   :  { %v361_v35 = vor.u32 %v360_v32, %v359_v3  ;;  %v364_v37 = vshll.u32 %v363_v33, 23  ;;  %v2960_v15 = vadd.s32 4294967294, %v2208_v36  ;;  %v2255_v45 = vsel %vm2254_vm5, %v2253_v51, 0 }
 0x10f   :  { %v375_v63 = vsel %vm3531_vm4, 0, %v373_v7  ;;  %vm446_vm7 = vc.u32 %v3522_v44, %v3525_v20  ;;  %v447_v1 = vadd.s32 1, %v3526_v41  ;;  %v2257_v49 = vand.u32 31, %v2255_v45 }
 0x110   :  { %v365_v29 = vor.u32 4788187, %v364_v37  ;;  %v368_v59 = vcvt.s32.f32 %v361_v35  ;;  %vm2961_vm6 = vcmp.lt.s32.totalorder %v2960_v15, 0  ;;  %v2196_v53 = vadd.s32 %v3453_v40, %v3459_v43 }
 0x111   :  { %v2211_v47 = vsel %vm2961_vm6, 0, %v2960_v15  ;;  %v444_v10 = vmul.u32 %v3487_v14, %v428_v42  ;;  %v3545_v9 = vand.u32 3, %v375_v63  ;;  %v448_v55 = vsel %vm446_vm7, %v447_v1, %v3526_v41 }
 0x112   :  { %v366_v26 = vand.u32 2147483647, %v365_v29  ;;  %v2212_v5 = vsub.s32 32, %v2211_v47  ;;  %v2216_v6 = vsub.s32 4294967266, %v2211_v47  ;;  %v2258_v54 = vsub.s32 32, %v2257_v49 }
 0x113   :  { %vm2142_vm8 = vcmp.lt.s32.totalorder %v3360_v22, 0  ;;  %v2213_v7 = vshll.u32 %v3503_v56, %v2211_v47  ;;  %v449_v19 = vadd.s32 %v448_v55, %v444_v10  ;;  %v2226_v40 = vsub.s32 4, %v3495_v27 }
 0x114   :  { %v369_v8 = vmul.f32 %v368_v59, %v366_v26  ;;  %v2214_v12 = vshrl.u32 %v2196_v53, %v2212_v5  ;;  %v2217_v16 = vadd.s32 127, %v2216_v6  ;;  %v3551_v43 = vshrl.u32 %v2255_v45, 5 }
 0x115   :  { %v2261_v14 = vshrl.u32 %v3268_v62, %v2258_v54  ;;  %v450_v32 = vadd.s32 536870912, %v449_v19  ;;  %v2260_v33 = vshll.u32 %v3267_v58, %v2257_v49  ;;  %v2263_v56 = vshll.u32 %v3268_v62, %v2257_v49 }
 0x116   :  { %v370_v61 = vxor.u32 2147483648, %v369_v8  ;;  %v2215_v23 = vor.u32 %v2214_v12, %v2213_v7  ;;  %v2218_v3 = vshll.u32 %v2217_v16, 23  ;;  %v2264_v36 = vshrl.u32 %v3269_v0, %v2258_v54 }
 0x117   :  { %v2267_v50 = vshrl.u32 %v3270_v2, %v2258_v54  ;;  %v3563_v37 = vshrl.u32 %v450_v32, 30  ;;  %v2266_v41 = vshll.u32 %v3269_v0, %v2257_v49  ;;  %v2262_v15 = vor.u32 %v2261_v14, %v2260_v33 }
 0x118   :  { %v371_v34 = vsel %vm288_vm14, %v370_v61, %v369_v8  ;;  %v2219_v35 = vor.u32 4788187, %v2218_v3  ;;  %v2269_v29 = vshll.u32 %v3270_v2, %v2257_v49  ;;  %v2270_v42 = vshrl.u32 %v3271_v4, %v2258_v54  ;;  %v3614_v3 = vpop.f32.mrb[4].mxu1 }
 0x119   :  { %v374_v51 = vsel %vm3531_vm4, %v3357_v21, %v371_v34  ;;  %v2222_v59 = vcvt.s32.f32 %v2215_v23  ;;  %v452_v63 = vshll.u32 %v3563_v37, 30  ;;  %v2265_v26 = vor.u32 %v2264_v36, %v2263_v56 }
 0x11a   :  { %3145 = vcosq.f32 %v374_v51  ;;  %v2220_v45 = vand.u32 2147483647, %v2219_v35  ;;  %v2268_v47 = vor.u32 %v2267_v50, %v2266_v41  ;;  %v2271_v60 = vor.u32 %v2270_v42, %v2269_v29 }
 0x11b   :  { %3147 = vsinq.f32 %v374_v51  ;;  %v2273_v1 = vshrl.u32 %v3272_v11, %v2258_v54  ;;  %vm3572_vm9 = vcmp.le.f32.partialorder %v2140_v28, 0.7853982  ;;  %v3576_v6 = vsub.s32 %v449_v19, %v452_v63 }
 0x11c   :  { %v2223_v5 = vmul.f32 %v2222_v59, %v2220_v45  ;;  %v2272_v10 = vshll.u32 %v3271_v4, %v2257_v49  ;;  %vm384_vm10 = vcmp.eq.s32.totalorder %v3545_v9, 2  ;;  %v3583_v8 = vsel %vm2142_vm8, %v2226_v40, %v3495_v27 }
 0x11d   :  { %vm2275_vm11 = vcmp.lt.s32.totalorder %v3551_v43, 1  ;;  %v2291_v55 = vshll.u32 %v2251_v24, 8  ;;  %v3588_v28 = vadd.f32 %v3369_v30, %v3352_v17  ;;  %vm381_vm12 = vcmp.eq.s32.totalorder %v3545_v9, 0 }
 0x11e   :  { %v2224_v7 = vxor.u32 2147483648, %v2223_v5  ;;  %v455_v12 = vsub.s32 0, %v3576_v6  ;;  %v2274_v49 = vor.u32 %v2273_v1, %v2272_v10  ;;  %vm2278_vm13 = vcmp.lt.s32.totalorder %v3551_v43, 4 }
 0x11f   :  { %vm380_vm14 = vcmp.lt.s32.totalorder %v3545_v9, 2  ;;  %v2259_v27 = vshrl.u32 %v3267_v58, %v2258_v54  ;;  %v2280_v16 = vsel %vm2278_vm13, %v2268_v47, 2102212464  ;;  %v2283_v24 = vsel %vm2275_vm11, %v2262_v15, %v2265_v26 }
 0x120   :  { %v2284_v30 = vsel %vm2278_vm13, %v2271_v60, 920167782  ;;  %vm378_vm15 = vweird.f32 %v3357_v21  ;;  %v2225_v19 = vsel %vm2142_vm8, %v2224_v7, %v2223_v5  ;;  %v2891_v61 = vmin.u32 %v455_v12, %v3576_v6 }
 0x121   :  { %vm2276_vm0 = vcmp.lt.s32.totalorder %v3551_v43, 2  ;;  %vm2277_vm1 = vcmp.lt.s32.totalorder %v3551_v43, 3  ;;  %v2228_v54 = vsel %vm3572_vm9, %v3360_v22, %v2225_v19  ;;  %v2279_v40 = vsel %vm2275_vm11, %v2259_v27, %v2262_v15 }
 0x122   :  { %v2285_v14 = vsel %vm2277_vm1, %v2268_v47, %v2284_v30  ;;  %v2287_v23 = vsel %vm2275_vm11, %v2265_v26, %v2268_v47  ;;  %v457_v32 = vclz %v2891_v61  ;;  %v2281_v33 = vsel %vm2277_vm1, %v2265_v26, %v2280_v16 }
 0x123   :  { %v2286_v34 = vsel %vm2276_vm0, %v2283_v24, %v2285_v14  ;;  %v2288_v56 = vsel %vm2278_vm13, %v2274_v49, 1326507024  ;;  %3149 = vcosq.f32 %v2228_v54  ;;  %v2282_v59 = vsel %vm2276_vm0, %v2279_v40, %v2281_v33 }
 0x124   :  { %v3146_v36 = vpop.eup %3145  ;;  %v2289_v50 = vsel %vm2277_vm1, %v2271_v60, %v2288_v56  ;;  %v3620_v51 = vmul.u32.u64.low %v2291_v55, %v2286_v34  ;;  %v3621_v35 = vmul.u32.u64.high %v2291_v55, %v2286_v34, %v3620_v51  ;;  %3151 = vsinq.f32 %v2228_v54 }
 0x125   :  { %v3148_v41 = vpop.eup %3147  ;;  %v385_v15 = vxor.u32 2147483648, %v3146_v36  ;;  %v2892_v29 = vadd.s32 4294967294, %v457_v32  ;;  %v2290_v42 = vsel %vm2276_vm0, %v2287_v23, %v2289_v50  ;;  %v445_v60 = vadd.s32 %v3525_v20, %v3522_v44  ;;  %v3655_v23 = vpop.f32.mrb[5].mxu0 }
 0x126   :  { %v382_v45 = vxor.u32 2147483648, %v3148_v41  ;;  %v3628_v63 = vmul.u32.u64.low %v2291_v55, %v2290_v42  ;;  %v3629_v26 = vmul.u32.u64.high %v2291_v55, %v2290_v42, %v3628_v63  ;;  %v598_v1 = vand.u32 2139095040, %v3588_v28 }
 0x127   :  { %v386_v47 = vsel %vm384_vm10, %v385_v15, %v3148_v41  ;;  %vm2893_vm2 = vcmp.lt.s32.totalorder %v2892_v29, 0  ;;  %v475_v7 = vsub.s32 4, %v3563_v37  ;;  %v2301_v43 = vadd.s32 1, %v3621_v35 }
 0x128   :  { %v383_v5 = vsel %vm381_vm12, %v3146_v36, %v382_v45  ;;  %v460_v10 = vsel %vm2893_vm2, 0, %v2892_v29  ;;  %v2298_v16 = vmul.u32 %v2291_v55, %v2282_v59  ;;  %vm2300_vm3 = vc.u32 %v3629_v26, %v3620_v51 }
 0x129   :  { %v387_v12 = vsel %vm380_vm14, %v383_v5, %v386_v47  ;;  %v461_v49 = vsub.s32 32, %v460_v10  ;;  %v465_v27 = vsub.s32 4294967266, %v460_v10  ;;  %v595_v20 = vand.u32 2147483647, %v3588_v28 }
 0x12a   :  { %v3644_v44 = vsel %vm378_vm15, nan, %v387_v12  ;;  %v599_v24 = vshrl.u32 %v598_v1, 23  ;;  %v462_v30 = vshll.u32 %v3576_v6, %v460_v10  ;;  %v2302_v9 = vsel %vm2300_vm3, %v2301_v43, %v3621_v35 }
 0x12b   :  { %v463_v19 = vshrl.u32 %v445_v60, %v461_v49  ;;  %v466_v61 = vadd.s32 127, %v465_v27  ;;  %v2229_v55 = vsel %vm3572_vm9, 0, %v3583_v8  ;;  %v2303_v54 = vadd.s32 %v2302_v9, %v2298_v16 }
 0x12c   :  { %v2898_v21 = vadd.s32 4294967169, %v599_v24  ;;  %vm391_vm4 = vcmp.lt.s32.totalorder %v3363_v25, 0  ;;  %v602_v34 = vand.u32 8388607, %v595_v20  ;;  %v3662_v8 = vand.u32 3, %v2229_v55 }
 0x12d   :  { %v464_v40 = vor.u32 %v463_v19, %v462_v30  ;;  %v467_v14 = vshll.u32 %v466_v61, 23  ;;  %v3150_v32 = vpop.eup %3149  ;;  %v476_v6 = vsel %vm391_vm4, %v475_v7, %v3563_v37  ;;  %v2304_v33 = vadd.s32 536870912, %v2303_v54 }
 0x12e   :  { %v605_v56 = vadd.s32 1, %v2898_v21  ;;  %v3152_v53 = vpop.eup %3151  ;;  %vm3666_vm5 = vcmp.le.f32.partialorder %v389_v46, 0.7853982  ;;  %v2239_v45 = vxor.u32 2147483648, %v3150_v32  ;;  %v603_v63 = vor.u32 8388608, %v602_v34 }
 0x12f   :  { %v468_v36 = vor.u32 4788187, %v467_v14  ;;  %v3670_v35 = vshrl.u32 %v2304_v33, 30  ;;  %v471_v37 = vcvt.s32.f32 %v464_v40  ;;  %v478_v15 = vsel %vm3666_vm5, 0, %v476_v6 }
 0x130   :  { %vm606_vm6 = vcmp.gt.s32.totalorder %v605_v56, 0  ;;  %v2236_v42 = vxor.u32 2147483648, %v3152_v53  ;;  %vm2235_vm7 = vcmp.eq.s32.totalorder %v3662_v8, 0  ;;  %vm2238_vm8 = vcmp.eq.s32.totalorder %v3662_v8, 2 }
 0x131   :  { %v469_v41 = vand.u32 2147483647, %v468_v36  ;;  %v607_v29 = vsel %vm606_vm6, %v605_v56, 0  ;;  %v2306_v59 = vshll.u32 %v3670_v35, 30  ;;  %v3677_v60 = vand.u32 3, %v478_v15 }
 0x132   :  { %v609_v47 = vand.u32 31, %v607_v29  ;;  %v3683_v5 = vadd.f32 %v3371_v31, %v3352_v17  ;;  %v2299_v7 = vadd.s32 %v3620_v51, %v3629_v26  ;;  %v3687_v43 = vshrl.u32 %v607_v29, 5  ;;  %v3718_v29 = vpop.f32.mrb[5].mxu1 }
 0x133   :  { %v472_v46 = vmul.f32 %v471_v37, %v469_v41  ;;  %v3679_v1 = vsub.s32 %v2303_v54, %v2306_v59  ;;  %v3689_v49 = vsel %vm2235_vm7, %v3150_v32, %v2236_v42  ;;  %v3691_v27 = vsel %vm2238_vm8, %v2239_v45, %v3152_v53 }
 0x134   :  { %v610_v12 = vsub.s32 32, %v609_v47  ;;  %v3694_v24 = vshll.u32 %v603_v63, 8  ;;  %v612_v31 = vshll.u32 %v3267_v58, %v609_v47  ;;  %v615_v9 = vshll.u32 %v3268_v62, %v609_v47 }
 0x135   :  { %v473_v10 = vxor.u32 2147483648, %v472_v46  ;;  %v2309_v16 = vsub.s32 0, %v3679_v1  ;;  %v2452_v55 = vand.u32 2139095040, %v3683_v5  ;;  %v618_v21 = vshll.u32 %v3269_v0, %v609_v47 }
 0x136   :  { %v613_v19 = vshrl.u32 %v3268_v62, %v610_v12  ;;  %v616_v51 = vshrl.u32 %v3269_v0, %v610_v12  ;;  %vm627_vm9 = vcmp.lt.s32.totalorder %v3687_v43, 1  ;;  %v619_v32 = vshrl.u32 %v3270_v2, %v610_v12 }
 0x137   :  { %v474_v30 = vsel %vm391_vm4, %v473_v10, %v472_v46  ;;  %v2963_v61 = vmin.u32 %v2309_v16, %v3679_v1  ;;  %v621_v6 = vshll.u32 %v3270_v2, %v609_v47  ;;  %v622_v33 = vshrl.u32 %v3271_v4, %v610_v12 }
 0x138   :  { %v477_v26 = vsel %vm3666_vm5, %v3363_v25, %v474_v30  ;;  %v614_v54 = vor.u32 %v613_v19, %v612_v31  ;;  %v617_v14 = vor.u32 %v616_v51, %v615_v9  ;;  %v624_v34 = vshll.u32 %v3271_v4, %v609_v47 }
 0x139   :  { %3153 = vcosq.f32 %v477_v26  ;;  %v2311_v40 = vclz %v2963_v61  ;;  %v625_v56 = vshrl.u32 %v3272_v11, %v610_v12  ;;  %v611_v36 = vshrl.u32 %v3267_v58, %v610_v12 }
 0x13a   :  { %3155 = vsinq.f32 %v477_v26  ;;  %v620_v50 = vor.u32 %v619_v32, %v618_v21  ;;  %vm628_vm10 = vcmp.lt.s32.totalorder %v3687_v43, 2  ;;  %vm2234_vm11 = vcmp.lt.s32.totalorder %v3662_v8, 2 }
 0x13b   :  { %v2964_v53 = vadd.s32 4294967294, %v2311_v40  ;;  %v623_v41 = vor.u32 %v622_v33, %v621_v6  ;;  %v626_v37 = vor.u32 %v625_v56, %v624_v34  ;;  %vm630_vm12 = vcmp.lt.s32.totalorder %v3687_v43, 4 }
 0x13c   :  { %v2453_v15 = vshrl.u32 %v2452_v55, 23  ;;  %vm484_vm13 = vcmp.eq.s32.totalorder %v3677_v60, 0  ;;  %vm629_vm15 = vcmp.lt.s32.totalorder %v3687_v43, 3  ;;  %v632_v42 = vsel %vm630_vm12, %v620_v50, 2102212464 }
 0x13d   :  { %vm2965_vm14 = vcmp.lt.s32.totalorder %v2964_v53, 0  ;;  %v635_v45 = vsel %vm627_vm9, %v614_v54, %v617_v14  ;;  %vm483_vm0 = vcmp.lt.s32.totalorder %v3677_v60, 2  ;;  %v636_v63 = vsel %vm630_vm12, %v623_v41, 920167782 }
 0x13e   :  { %v2314_v59 = vsel %vm2965_vm14, 0, %v2964_v53  ;;  %v639_v46 = vsel %vm627_vm9, %v617_v14, %v620_v50  ;;  %v640_v47 = vsel %vm630_vm12, %v626_v37, 1326507024  ;;  %vm481_vm1 = vweird.f32 %v3363_v25 }
 0x13f   :  { %v2315_v10 = vsub.s32 32, %v2314_v59  ;;  %v2319_v12 = vsub.s32 4294967266, %v2314_v59  ;;  %v631_v16 = vsel %vm627_vm9, %v611_v36, %v614_v54  ;;  %v633_v30 = vsel %vm629_vm15, %v617_v14, %v632_v42 }
 0x140   :  { %vm2245_vm2 = vcmp.lt.s32.totalorder %v3384_v52, 0  ;;  %v2316_v31 = vshll.u32 %v3679_v1, %v2314_v59  ;;  %v637_v19 = vsel %vm629_vm15, %v620_v50, %v636_v63  ;;  %v641_v51 = vsel %vm629_vm15, %v623_v41, %v640_v47 }
 0x141   :  { %v2970_v26 = vadd.s32 4294967169, %v2453_v15  ;;  %v2317_v61 = vshrl.u32 %v2299_v7, %v2315_v10  ;;  %v2320_v9 = vadd.s32 127, %v2319_v12  ;;  %v638_v55 = vsel %vm628_vm10, %v635_v45, %v637_v19 }
 0x142   :  { %v642_v54 = vsel %vm628_vm10, %v639_v46, %v641_v51  ;;  %v3747_v1 = vmul.u32.u64.low %v3694_v24, %v638_v55  ;;  %v3748_v32 = vmul.u32.u64.high %v3694_v24, %v638_v55, %v3747_v1  ;;  %v634_v56 = vsel %vm628_vm10, %v631_v16, %v633_v30 }
 0x143   :  { %v3154_v21 = vpop.eup %3153  ;;  %v3743_v40 = vmul.u32.u64.low %v3694_v24, %v642_v54  ;;  %v3744_v14 = vmul.u32.u64.high %v3694_v24, %v642_v54, %v3743_v40  ;;  %v2318_v7 = vor.u32 %v2317_v61, %v2316_v31  ;;  %v2321_v34 = vshll.u32 %v2320_v9, 23 }
 0x144   :  { %v3156_v6 = vpop.eup %3155  ;;  %v488_v33 = vxor.u32 2147483648, %v3154_v21  ;;  %vm487_vm3 = vcmp.eq.s32.totalorder %v3677_v60, 2  ;;  %v2449_v36 = vand.u32 2147483647, %v3683_v5  ;;  %v2459_v50 = vadd.s32 1, %v2970_v26 }
 0x145   :  { %v485_v53 = vxor.u32 2147483648, %v3156_v6  ;;  %v2241_v41 = vsel %vm2234_vm11, %v3689_v49, %v3691_v27  ;;  %v2322_v15 = vor.u32 4788187, %v2321_v34  ;;  %v2329_v42 = vsub.s32 4, %v3670_v35 }
 0x146   :  { %v489_v37 = vsel %vm487_vm3, %v488_v33, %v3156_v6  ;;  %v650_v43 = vmul.u32 %v3694_v24, %v634_v56  ;;  %vm652_vm4 = vc.u32 %v3744_v14, %v3747_v1  ;;  %v653_v59 = vadd.s32 1, %v3748_v32 }
 0x147   :  { %v486_v45 = vsel %vm484_vm13, %v3154_v21, %v485_v53  ;;  %v2323_v46 = vand.u32 2147483647, %v2322_v15  ;;  %v2325_v8 = vcvt.s32.f32 %v2318_v7  ;;  %vm2460_vm5 = vcmp.gt.s32.totalorder %v2459_v50, 0 }
 0x148   :  { %v490_v63 = vsel %vm483_vm0, %v486_v45, %v489_v37  ;;  %v654_v27 = vsel %vm652_vm4, %v653_v59, %v3748_v32  ;;  %v2456_v47 = vand.u32 8388607, %v2449_v36  ;;  %v2461_v24 = vsel %vm2460_vm5, %v2459_v50, 0 }
 0x149   :  { %v491_v49 = vsel %vm481_vm1, nan, %v490_v63  ;;  %v2326_v12 = vmul.f32 %v2325_v8, %v2323_v46  ;;  %v2330_v60 = vsel %vm2245_vm2, %v2329_v42, %v3670_v35  ;;  %v655_v16 = vadd.s32 %v654_v27, %v650_v43 }
 0x14a   :  { %v2998_v10 = vpack.c.bf16 %v491_v49, %v3644_v44  ;;  %vm2232_vm6 = vweird.f32 %v3360_v22  ;;  %vm3780_vm7 = vcmp.le.f32.partialorder %v2243_v48, 0.7853982  ;;  %v2463_v30 = vand.u32 31, %v2461_v24 }
 0x14b   :  { %v3784_v31 = vsel %vm2232_vm6, nan, %v2241_v41  ;;  %v2327_v19 = vxor.u32 2147483648, %v2326_v12  ;;  %v656_v44 = vadd.s32 536870912, %v655_v16  ;;  %v3788_v51 = vadd.f32 %v3378_v38, %v3354_v18 }
 0x14c   :  { %2838 = vst [vmem:[#allocation2] sm:$0xff] %v2998_v10  ;;  %v2332_v35 = vsel %vm3780_vm7, 0, %v2330_v60  ;;  %v2457_v22 = vor.u32 8388608, %v2456_v47  ;;  %v2462_v26 = vshrl.u32 %v2461_v24, 5  ;;  %v2464_v61 = vsub.s32 32, %v2463_v30 }
 0x14d   :  { %v2328_v48 = vsel %vm2245_vm2, %v2327_v19, %v2326_v12  ;;  %v3794_v9 = vshrl.u32 %v656_v44, 30  ;;  %v2466_v55 = vshll.u32 %v3267_v58, %v2463_v30  ;;  %v2469_v54 = vshll.u32 %v3268_v62, %v2463_v30 }
 0x14e   :  { %v2331_v38 = vsel %vm3780_vm7, %v3384_v52, %v2328_v48  ;;  %v2467_v21 = vshrl.u32 %v3268_v62, %v2464_v61  ;;  %v2470_v40 = vshrl.u32 %v3269_v0, %v2464_v61  ;;  %v2472_v32 = vshll.u32 %v3269_v0, %v2463_v30 }
 0x14f   :  { %3157 = vcosq.f32 %v2331_v38  ;;  %v658_v6 = vshll.u32 %v3794_v9, 30  ;;  %v2473_v33 = vshrl.u32 %v3270_v2, %v2464_v61  ;;  %v2475_v7 = vshll.u32 %v3270_v2, %v2463_v30 }
 0x150   :  { %3159 = vsinq.f32 %v2331_v38  ;;  %v2468_v34 = vor.u32 %v2467_v21, %v2466_v55  ;;  %v2471_v56 = vor.u32 %v2470_v40, %v2469_v54  ;;  %v2476_v53 = vshrl.u32 %v3271_v4, %v2464_v61 }
 0x151   :  { %v3808_v50 = vsub.s32 %v655_v16, %v658_v6  ;;  %v2474_v41 = vor.u32 %v2473_v33, %v2472_v32  ;;  %v2478_v37 = vshll.u32 %v3271_v4, %v2463_v30  ;;  %v2479_v15 = vshrl.u32 %v3272_v11, %v2464_v61 }
 0x152   :  { %v2336_v42 = vand.u32 3, %v2332_v35  ;;  %v2477_v45 = vor.u32 %v2476_v53, %v2475_v7  ;;  %v2497_v43 = vshll.u32 %v2457_v22, 8  ;;  %v701_v59 = vand.u32 2139095040, %v3788_v51 }
 0x153   :  { %v661_v63 = vsub.s32 0, %v3808_v50  ;;  %v2480_v46 = vor.u32 %v2479_v15, %v2478_v37  ;;  %vm2481_vm8 = vcmp.lt.s32.totalorder %v2462_v26, 1  ;;  %vm2484_vm9 = vcmp.lt.s32.totalorder %v2462_v26, 4 }
 0x154   :  { %v2465_v8 = vshrl.u32 %v3267_v58, %v2464_v61  ;;  %v2486_v49 = vsel %vm2484_vm9, %v2474_v41, 2102212464  ;;  %v2489_v27 = vsel %vm2481_vm8, %v2468_v34, %v2471_v56  ;;  %v2490_v47 = vsel %vm2484_vm9, %v2477_v45, 920167782 }
 0x155   :  { %v2899_v24 = vmin.u32 %v661_v63, %v3808_v50  ;;  %vm2482_vm10 = vcmp.lt.s32.totalorder %v2462_v26, 2  ;;  %vm2483_vm11 = vcmp.lt.s32.totalorder %v2462_v26, 3  ;;  %v2493_v10 = vsel %vm2481_vm8, %v2471_v56, %v2474_v41 }
 0x156   :  { %vm2335_vm12 = vweird.f32 %v3384_v52  ;;  %v2485_v12 = vsel %vm2481_vm8, %v2465_v8, %v2468_v34  ;;  %v2491_v60 = vsel %vm2483_vm11, %v2474_v41, %v2490_v47  ;;  %v2494_v16 = vsel %vm2484_vm9, %v2480_v46, 1326507024  ;;  %v3831_v8 = vpop.f32.mrb[6].mxu0 }
 0x157   :  { %v702_v25 = vshrl.u32 %v701_v59, 23  ;;  %v663_v30 = vclz %v2899_v24  ;;  %v2487_v19 = vsel %vm2483_vm11, %v2471_v56, %v2486_v49  ;;  %v2492_v44 = vsel %vm2482_vm10, %v2489_v27, %v2491_v60 }
 0x158   :  { %v2495_v35 = vsel %vm2483_vm11, %v2477_v45, %v2494_v16  ;;  %vm2337_vm13 = vcmp.lt.s32.totalorder %v2336_v42, 2  ;;  %v3819_v61 = vmul.u32.u64.low %v2497_v43, %v2492_v44  ;;  %v3820_v48 = vmul.u32.u64.high %v2497_v43, %v2492_v44, %v3819_v61 }
 0x159   :  { %v2496_v22 = vsel %vm2482_vm10, %v2493_v10, %v2495_v35  ;;  %v3158_v55 = vpop.eup %3157  ;;  %v2900_v54 = vadd.s32 4294967294, %v663_v30  ;;  %v2902_v40 = vadd.s32 4294967169, %v702_v25  ;;  %vm2338_vm14 = vcmp.eq.s32.totalorder %v2336_v42, 0 }
 0x15a   :  { %v3823_v38 = vmul.u32.u64.low %v2497_v43, %v2496_v22  ;;  %v3824_v21 = vmul.u32.u64.high %v2497_v43, %v2496_v22, %v3823_v38  ;;  %v3160_v32 = vpop.eup %3159  ;;  %vm2341_vm15 = vcmp.eq.s32.totalorder %v2336_v42, 2  ;;  %v2342_v6 = vxor.u32 2147483648, %v3158_v55 }
 0x15b   :  { %v2488_v33 = vsel %vm2482_vm10, %v2485_v12, %v2487_v19  ;;  %v2339_v7 = vxor.u32 2147483648, %v3160_v32  ;;  %vm2901_vm0 = vcmp.lt.s32.totalorder %v2900_v54, 0  ;;  %v698_v34 = vand.u32 2147483647, %v3788_v51 }
 0x15c   :  { %v708_v56 = vadd.s32 1, %v2902_v40  ;;  %v2343_v53 = vsel %vm2341_vm15, %v2342_v6, %v3160_v32  ;;  %v651_v41 = vadd.s32 %v3747_v1, %v3744_v14  ;;  %v666_v37 = vsel %vm2901_vm0, 0, %v2900_v54 }
 0x15d   :  { %v2507_v15 = vadd.s32 1, %v3820_v48  ;;  %v2340_v45 = vsel %vm2338_vm14, %v3158_v55, %v2339_v7  ;;  %v667_v59 = vsub.s32 32, %v666_v37  ;;  %v671_v63 = vsub.s32 4294967266, %v666_v37 }
 0x15e   :  { %v2504_v46 = vmul.u32 %v2497_v43, %v2488_v33  ;;  %v2344_v26 = vsel %vm2337_vm13, %v2340_v45, %v2343_v53  ;;  %v668_v49 = vshll.u32 %v3808_v50, %v666_v37  ;;  %vm2506_vm1 = vc.u32 %v3824_v21, %v3819_v61 }
 0x15f   :  { %vm709_vm2 = vcmp.gt.s32.totalorder %v708_v56, 0  ;;  %v2345_v14 = vsel %vm2335_vm12, nan, %v2344_v26  ;;  %v669_v1 = vshrl.u32 %v651_v41, %v667_v59  ;;  %v672_v27 = vadd.s32 127, %v671_v63 }
 0x160   :  { %v2508_v47 = vsel %vm2506_vm1, %v2507_v15, %v3820_v48  ;;  %v3010_v24 = vpack.c.bf16 %v2345_v14, %v3784_v31  ;;  %v705_v42 = vand.u32 8388607, %v698_v34  ;;  %v710_v10 = vsel %vm709_vm2, %v708_v56, 0 }
 0x161   :  { %v2509_v43 = vadd.s32 %v2508_v47, %v2504_v46  ;;  %v670_v12 = vor.u32 %v669_v1, %v668_v49  ;;  %v673_v50 = vshll.u32 %v672_v27, 23  ;;  %v712_v60 = vand.u32 31, %v710_v10 }
 0x162   :  { %2850 = vst [vmem:[#allocation2 + $0x48] sm:$0xff] %v3010_v24  ;;  %v681_v19 = vsub.s32 4, %v3794_v9  ;;  %v706_v35 = vor.u32 8388608, %v705_v42  ;;  %v711_v33 = vshrl.u32 %v710_v10, 5  ;;  %v3856_v56 = vadd.f32 %v3380_v39, %v3354_v18 }
 0x163   :  { %v2510_v16 = vadd.s32 536870912, %v2509_v43  ;;  %v674_v25 = vor.u32 4788187, %v673_v50  ;;  %v713_v30 = vsub.s32 32, %v712_v60  ;;  %v677_v52 = vcvt.s32.f32 %v670_v12 }
 0x164   :  { %v715_v31 = vshll.u32 %v3267_v58, %v712_v60  ;;  %v718_v38 = vshll.u32 %v3268_v62, %v712_v60  ;;  %v721_v7 = vshll.u32 %v3269_v0, %v712_v60  ;;  %v724_v15 = vshll.u32 %v3270_v2, %v712_v60 }
 0x165   :  { %v3844_v44 = vshrl.u32 %v2510_v16, 30  ;;  %v675_v22 = vand.u32 2147483647, %v674_v25  ;;  %v716_v48 = vshrl.u32 %v3268_v62, %v713_v30  ;;  %v719_v55 = vshrl.u32 %v3269_v0, %v713_v30 }
 0x166   :  { %v722_v40 = vshrl.u32 %v3270_v2, %v713_v30  ;;  %v725_v32 = vshrl.u32 %v3271_v4, %v713_v30  ;;  %v727_v63 = vshll.u32 %v3271_v4, %v712_v60  ;;  %v728_v46 = vshrl.u32 %v3272_v11, %v713_v30 }
 0x167   :  { %v2512_v54 = vshll.u32 %v3844_v44, 30  ;;  %v678_v6 = vmul.f32 %v677_v52, %v675_v22  ;;  %v717_v41 = vor.u32 %v716_v48, %v715_v31  ;;  %v720_v37 = vor.u32 %v719_v55, %v718_v38  ;;  %v3879_v31 = vpop.f32.mrb[6].mxu1 }
 0x168   :  { %v723_v59 = vor.u32 %v722_v40, %v721_v7  ;;  %vm3865_vm3 = vcmp.le.f32.partialorder %v595_v20, 0.7853982  ;;  %vm597_vm4 = vcmp.lt.s32.totalorder %v3588_v28, 0  ;;  %v726_v49 = vor.u32 %v725_v32, %v724_v15 }
 0x169   :  { %v3858_v53 = vsub.s32 %v2509_v43, %v2512_v54  ;;  %v679_v45 = vxor.u32 2147483648, %v678_v6  ;;  %v682_v14 = vsel %vm597_vm4, %v681_v19, %v3794_v9  ;;  %v729_v1 = vor.u32 %v728_v46, %v727_v63 }
 0x16a   :  { %v746_v27 = vshll.u32 %v706_v35, 8  ;;  %v2555_v47 = vand.u32 2139095040, %v3856_v56  ;;  %v714_v43 = vshrl.u32 %v3267_v58, %v713_v30  ;;  %vm730_vm5 = vcmp.lt.s32.totalorder %v711_v33, 1 }
 0x16b   :  { %v2515_v39 = vsub.s32 0, %v3858_v53  ;;  %vm733_vm6 = vcmp.lt.s32.totalorder %v711_v33, 4  ;;  %v680_v20 = vsel %vm597_vm4, %v679_v45, %v678_v6  ;;  %vm731_vm7 = vcmp.lt.s32.totalorder %v711_v33, 2 }
 0x16c   :  { %v735_v42 = vsel %vm733_vm6, %v723_v59, 2102212464  ;;  %v738_v10 = vsel %vm730_vm5, %v717_v41, %v720_v37  ;;  %vm732_vm8 = vcmp.lt.s32.totalorder %v711_v33, 3  ;;  %v734_v50 = vsel %vm730_vm5, %v714_v43, %v717_v41 }
 0x16d   :  { %v2971_v24 = vmin.u32 %v2515_v39, %v3858_v53  ;;  %v739_v60 = vsel %vm733_vm6, %v726_v49, 920167782  ;;  %v736_v16 = vsel %vm732_vm8, %v720_v37, %v735_v42  ;;  %v742_v25 = vsel %vm730_vm5, %v720_v37, %v723_v59 }
 0x16e   :  { %v740_v9 = vsel %vm732_vm8, %v723_v59, %v739_v60  ;;  %v743_v52 = vsel %vm733_vm6, %v729_v1, 1326507024  ;;  %v683_v19 = vsel %vm3865_vm3, %v3588_v28, %v680_v20  ;;  %v2556_v38 = vshrl.u32 %v2555_v47, 23 }
 0x16f   :  { %v2517_v12 = vclz %v2971_v24  ;;  %v741_v30 = vsel %vm731_vm7, %v738_v10, %v740_v9  ;;  %v744_v22 = vsel %vm732_vm8, %v726_v49, %v743_v52  ;;  %v737_v40 = vsel %vm731_vm7, %v734_v50, %v736_v16 }
 0x170   :  { %v745_v48 = vsel %vm731_vm7, %v742_v25, %v744_v22  ;;  %v3882_v55 = vmul.u32.u64.low %v746_v27, %v741_v30  ;;  %v3883_v54 = vmul.u32.u64.high %v746_v27, %v741_v30, %v3882_v55  ;;  %3161 = vcosq.f32 %v683_v19 }
 0x171   :  { %v2972_v35 = vadd.s32 4294967294, %v2517_v12  ;;  %v3886_v32 = vmul.u32.u64.low %v746_v27, %v745_v48  ;;  %v3887_v6 = vmul.u32.u64.high %v746_v27, %v745_v48, %v3886_v32  ;;  %v2552_v41 = vand.u32 2147483647, %v3856_v56 }
 0x172   :  { %v2974_v37 = vadd.s32 4294967169, %v2556_v38  ;;  %v2505_v15 = vadd.s32 %v3819_v61, %v3824_v21  ;;  %v684_v63 = vsel %vm3865_vm3, 0, %v682_v14  ;;  %v753_v46 = vmul.u32 %v746_v27, %v737_v40 }
 0x173   :  { %vm2973_vm9 = vcmp.lt.s32.totalorder %v2972_v35, 0  ;;  %v756_v33 = vadd.s32 1, %v3883_v54  ;;  %vm755_vm10 = vc.u32 %v3887_v6, %v3882_v55  ;;  %3163 = vsinq.f32 %v683_v19 }
 0x174   :  { %v2520_v7 = vsel %vm2973_vm9, 0, %v2972_v35  ;;  %v2562_v39 = vadd.s32 1, %v2974_v37  ;;  %v2559_v61 = vand.u32 8388607, %v2552_v41  ;;  %v3902_v27 = vadd.f32 %v3467_v57, %v3352_v17 }
 0x175   :  { %v2521_v45 = vsub.s32 32, %v2520_v7  ;;  %v2525_v59 = vsub.s32 4294967266, %v2520_v7  ;;  %v2522_v49 = vshll.u32 %v3858_v53, %v2520_v7  ;;  %v757_v24 = vsel %vm755_vm10, %v756_v33, %v3883_v54 }
 0x176   :  { %vm2563_vm11 = vcmp.gt.s32.totalorder %v2562_v39, 0  ;;  %v758_v14 = vadd.s32 %v757_v24, %v753_v46  ;;  %v3904_v43 = vand.u32 3, %v684_v63  ;;  %v2535_v53 = vsub.s32 4, %v3844_v44 }
 0x177   :  { %v2523_v1 = vshrl.u32 %v2505_v15, %v2521_v45  ;;  %v2526_v47 = vadd.s32 127, %v2525_v59  ;;  %v2564_v20 = vsel %vm2563_vm11, %v2562_v39, 0  ;;  %vm2451_vm12 = vcmp.lt.s32.totalorder %v3683_v5, 0 }
 0x178   :  { %v759_v10 = vadd.s32 536870912, %v758_v14  ;;  %v2560_v12 = vor.u32 8388608, %v2559_v61  ;;  %v2566_v50 = vand.u32 31, %v2564_v20  ;;  %v907_v25 = vand.u32 2139095040, %v3902_v27 }
 0x179   :  { %v2524_v21 = vor.u32 %v2523_v1, %v2522_v49  ;;  %v2527_v26 = vshll.u32 %v2526_v47, 23  ;;  %vm693_vm13 = vcmp.eq.s32.totalorder %v3904_v43, 2  ;;  %v3915_v57 = vsel %vm2451_vm12, %v2535_v53, %v3844_v44 }
 0x17a   :  { %v3908_v9 = vshrl.u32 %v759_v10, 30  ;;  %v3162_v52 = vpop.eup %3161  ;;  %v2567_v19 = vsub.s32 32, %v2566_v50  ;;  %v3918_v30 = vadd.s32 %v3882_v55, %v3887_v6  ;;  %v904_v48 = vand.u32 2147483647, %v3902_v27 }
 0x17b   :  { %v2528_v42 = vor.u32 4788187, %v2527_v26  ;;  %v2531_v16 = vcvt.s32.f32 %v2524_v21  ;;  %v3925_v32 = vshll.u32 %v2560_v12, 8  ;;  %v694_v7 = vxor.u32 2147483648, %v3162_v52 }
 0x17c   :  { %v761_v22 = vshll.u32 %v3908_v9, 30  ;;  %v2570_v54 = vshrl.u32 %v3268_v62, %v2567_v19  ;;  %v2573_v38 = vshrl.u32 %v3269_v0, %v2567_v19  ;;  %v2576_v40 = vshrl.u32 %v3270_v2, %v2567_v19 }
 0x17d   :  { %v2529_v60 = vand.u32 2147483647, %v2528_v42  ;;  %v2569_v37 = vshll.u32 %v3267_v58, %v2566_v50  ;;  %v908_v15 = vshrl.u32 %v907_v25, 23  ;;  %v3164_v55 = vpop.eup %3163  ;;  %v2565_v45 = vshrl.u32 %v2564_v20, 5 }
 0x17e   :  { %v3927_v44 = vsub.s32 %v758_v14, %v761_v22  ;;  %v2572_v59 = vshll.u32 %v3268_v62, %v2566_v50  ;;  %v2575_v63 = vshll.u32 %v3269_v0, %v2566_v50  ;;  %vm690_vm14 = vcmp.eq.s32.totalorder %v3904_v43, 0 }
 0x17f   :  { %v2532_v35 = vmul.f32 %v2531_v16, %v2529_v60  ;;  %v2571_v33 = vor.u32 %v2570_v54, %v2569_v37  ;;  %v2578_v39 = vshll.u32 %v3270_v2, %v2566_v50  ;;  %v2579_v49 = vshrl.u32 %v3271_v4, %v2567_v19 }
 0x180   :  { %v764_v46 = vsub.s32 0, %v3927_v44  ;;  %vm3938_vm15 = vcmp.le.f32.partialorder %v2449_v36, 0.7853982  ;;  %v2574_v47 = vor.u32 %v2573_v38, %v2572_v59  ;;  %v2577_v24 = vor.u32 %v2576_v40, %v2575_v63  ;;  %v3956_v59 = vpop.f32.mrb[7].mxu0 }
 0x181   :  { %v2533_v6 = vxor.u32 2147483648, %v2532_v35  ;;  %v2581_v61 = vshll.u32 %v3271_v4, %v2566_v50  ;;  %v2582_v21 = vshrl.u32 %v3272_v11, %v2567_v19  ;;  %v691_v26 = vxor.u32 2147483648, %v3164_v55 }
 0x182   :  { %v695_v14 = vsel %vm693_vm13, %v694_v7, %v3164_v55  ;;  %v2903_v53 = vmin.u32 %v764_v46, %v3927_v44  ;;  %v2910_v20 = vadd.s32 4294967169, %v908_v15  ;;  %v2568_v36 = vshrl.u32 %v3267_v58, %v2567_v19 }
 0x183   :  { %v2534_v42 = vsel %vm2451_vm12, %v2533_v6, %v2532_v35  ;;  %v2580_v10 = vor.u32 %v2579_v49, %v2578_v39  ;;  %v2583_v12 = vor.u32 %v2582_v21, %v2581_v61  ;;  %vm2584_vm0 = vcmp.lt.s32.totalorder %v2565_v45, 1 }
 0x184   :  { %v766_v60 = vclz %v2903_v53  ;;  %vm2585_vm1 = vcmp.lt.s32.totalorder %v2565_v45, 2  ;;  %vm2587_vm2 = vcmp.lt.s32.totalorder %v2565_v45, 4  ;;  %vm2586_vm3 = vcmp.lt.s32.totalorder %v2565_v45, 3 }
 0x185   :  { %v2589_v50 = vsel %vm2587_vm2, %v2577_v24, 2102212464  ;;  %v2592_v16 = vsel %vm2584_vm0, %v2571_v33, %v2574_v47  ;;  %v2593_v25 = vsel %vm2587_vm2, %v2580_v10, 920167782  ;;  %v2588_v54 = vsel %vm2584_vm0, %v2568_v36, %v2571_v33 }
 0x186   :  { %v2904_v22 = vadd.s32 4294967294, %v766_v60  ;;  %v2594_v38 = vsel %vm2586_vm3, %v2577_v24, %v2593_v25  ;;  %v2596_v40 = vsel %vm2584_vm0, %v2574_v47, %v2577_v24  ;;  %v2590_v7 = vsel %vm2586_vm3, %v2574_v47, %v2589_v50 }
 0x187   :  { %v2595_v37 = vsel %vm2585_vm1, %v2592_v16, %v2594_v38  ;;  %v2597_v35 = vsel %vm2587_vm2, %v2583_v12, 1326507024  ;;  %v914_v15 = vadd.s32 1, %v2910_v20  ;;  %v692_v63 = vsel %vm690_vm14, %v3162_v52, %v691_v26 }
 0x188   :  { %vm2905_vm4 = vcmp.lt.s32.totalorder %v2904_v22, 0  ;;  %v2598_v19 = vsel %vm2586_vm3, %v2580_v10, %v2597_v35  ;;  %v3952_v55 = vmul.u32.u64.low %v3925_v32, %v2595_v37  ;;  %v3953_v6 = vmul.u32.u64.high %v3925_v32, %v2595_v37, %v3952_v55 }
 0x189   :  { %v769_v46 = vsel %vm2905_vm4, 0, %v2904_v22  ;;  %v2599_v33 = vsel %vm2585_vm1, %v2596_v40, %v2598_v19  ;;  %vm915_vm5 = vcmp.gt.s32.totalorder %v914_v15, 0  ;;  %v2537_v39 = vsel %vm3938_vm15, %v3683_v5, %v2534_v42 }
 0x18a   :  { %v770_v49 = vsub.s32 32, %v769_v46  ;;  %v774_v47 = vsub.s32 4294967266, %v769_v46  ;;  %v916_v24 = vsel %vm915_vm5, %v914_v15, 0  ;;  %v2591_v61 = vsel %vm2585_vm1, %v2588_v54, %v2590_v7 }
 0x18b   :  { %v3966_v21 = vmul.u32.u64.low %v3925_v32, %v2599_v33  ;;  %v3967_v53 = vmul.u32.u64.high %v3925_v32, %v2599_v33, %v3966_v21  ;;  %v918_v20 = vand.u32 31, %v916_v24  ;;  %v771_v52 = vshll.u32 %v3927_v44, %v769_v46 }
 0x18c   :  { %v772_v26 = vshrl.u32 %v3918_v30, %v770_v49  ;;  %v775_v36 = vadd.s32 127, %v774_v47  ;;  %v2610_v10 = vadd.s32 1, %v3953_v6  ;;  %vm689_vm6 = vcmp.lt.s32.totalorder %v3904_v43, 2 }
 0x18d   :  { %v2538_v42 = vsel %vm3938_vm15, 0, %v3915_v57  ;;  %vm700_vm7 = vcmp.lt.s32.totalorder %v3788_v51, 0  ;;  %v3977_v45 = vsub.s32 32, %v918_v20  ;;  %v38_v12 = vsub.s32 2, %v3345_v13 }
 0x18e   :  { %vm687_vm8 = vweird.f32 %v3588_v28  ;;  %v696_v44 = vsel %vm689_vm6, %v692_v63, %v695_v14  ;;  %v773_v60 = vor.u32 %v772_v26, %v771_v52  ;;  %v776_v30 = vshll.u32 %v775_v36, 23 }
 0x18f   :  { %v911_v50 = vand.u32 8388607, %v904_v48  ;;  %3165 = vcosq.f32 %v2537_v39  ;;  %v784_v43 = vsub.s32 4, %v3908_v9  ;;  %v2607_v1 = vmul.u32 %v3925_v32, %v2591_v61 }
 0x190   :  { %vm2609_vm9 = vc.u32 %v3967_v53, %v3952_v55  ;;  %3167 = vsinq.f32 %v2537_v39  ;;  %vm3989_vm10 = vcmp.le.f32.partialorder %v698_v34, 0.7853982  ;;  %v777_v14 = vor.u32 4788187, %v776_v30 }
 0x191   :  { %v2611_v16 = vsel %vm2609_vm9, %v2610_v10, %v3953_v6  ;;  %v3994_v25 = vshrl.u32 %v916_v24, 5  ;;  %v921_v54 = vshll.u32 %v3267_v58, %v918_v20  ;;  %v922_v32 = vshrl.u32 %v3268_v62, %v3977_v45 }
 0x192   :  { %v2612_v22 = vadd.s32 %v2611_v16, %v2607_v1  ;;  %v925_v38 = vshrl.u32 %v3269_v0, %v3977_v45  ;;  %v778_v40 = vand.u32 2147483647, %v777_v14  ;;  %v780_v7 = vcvt.s32.f32 %v773_v60 }
 0x193   :  { %v924_v34 = vshll.u32 %v3268_v62, %v918_v20  ;;  %v928_v37 = vshrl.u32 %v3270_v2, %v3977_v45  ;;  %v927_v15 = vshll.u32 %v3269_v0, %v918_v20  ;;  %v930_v19 = vshll.u32 %v3270_v2, %v918_v20 }
 0x194   :  { %v2613_v35 = vadd.s32 536870912, %v2612_v22  ;;  %v931_v6 = vshrl.u32 %v3271_v4, %v3977_v45  ;;  %v781_v63 = vmul.f32 %v780_v7, %v778_v40  ;;  %v923_v46 = vor.u32 %v922_v32, %v921_v54 }
 0x195   :  { %v926_v33 = vor.u32 %v925_v38, %v924_v34  ;;  %v934_v39 = vshrl.u32 %v3272_v11, %v3977_v45  ;;  %v4010_v49 = vand.u32 3, %v2538_v42  ;;  %v912_v24 = vor.u32 8388608, %v911_v50 }
 0x196   :  { %v4012_v47 = vshrl.u32 %v2613_v35, 30  ;;  %v932_v61 = vor.u32 %v931_v6, %v930_v19  ;;  %v782_v21 = vxor.u32 2147483648, %v781_v63  ;;  %v785_v52 = vsel %vm700_vm7, %v784_v43, %v3908_v9 }
 0x197   :  { %v929_v26 = vor.u32 %v928_v37, %v927_v15  ;;  %v933_v36 = vshll.u32 %v3271_v4, %v918_v20  ;;  %v4020_v10 = vsel %vm687_vm8, nan, %v696_v44  ;;  %vm936_vm11 = vcmp.lt.s32.totalorder %v3994_v25, 1 }
 0x198   :  { %v2615_v60 = vshll.u32 %v4012_v47, 30  ;;  %vm939_vm12 = vcmp.lt.s32.totalorder %v3994_v25, 4  ;;  %v783_v42 = vsel %vm700_vm7, %v782_v21, %v781_v63  ;;  %v944_v9 = vsel %vm936_vm11, %v923_v46, %v926_v33 }
 0x199   :  { %v935_v30 = vor.u32 %v934_v39, %v933_v36  ;;  %v945_v20 = vsel %vm939_vm12, %v932_v61, 920167782  ;;  %v3166_v50 = vpop.eup %3165  ;;  %vm2547_vm13 = vcmp.eq.s32.totalorder %v4010_v49, 2  ;;  %v786_v28 = vsel %vm3989_vm10, %v3788_v51, %v783_v42  ;;  %v3241_v39 = vld [vmem:[%s5341_s2] sm:$0x7]  ;;  %s3273_s2 = smov [#allocation2]  }
 0x19a   :  { %v787_v44 = vsel %vm3989_vm10, 0, %v785_v52  ;;  %v4037_v43 = vsub.s32 %v2612_v22, %v2615_v60  ;;  %vm938_vm14 = vcmp.lt.s32.totalorder %v3994_v25, 3  ;;  %v3168_v1 = vpop.eup %3167  ;;  %vm2544_vm15 = vcmp.eq.s32.totalorder %v4010_v49, 0  ;;  %s2859_s9 = sshll.u32 %s3273_s2, 4  ;;  %s2860_s9 = int_to_ptr.vmem [resolvable:$true] %s2859_s9 }
 0x19b   :  { %3169 = vcosq.f32 %v786_v28  ;;  %vm2554_vm0 = vcmp.lt.s32.totalorder %v3856_v56, 0  ;;  %vm937_vm1 = vcmp.lt.s32.totalorder %v3994_v25, 2  ;;  %v946_v14 = vsel %vm938_vm14, %v929_v26, %v945_v20  ;;  %s3242_s10 = scalar_lea.vmem %s2860_s9, 1536  ;;  %p3247_p1 = scmp.lt.s32.totalorder %s2860_s9, %s2860_s9 }
 0x19c   :  { %v952_v16 = vshll.u32 %v912_v24, 8  ;;  %3171 = vsinq.f32 %v786_v28  ;;  %v2618_v57 = vsub.s32 0, %v4037_v43  ;;  %v941_v22 = vsel %vm939_vm12, %v929_v26, 2102212464  ;;  %p3243_p0 = scmp.ne.s32.totalorder %s2860_s9, %s3242_s10  ;;  %p3248_p2 = scmp.lt.s32.totalorder %s3242_s10, %s3242_s10 }
 0x19d   :  { %v947_v54 = vsel %vm937_vm1, %v944_v9, %v946_v14  ;;  %v948_v32 = vsel %vm936_vm11, %v926_v33, %v929_v26  ;;  %v949_v38 = vsel %vm939_vm12, %v935_v30, 1326507024  ;;  %v2548_v34 = vxor.u32 2147483648, %v3166_v50 }
 0x19e   :  { %v4054_v40 = vmul.u32.u64.low %v952_v16, %v947_v54  ;;  %v4055_v7 = vmul.u32.u64.high %v952_v16, %v947_v54, %v4054_v40  ;;  %v791_v37 = vand.u32 3, %v787_v44  ;;  %v2975_v35 = vmin.u32 %v2618_v57, %v4037_v43  ;;  %p3249_p3 = por %p3248_p2, %p3247_p1 }
 0x19f   :  { %v920_v15 = vshrl.u32 %v3267_v58, %v3977_v45  ;;  %v2545_v19 = vxor.u32 2147483648, %v3168_v1  ;;  %v2638_v6 = vsub.s32 4, %v4012_v47  ;;  %v950_v63 = vsel %vm938_vm14, %v932_v61, %v949_v38 }
 0x1a0   :  { %v4069_v24 = vrot.slane %v3241_v39, %v38_v12  ;;  %v2620_v21 = vclz %v2975_v35  ;;  %v942_v45 = vsel %vm938_vm14, %v926_v33, %v941_v22  ;;  %v951_v26 = vsel %vm937_vm1, %v948_v32, %v950_v63  ;;  %p3250_p4 = pnand %p3249_p3, %p3243_p0 }
 0x1a1   :  { %v940_v52 = vsel %vm936_vm11, %v920_v15, %v923_v46  ;;  %v4077_v36 = vmul.u32.u64.low %v952_v16, %v951_v26  ;;  %v4078_v61 = vmul.u32.u64.high %v952_v16, %v951_v26, %v4077_v36  ;;  %v4086_v13 = vadd.f32 %v3655_v23, %v3354_v18  ;;  %v4090_v46 = vpop.f32.mrb[7].mxu1 }
 0x1a2   :  { %v4082_v60 = vadd.f32 %v3614_v3, %v4069_v24  ;;  %vm2543_vm2 = vcmp.lt.s32.totalorder %v4010_v49, 2  ;;  %vm790_vm3 = vweird.f32 %v3788_v51  ;;  %vm792_vm4 = vcmp.lt.s32.totalorder %v791_v37, 2 }
 0x1a3   :  { %vm793_vm5 = vcmp.eq.s32.totalorder %v791_v37, 0  ;;  %vm796_vm6 = vcmp.eq.s32.totalorder %v791_v37, 2  ;;  %v2976_v12 = vadd.s32 4294967294, %v2620_v21  ;;  %v2549_v33 = vsel %vm2547_vm13, %v2548_v34, %v3168_v1 }
 0x1a4   :  { %v943_v3 = vsel %vm937_vm1, %v940_v52, %v942_v45  ;;  %v962_v42 = vadd.s32 1, %v4055_v7  ;;  %v804_v23 = vand.u32 2139095040, %v4082_v60  ;;  %v2546_v30 = vsel %vm2544_vm15, %v3166_v50, %v2545_v19 }
 0x1a5   :  { %v2608_v9 = vadd.s32 %v3952_v55, %v3967_v53  ;;  %vm2977_vm7 = vcmp.lt.s32.totalorder %v2976_v12, 0  ;;  %v2639_v20 = vsel %vm2554_vm0, %v2638_v6, %v4012_v47  ;;  %v3170_v28 = vpop.eup %3169  ;;  %vm961_vm8 = vc.u32 %v4078_v61, %v4054_v40 }
 0x1a6   :  { %v2623_v44 = vsel %vm2977_vm7, 0, %v2976_v12  ;;  %v801_v25 = vand.u32 2147483647, %v4082_v60  ;;  %v1010_v1 = vand.u32 2139095040, %v4086_v13  ;;  %v3172_v14 = vpop.eup %3171  ;;  %v797_v57 = vxor.u32 2147483648, %v3170_v28 }
 0x1a7   :  { %v2624_v50 = vsub.s32 32, %v2623_v44  ;;  %v2628_v22 = vsub.s32 4294967266, %v2623_v44  ;;  %v959_v54 = vmul.u32 %v952_v16, %v943_v3  ;;  %v794_v55 = vxor.u32 2147483648, %v3172_v14 }
 0x1a8   :  { %v2625_v53 = vshll.u32 %v4037_v43, %v2623_v44  ;;  %v963_v32 = vsel %vm961_vm8, %v962_v42, %v4055_v7  ;;  %v805_v47 = vshrl.u32 %v804_v23, 23  ;;  %v798_v38 = vsel %vm796_vm6, %v797_v57, %v3172_v14 }
 0x1a9   :  { %v2626_v34 = vshrl.u32 %v2608_v9, %v2624_v50  ;;  %v2629_v35 = vadd.s32 127, %v2628_v22  ;;  %v964_v15 = vadd.s32 %v963_v32, %v959_v54  ;;  %v795_v19 = vsel %vm793_vm5, %v3170_v28, %v794_v55 }
 0x1aa   :  { %v2906_v6 = vadd.s32 4294967169, %v805_v47  ;;  %v808_v63 = vand.u32 8388607, %v801_v25  ;;  %v1011_v39 = vshrl.u32 %v1010_v1, 23  ;;  %v799_v16 = vsel %vm792_vm4, %v795_v19, %v798_v38 }
 0x1ab   :  { %v2627_v21 = vor.u32 %v2626_v34, %v2625_v53  ;;  %v2630_v52 = vshll.u32 %v2629_v35, 23  ;;  %v965_v43 = vadd.s32 536870912, %v964_v15  ;;  %v2550_v7 = vsel %vm2543_vm2, %v2546_v30, %v2549_v33 }
 0x1ac   :  { %v800_v45 = vsel %vm790_vm3, nan, %v799_v16  ;;  %vm4122_vm9 = vcmp.le.f32.partialorder %v2552_v41, 0.7853982  ;;  %v811_v36 = vadd.s32 1, %v2906_v6  ;;  %v809_v49 = vor.u32 8388608, %v808_v63 }
 0x1ad   :  { %v3000_v12 = vpack.c.bf16 %v800_v45, %v4020_v10  ;;  %v2631_v37 = vor.u32 4788187, %v2630_v52  ;;  %v2641_v3 = vsel %vm4122_vm9, 0, %v2639_v20  ;;  %v4129_v42 = vshrl.u32 %v965_v43, 30 }
 0x1ae   :  { %vm812_vm10 = vcmp.gt.s32.totalorder %v811_v36, 0  ;;  %v1007_v51 = vand.u32 2147483647, %v4086_v13  ;;  %v2914_v33 = vadd.s32 4294967169, %v1011_v39  ;;  %v2634_v41 = vcvt.s32.f32 %v2627_v21 }
 0x1af   :  { %2840 = vst [vmem:[#allocation2 + $0xc] sm:$0xff] %v3000_v12  ;;  %v2632_v23 = vand.u32 2147483647, %v2631_v37  ;;  %v967_v30 = vshll.u32 %v4129_v42, 30  ;;  %v813_v9 = vsel %vm812_vm10, %v811_v36, 0  ;;  %vm2541_vm11 = vweird.f32 %v3683_v5 }
 0x1b0   :  { %v815_v10 = vand.u32 31, %v813_v9  ;;  %v4134_v28 = vsel %vm2541_vm11, nan, %v2550_v7  ;;  %v4136_v20 = vand.u32 3, %v2641_v3  ;;  %v960_v14 = vadd.s32 %v4054_v40, %v4078_v61 }
 0x1b1   :  { %v2635_v44 = vmul.f32 %v2634_v41, %v2632_v23  ;;  %v4138_v1 = vsub.s32 %v964_v15, %v967_v30  ;;  %v4142_v50 = vshll.u32 %v809_v49, 8  ;;  %v4146_v22 = vand.u32 8388607, %v1007_v51  ;;  %v4166_v23 = vpop.f32.mrb[8].mxu0 }
 0x1b2   :  { %v816_v57 = vsub.s32 32, %v815_v10  ;;  %v818_v55 = vshll.u32 %v3267_v58, %v815_v10  ;;  %v1017_v53 = vadd.s32 1, %v2914_v33  ;;  %v821_v47 = vshll.u32 %v3268_v62, %v815_v10 }
 0x1b3   :  { %v2636_v54 = vxor.u32 2147483648, %v2635_v44  ;;  %v970_v5 = vsub.s32 0, %v4138_v1  ;;  %v814_v35 = vshrl.u32 %v813_v9, 5  ;;  %v824_v15 = vshll.u32 %v3269_v0, %v815_v10 }
 0x1b4   :  { %v819_v32 = vshrl.u32 %v3268_v62, %v816_v57  ;;  %v822_v38 = vshrl.u32 %v3269_v0, %v816_v57  ;;  %v825_v40 = vshrl.u32 %v3270_v2, %v816_v57  ;;  %v817_v6 = vshrl.u32 %v3267_v58, %v816_v57 }
 0x1b5   :  { %v2637_v61 = vsel %vm2554_vm0, %v2636_v54, %v2635_v44  ;;  %v2911_v34 = vmin.u32 %v970_v5, %v4138_v1  ;;  %v827_v52 = vshll.u32 %v3270_v2, %v815_v10  ;;  %v828_v43 = vshrl.u32 %v3271_v4, %v816_v57 }
 0x1b6   :  { %v2640_v19 = vsel %vm4122_vm9, %v3856_v56, %v2637_v61  ;;  %v820_v63 = vor.u32 %v819_v32, %v818_v55  ;;  %v823_v39 = vor.u32 %v822_v38, %v821_v47  ;;  %v826_v21 = vor.u32 %v825_v40, %v824_v15 }
 0x1b7   :  { %3173 = vcosq.f32 %v2640_v19  ;;  %v972_v16 = vclz %v2911_v34  ;;  %v830_v7 = vshll.u32 %v3271_v4, %v815_v10  ;;  %v831_v45 = vshrl.u32 %v3272_v11, %v816_v57 }
 0x1b8   :  { %3175 = vsinq.f32 %v2640_v19  ;;  %vm833_vm12 = vcmp.lt.s32.totalorder %v814_v35, 1  ;;  %vm835_vm13 = vcmp.lt.s32.totalorder %v814_v35, 3  ;;  %vm1018_vm14 = vcmp.gt.s32.totalorder %v1017_v53, 0 }
 0x1b9   :  { %v2912_v36 = vadd.s32 4294967294, %v972_v16  ;;  %v829_v26 = vor.u32 %v828_v43, %v827_v52  ;;  %v832_v12 = vor.u32 %v831_v45, %v830_v7  ;;  %vm836_vm15 = vcmp.lt.s32.totalorder %v814_v35, 4 }
 0x1ba   :  { %v837_v37 = vsel %vm833_vm12, %v817_v6, %v820_v63  ;;  %v838_v3 = vsel %vm836_vm15, %v826_v21, 2102212464  ;;  %v841_v49 = vsel %vm833_vm12, %v820_v63, %v823_v39  ;;  %v845_v33 = vsel %vm833_vm12, %v823_v39, %v826_v21 }
 0x1bb   :  { %vm2913_vm0 = vcmp.lt.s32.totalorder %v2912_v36, 0  ;;  %v839_v30 = vsel %vm835_vm13, %v823_v39, %v838_v3  ;;  %v842_v9 = vsel %vm836_vm15, %v829_v26, 920167782  ;;  %v846_v10 = vsel %vm836_vm15, %v832_v12, 1326507024 }
 0x1bc   :  { %v975_v41 = vsel %vm2913_vm0, 0, %v2912_v36  ;;  %vm834_vm1 = vcmp.lt.s32.totalorder %v814_v35, 2  ;;  %v1019_v54 = vsel %vm1018_vm14, %v1017_v53, 0  ;;  %vm2644_vm2 = vweird.f32 %v3856_v56 }
 0x1bd   :  { %v976_v44 = vsub.s32 32, %v975_v41  ;;  %v980_v57 = vsub.s32 4294967266, %v975_v41  ;;  %v977_v5 = vshll.u32 %v4138_v1, %v975_v41  ;;  %v840_v55 = vsel %vm834_vm1, %v837_v37, %v839_v30 }
 0x1be   :  { %v843_v32 = vsel %vm835_vm13, %v826_v21, %v842_v9  ;;  %v847_v47 = vsel %vm835_vm13, %v829_v26, %v846_v10  ;;  %vm2646_vm3 = vcmp.lt.s32.totalorder %v4136_v20, 2  ;;  %v1021_v35 = vand.u32 31, %v1019_v54 }
 0x1bf   :  { %v978_v38 = vshrl.u32 %v960_v14, %v976_v44  ;;  %v981_v40 = vadd.s32 127, %v980_v57  ;;  %v844_v61 = vsel %vm834_vm1, %v841_v49, %v843_v32  ;;  %v848_v34 = vsel %vm834_vm1, %v845_v33, %v847_v47 }
 0x1c0   :  { %v4175_v15 = vmul.u32.u64.low %v4142_v50, %v848_v34  ;;  %v4176_v19 = vmul.u32.u64.high %v4142_v50, %v848_v34, %v4175_v15  ;;  %v4179_v6 = vmul.u32.u64.low %v4142_v50, %v844_v61  ;;  %v4180_v53 = vmul.u32.u64.high %v4142_v50, %v844_v61, %v4179_v6 }
 0x1c1   :  { %v3174_v63 = vpop.eup %3173  ;;  %v979_v1 = vor.u32 %v978_v38, %v977_v5  ;;  %v982_v39 = vshll.u32 %v981_v40, 23  ;;  %vm2647_vm4 = vcmp.eq.s32.totalorder %v4136_v20, 0  ;;  %vm2650_vm5 = vcmp.eq.s32.totalorder %v4136_v20, 2 }
 0x1c2   :  { %v3176_v16 = vpop.eup %3175  ;;  %v2651_v14 = vxor.u32 2147483648, %v3174_v63  ;;  %v1015_v21 = vor.u32 8388608, %v4146_v22  ;;  %v856_v7 = vmul.u32 %v4142_v50, %v840_v55  ;;  %v1022_v45 = vsub.s32 32, %v1021_v35 }
 0x1c3   :  { %v2648_v52 = vxor.u32 2147483648, %v3176_v16  ;;  %v983_v43 = vor.u32 4788187, %v982_v39  ;;  %vm858_vm6 = vc.u32 %v4176_v19, %v4179_v6  ;;  %v859_v26 = vadd.s32 1, %v4180_v53 }
 0x1c4   :  { %v2652_v36 = vsel %vm2650_vm5, %v2651_v14, %v3176_v16  ;;  %v4191_v12 = vshrl.u32 %v1019_v54, 5  ;;  %v986_v49 = vcvt.s32.f32 %v979_v1  ;;  %v1024_v33 = vshll.u32 %v3267_v58, %v1021_v35 }
 0x1c5   :  { %v2649_v37 = vsel %vm2647_vm4, %v3174_v63, %v2648_v52  ;;  %v984_v3 = vand.u32 2147483647, %v983_v43  ;;  %v860_v41 = vsel %vm858_vm6, %v859_v26, %v4180_v53  ;;  %v1025_v50 = vshrl.u32 %v3268_v62, %v1022_v45 }
 0x1c6   :  { %v2653_v22 = vsel %vm2646_vm3, %v2649_v37, %v2652_v36  ;;  %v1027_v30 = vshll.u32 %v3268_v62, %v1021_v35  ;;  %v861_v44 = vadd.s32 %v860_v41, %v856_v7  ;;  %v1028_v57 = vshrl.u32 %v3269_v0, %v1022_v45 }
 0x1c7   :  { %v2654_v9 = vsel %vm2644_vm2, nan, %v2653_v22  ;;  %v987_v10 = vmul.f32 %v986_v49, %v984_v3  ;;  %v1026_v5 = vor.u32 %v1025_v50, %v1024_v33  ;;  %v1030_v55 = vshll.u32 %v3269_v0, %v1021_v35 }
 0x1c8   :  { %v3012_v54 = vpack.c.bf16 %v2654_v9, %v4134_v28  ;;  %v1031_v20 = vshrl.u32 %v3270_v2, %v1022_v45  ;;  %v862_v47 = vadd.s32 536870912, %v861_v44  ;;  %v1029_v38 = vor.u32 %v1028_v57, %v1027_v30 }
 0x1c9   :  { %v988_v32 = vxor.u32 2147483648, %v987_v10  ;;  %v1033_v40 = vshll.u32 %v3270_v2, %v1021_v35  ;;  %v1034_v56 = vshrl.u32 %v3271_v4, %v1022_v45  ;;  %v1036_v34 = vshll.u32 %v3271_v4, %v1021_v35 }
 0x1ca   :  { %2852 = vst [vmem:[#allocation2 + $0x54] sm:$0xff] %v3012_v54  ;;  %v1032_v61 = vor.u32 %v1031_v20, %v1030_v55  ;;  %v1037_v15 = vshrl.u32 %v3272_v11, %v1022_v45  ;;  %vm4211_vm7 = vcmp.le.f32.partialorder %v904_v48, 0.7853982  ;;  %vm906_vm8 = vcmp.lt.s32.totalorder %v3902_v27, 0 }
 0x1cb   :  { %v863_v53 = vshrl.u32 %v862_v47, 30  ;;  %v1055_v63 = vshll.u32 %v1015_v21, 8  ;;  %v1035_v1 = vor.u32 %v1034_v56, %v1033_v40  ;;  %vm1039_vm9 = vcmp.lt.s32.totalorder %v4191_v12, 1 }
 0x1cc   :  { %v1038_v39 = vor.u32 %v1037_v15, %v1036_v34  ;;  %vm1040_vm10 = vcmp.lt.s32.totalorder %v4191_v12, 2  ;;  %v989_v35 = vsel %vm906_vm8, %v988_v32, %v987_v10  ;;  %vm1042_vm11 = vcmp.lt.s32.totalorder %v4191_v12, 4 }
 0x1cd   :  { %v864_v16 = vshll.u32 %v863_v53, 30  ;;  %v1047_v48 = vsel %vm1039_vm9, %v1026_v5, %v1029_v38  ;;  %vm1041_vm12 = vcmp.lt.s32.totalorder %v4191_v12, 3  ;;  %v1044_v14 = vsel %vm1042_vm11, %v1032_v61, 2102212464 }
 0x1ce   :  { %v1048_v52 = vsel %vm1042_vm11, %v1035_v1, 920167782  ;;  %v1051_v21 = vsel %vm1039_vm9, %v1029_v38, %v1032_v61  ;;  %v1023_v7 = vshrl.u32 %v3267_v58, %v1022_v45  ;;  %v1052_v26 = vsel %vm1042_vm11, %v1038_v39, 1326507024 }
 0x1cf   :  { %v4226_v43 = vsub.s32 %v861_v44, %v864_v16  ;;  %v1049_v36 = vsel %vm1041_vm12, %v1032_v61, %v1048_v52  ;;  %v992_v37 = vsel %vm4211_vm7, %v3902_v27, %v989_v35  ;;  %v1053_v49 = vsel %vm1041_vm12, %v1035_v1, %v1052_v26  ;;  %v4261_v61 = vpop.f32.mrb[8].mxu1 }
 0x1d0   :  { %v1050_v3 = vsel %vm1040_vm10, %v1047_v48, %v1049_v36  ;;  %v4236_v33 = vadd.f32 %v3718_v29, %v4069_v24  ;;  %v1043_v41 = vsel %vm1039_vm9, %v1023_v7, %v1026_v5  ;;  %v1045_v45 = vsel %vm1041_vm12, %v1029_v38, %v1044_v14 }
 0x1d1   :  { %v867_v22 = vsub.s32 0, %v4226_v43  ;;  %v1054_v50 = vsel %vm1040_vm10, %v1051_v21, %v1053_v49  ;;  %v4246_v10 = vmul.u32.u64.low %v1055_v63, %v1050_v3  ;;  %v4247_v44 = vmul.u32.u64.high %v1055_v63, %v1050_v3, %v4246_v10 }
 0x1d2   :  { %v4243_v30 = vmul.u32.u64.low %v1055_v63, %v1054_v50  ;;  %v4244_v9 = vmul.u32.u64.high %v1055_v63, %v1054_v50, %v4243_v30  ;;  %3177 = vcosq.f32 %v992_v37  ;;  %v4252_v29 = vadd.f32 %v3831_v8, %v3352_v17 }
 0x1d3   :  { %v2907_v57 = vmin.u32 %v867_v22, %v4226_v43  ;;  %v990_v54 = vsub.s32 4, %v4129_v42  ;;  %3179 = vsinq.f32 %v992_v37  ;;  %v1046_v5 = vsel %vm1040_vm10, %v1043_v41, %v1045_v45 }
 0x1d4   :  { %v495_v55 = vand.u32 2139095040, %v4236_v33  ;;  %v887_v32 = vsub.s32 4, %v863_v53  ;;  %vm1064_vm13 = vc.u32 %v4244_v9, %v4246_v10  ;;  %v1065_v47 = vadd.s32 1, %v4247_v44 }
 0x1d5   :  { %v869_v20 = vclz %v2907_v57  ;;  %v492_v38 = vand.u32 2147483647, %v4236_v33  ;;  %vm803_vm14 = vcmp.lt.s32.totalorder %v4082_v60, 0  ;;  %v1062_v56 = vmul.u32 %v1055_v63, %v1046_v5 }
 0x1d6   :  { %v496_v40 = vshrl.u32 %v495_v55, 23  ;;  %v991_v12 = vsel %vm906_vm8, %v990_v54, %v4129_v42  ;;  %v1066_v34 = vsel %vm1064_vm13, %v1065_v47, %v4247_v44  ;;  %v1216_v1 = vand.u32 2139095040, %v4252_v29 }
 0x1d7   :  { %v2908_v8 = vadd.s32 4294967294, %v869_v20  ;;  %v888_v39 = vsel %vm803_vm14, %v887_v32, %v863_v53  ;;  %v1067_v35 = vadd.s32 %v1066_v34, %v1062_v56  ;;  %vm4273_vm0 = vcmp.le.f32.partialorder %v801_v25, 0.7853982 }
 0x1d8   :  { %v2894_v15 = vadd.s32 4294967169, %v496_v40  ;;  %v499_v42 = vand.u32 8388607, %v492_v38  ;;  %v993_v14 = vsel %vm4211_vm7, 0, %v991_v12  ;;  %v857_v52 = vadd.s32 %v4179_v6, %v4176_v19 }
 0x1d9   :  { %vm2909_vm15 = vcmp.lt.s32.totalorder %v2908_v8, 0  ;;  %v890_v7 = vsel %vm4273_vm0, 0, %v888_v39  ;;  %v1068_v25 = vadd.s32 536870912, %v1067_v35  ;;  %v1217_v36 = vshrl.u32 %v1216_v1, 23 }
 0x1da   :  { %v872_v63 = vsel %vm2909_vm15, 0, %v2908_v8  ;;  %v502_v48 = vadd.s32 1, %v2894_v15  ;;  %v500_v19 = vor.u32 8388608, %v499_v42  ;;  %v4292_v45 = vand.u32 3, %v993_v14 }
 0x1db   :  { %v873_v21 = vsub.s32 32, %v872_v63  ;;  %v877_v53 = vsub.s32 4294967266, %v872_v63  ;;  %v874_v37 = vshll.u32 %v4226_v43, %v872_v63  ;;  %v4290_v41 = vshrl.u32 %v1068_v25, 30 }
 0x1dc   :  { %vm503_vm1 = vcmp.gt.s32.totalorder %v502_v48, 0  ;;  %v4285_v26 = vpop.eup %3177  ;;  %v4294_v44 = vand.u32 3, %v890_v7  ;;  %v4297_v57 = vadd.s32 %v4246_v10, %v4244_v9  ;;  %v1213_v5 = vand.u32 2147483647, %v4252_v29 }
 0x1dd   :  { %v875_v3 = vshrl.u32 %v857_v52, %v873_v21  ;;  %v878_v49 = vadd.s32 127, %v877_v53  ;;  %v504_v22 = vsel %vm503_vm1, %v502_v48, 0  ;;  %v4288_v28 = vpop.eup %3179  ;;  %v1070_v43 = vshll.u32 %v4290_v41, 30 }
 0x1de   :  { %v506_v6 = vand.u32 31, %v504_v22  ;;  %v1000_v55 = vxor.u32 2147483648, %v4288_v28  ;;  %v1003_v20 = vxor.u32 2147483648, %v4285_v26  ;;  %v2922_v47 = vadd.s32 4294967169, %v1217_v36 }
 0x1df   :  { %v876_v50 = vor.u32 %v875_v3, %v874_v37  ;;  %v879_v30 = vshll.u32 %v878_v49, 23  ;;  %v4303_v40 = vsub.s32 %v1067_v35, %v1070_v43  ;;  %v4305_v8 = vshrl.u32 %v504_v22, 5 }
 0x1e0   :  { %v507_v54 = vsub.s32 32, %v506_v6  ;;  %v4308_v12 = vshll.u32 %v500_v19, 8  ;;  %v509_v39 = vshll.u32 %v3267_v58, %v506_v6  ;;  %v512_v63 = vshll.u32 %v3268_v62, %v506_v6 }
 0x1e1   :  { %v880_v32 = vor.u32 4788187, %v879_v30  ;;  %v883_v10 = vcvt.s32.f32 %v876_v50  ;;  %v1073_v1 = vsub.s32 0, %v4303_v40  ;;  %v515_v35 = vshll.u32 %v3269_v0, %v506_v6 }
 0x1e2   :  { %v510_v56 = vshrl.u32 %v3268_v62, %v507_v54  ;;  %v513_v34 = vshrl.u32 %v3269_v0, %v507_v54  ;;  %v516_v15 = vshrl.u32 %v3270_v2, %v507_v54  ;;  %v518_v48 = vshll.u32 %v3270_v2, %v506_v6 }
 0x1e3   :  { %v881_v9 = vand.u32 2147483647, %v880_v32  ;;  %v519_v14 = vshrl.u32 %v3271_v4, %v507_v54  ;;  %v1223_v52 = vadd.s32 1, %v2922_v47  ;;  %v2915_v21 = vmin.u32 %v1073_v1, %v4303_v40 }
 0x1e4   :  { %v511_v53 = vor.u32 %v510_v56, %v509_v39  ;;  %v514_v7 = vor.u32 %v513_v34, %v512_v63  ;;  %v517_v25 = vor.u32 %v516_v15, %v515_v35  ;;  %v521_v3 = vshll.u32 %v3271_v4, %v506_v6  ;;  %v4354_v15 = vpop.f32.mrb[9].mxu0 }
 0x1e5   :  { %v884_v42 = vmul.f32 %v883_v10, %v881_v9  ;;  %v520_v37 = vor.u32 %v519_v14, %v518_v48  ;;  %v522_v49 = vshrl.u32 %v3272_v11, %v507_v54  ;;  %vm999_vm2 = vcmp.eq.s32.totalorder %v4292_v45, 0 }
 0x1e6   :  { %vm1002_vm3 = vcmp.eq.s32.totalorder %v4292_v45, 2  ;;  %v1075_v22 = vclz %v2915_v21  ;;  %v1093_v19 = vsub.s32 4, %v4290_v41  ;;  %v508_v50 = vshrl.u32 %v3267_v58, %v507_v54 }
 0x1e7   :  { %v885_v36 = vxor.u32 2147483648, %v884_v42  ;;  %vm524_vm4 = vcmp.lt.s32.totalorder %v4305_v8, 1  ;;  %vm1009_vm5 = vcmp.lt.s32.totalorder %v4086_v13, 0  ;;  %v523_v43 = vor.u32 %v522_v49, %v521_v3 }
 0x1e8   :  { %vm525_vm6 = vcmp.lt.s32.totalorder %v4305_v8, 2  ;;  %vm527_vm7 = vcmp.lt.s32.totalorder %v4305_v8, 4  ;;  %v2916_v32 = vadd.s32 4294967294, %v1075_v22  ;;  %v532_v47 = vsel %vm524_vm4, %v511_v53, %v514_v7 }
 0x1e9   :  { %v886_v30 = vsel %vm803_vm14, %v885_v36, %v884_v42  ;;  %v529_v54 = vsel %vm527_vm7, %v517_v25, 2102212464  ;;  %vm998_vm8 = vcmp.lt.s32.totalorder %v4292_v45, 2  ;;  %vm526_vm9 = vcmp.lt.s32.totalorder %v4305_v8, 3 }
 0x1ea   :  { %v889_v6 = vsel %vm4273_vm0, %v4082_v60, %v886_v30  ;;  %v528_v56 = vsel %vm524_vm4, %v508_v50, %v511_v53  ;;  %v533_v9 = vsel %vm527_vm7, %v520_v37, 920167782  ;;  %vm4346_vm10 = vcmp.le.f32.partialorder %v1007_v51, 0.7853982 }
 0x1eb   :  { %3181 = vcosq.f32 %v889_v6  ;;  %vm2917_vm11 = vcmp.lt.s32.totalorder %v2916_v32, 0  ;;  %v534_v10 = vsel %vm526_vm9, %v517_v25, %v533_v9  ;;  %v536_v34 = vsel %vm524_vm4, %v514_v7, %v517_v25 }
 0x1ec   :  { %3183 = vsinq.f32 %v889_v6  ;;  %v1078_v1 = vsel %vm2917_vm11, 0, %v2916_v32  ;;  %v530_v39 = vsel %vm526_vm9, %v514_v7, %v529_v54  ;;  %v535_v63 = vsel %vm525_vm6, %v532_v47, %v534_v10 }
 0x1ed   :  { %v537_v51 = vsel %vm527_vm7, %v523_v43, 1326507024  ;;  %v1079_v35 = vsub.s32 32, %v1078_v1  ;;  %v1080_v42 = vshll.u32 %v4303_v40, %v1078_v1  ;;  %v1083_v48 = vsub.s32 4294967266, %v1078_v1 }
 0x1ee   :  { %v538_v14 = vsel %vm526_vm9, %v520_v37, %v537_v51  ;;  %v4368_v53 = vmul.u32.u64.low %v4308_v12, %v535_v63  ;;  %v4369_v25 = vmul.u32.u64.high %v4308_v12, %v535_v63, %v4368_v53  ;;  %vm1224_vm12 = vcmp.gt.s32.totalorder %v1223_v52, 0 }
 0x1ef   :  { %v539_v21 = vsel %vm525_vm6, %v536_v34, %v538_v14  ;;  %v1081_v7 = vshrl.u32 %v4297_v57, %v1079_v35  ;;  %v1084_v36 = vadd.s32 127, %v1083_v48  ;;  %v1001_v40 = vsel %vm999_vm2, %v4285_v26, %v1000_v55 }
 0x1f0   :  { %v4374_v3 = vmul.u32.u64.low %v4308_v12, %v539_v21  ;;  %v4375_v49 = vmul.u32.u64.high %v4308_v12, %v539_v21, %v4374_v3  ;;  %v1004_v37 = vsel %vm1002_vm3, %v1003_v20, %v4288_v28  ;;  %vm895_vm13 = vcmp.lt.s32.totalorder %v4294_v44, 2 }
 0x1f1   :  { %v531_v57 = vsel %vm525_vm6, %v528_v56, %v530_v39  ;;  %v1225_v22 = vsel %vm1224_vm12, %v1223_v52, 0  ;;  %vm893_vm14 = vweird.f32 %v4082_v60  ;;  %v1082_v50 = vor.u32 %v1081_v7, %v1080_v42 }
 0x1f2   :  { %v1085_v30 = vshll.u32 %v1084_v36, 23  ;;  %v1094_v55 = vsel %vm1009_vm5, %v1093_v19, %v4290_v41  ;;  %v1227_v43 = vand.u32 31, %v1225_v22  ;;  %vm896_vm15 = vcmp.eq.s32.totalorder %v4294_v44, 0 }
 0x1f3   :  { %vm899_vm0 = vcmp.eq.s32.totalorder %v4294_v44, 2  ;;  %v550_v26 = vadd.s32 1, %v4369_v25  ;;  %v4399_v28 = vand.u32 8388607, %v1213_v5  ;;  %v1005_v20 = vsel %vm998_vm8, %v1001_v40, %v1004_v37 }
 0x1f4   :  { %v1086_v8 = vor.u32 4788187, %v1085_v30  ;;  %v547_v52 = vmul.u32 %v4308_v12, %v531_v57  ;;  %vm549_vm1 = vc.u32 %v4375_v49, %v4368_v53  ;;  %v1096_v19 = vsel %vm4346_vm10, 0, %v1094_v55 }
 0x1f5   :  { %v3182_v41 = vpop.eup %3181  ;;  %v551_v6 = vsel %vm549_vm1, %v550_v26, %v4369_v25  ;;  %v1228_v32 = vsub.s32 32, %v1227_v43  ;;  %v4411_v54 = vadd.f32 %v3879_v31, %v4069_v24  ;;  %vm996_vm2 = vweird.f32 %v3902_v27 }
 0x1f6   :  { %v3184_v47 = vpop.eup %3183  ;;  %v900_v45 = vxor.u32 2147483648, %v3182_v41  ;;  %v1087_v56 = vand.u32 2147483647, %v1086_v8  ;;  %v1089_v12 = vcvt.s32.f32 %v1082_v50  ;;  %v552_v9 = vadd.s32 %v551_v6, %v547_v52 }
 0x1f7   :  { %v897_v10 = vxor.u32 2147483648, %v3184_v47  ;;  %v4414_v34 = vshrl.u32 %v1225_v22, 5  ;;  %v1230_v1 = vshll.u32 %v3267_v58, %v1227_v43  ;;  %v1231_v39 = vshrl.u32 %v3268_v62, %v1228_v32 }
 0x1f8   :  { %v901_v63 = vsel %vm899_vm0, %v900_v45, %v3184_v47  ;;  %v1090_v51 = vmul.f32 %v1089_v12, %v1087_v56  ;;  %v553_v31 = vadd.s32 536870912, %v552_v9  ;;  %v1234_v35 = vshrl.u32 %v3269_v0, %v1228_v32 }
 0x1f9   :  { %v898_v42 = vsel %vm896_vm15, %v3182_v41, %v897_v10  ;;  %v1233_v48 = vshll.u32 %v3268_v62, %v1227_v43  ;;  %v1236_v14 = vshll.u32 %v3269_v0, %v1227_v43  ;;  %v1237_v21 = vshrl.u32 %v3270_v2, %v1228_v32 }
 0x1fa   :  { %v902_v25 = vsel %vm895_vm13, %v898_v42, %v901_v63  ;;  %v1091_v7 = vxor.u32 2147483648, %v1090_v51  ;;  %v4428_v36 = vshrl.u32 %v553_v31, 30  ;;  %v1232_v3 = vor.u32 %v1231_v39, %v1230_v1 }
 0x1fb   :  { %v903_v40 = vsel %vm893_vm14, nan, %v902_v25  ;;  %v1239_v37 = vshll.u32 %v3270_v2, %v1227_v43  ;;  %v1240_v57 = vshrl.u32 %v3271_v4, %v1228_v32  ;;  %v1243_v22 = vshrl.u32 %v3272_v11, %v1228_v32 }
 0x1fc   :  { %v3001_v50 = vpack.c.bf16 %v903_v40, %v903_v40  ;;  %v1092_v30 = vsel %vm1009_vm5, %v1091_v7, %v1090_v51  ;;  %v555_v44 = vshll.u32 %v4428_v36, 30  ;;  %v1235_v55 = vor.u32 %v1234_v35, %v1233_v48  ;;  %v4473_v40 = vpop.f32.mrb[9].mxu1 }
 0x1fd   :  { %v1095_v26 = vsel %vm4346_vm10, %v4086_v13, %v1092_v30  ;;  %v1238_v8 = vor.u32 %v1237_v21, %v1236_v14  ;;  %v1241_v60 = vor.u32 %v1240_v57, %v1239_v37  ;;  %v1242_v52 = vshll.u32 %v3271_v4, %v1227_v43 }
 0x1fe   :  { %2841 = vst [vmem:[#allocation2 + $0x14] sm:$0xf] %v3001_v50  ;;  %3185 = vcosq.f32 %v1095_v26  ;;  %v4442_v41 = vsub.s32 %v552_v9, %v555_v44  ;;  %v1221_v6 = vor.u32 8388608, %v4399_v28  ;;  %v4447_v47 = vadd.f32 %v3956_v59, %v3354_v18 }
 0x1ff   :  { %v4451_v45 = vsel %vm996_vm2, nan, %v1005_v20  ;;  %3187 = vsinq.f32 %v1095_v26  ;;  %v1100_v16 = vand.u32 3, %v1096_v19  ;;  %v1244_v56 = vor.u32 %v1243_v22, %v1242_v52 }
 0x200   :  { %v558_v12 = vsub.s32 0, %v4442_v41  ;;  %vm1245_vm3 = vcmp.lt.s32.totalorder %v4414_v34, 1  ;;  %vm1248_vm4 = vcmp.lt.s32.totalorder %v4414_v34, 4  ;;  %v1422_v43 = vand.u32 2139095040, %v4411_v54 }
 0x201   :  { %v1229_v28 = vshrl.u32 %v3267_v58, %v1228_v32  ;;  %v1250_v9 = vsel %vm1248_vm4, %v1238_v8, 2102212464  ;;  %v1253_v59 = vsel %vm1245_vm3, %v1232_v3, %v1235_v55  ;;  %v1254_v10 = vsel %vm1248_vm4, %v1241_v60, 920167782 }
 0x202   :  { %v2895_v27 = vmin.u32 %v558_v12, %v4442_v41  ;;  %vm1247_vm5 = vcmp.lt.s32.totalorder %v4414_v34, 3  ;;  %v1257_v20 = vsel %vm1245_vm3, %v1235_v55, %v1238_v8  ;;  %v1261_v19 = vshll.u32 %v1221_v6, 8 }
 0x203   :  { %vm1246_vm6 = vcmp.lt.s32.totalorder %v4414_v34, 2  ;;  %v1249_v1 = vsel %vm1245_vm3, %v1229_v28, %v1232_v3  ;;  %v1255_v39 = vsel %vm1247_vm5, %v1238_v8, %v1254_v10  ;;  %v1258_v63 = vsel %vm1248_vm4, %v1244_v56, 1326507024 }
 0x204   :  { %v560_v51 = vclz %v2895_v27  ;;  %v1251_v31 = vsel %vm1247_vm5, %v1235_v55, %v1250_v9  ;;  %v1256_v35 = vsel %vm1246_vm6, %v1253_v59, %v1255_v39  ;;  %v1259_v32 = vsel %vm1247_vm5, %v1241_v60, %v1258_v63 }
 0x205   :  { %vm1099_vm7 = vweird.f32 %v4086_v13  ;;  %v1260_v42 = vsel %vm1246_vm6, %v1257_v20, %v1259_v32  ;;  %v4466_v48 = vmul.u32.u64.low %v1261_v19, %v1256_v35  ;;  %v4467_v14 = vmul.u32.u64.high %v1261_v19, %v1256_v35, %v4466_v48 }
 0x206   :  { %v1423_v21 = vshrl.u32 %v1422_v43, 23  ;;  %vm1101_vm8 = vcmp.lt.s32.totalorder %v1100_v16, 2  ;;  %v2896_v25 = vadd.s32 4294967294, %v560_v51  ;;  %vm1102_vm9 = vcmp.eq.s32.totalorder %v1100_v16, 0 }
 0x207   :  { %v4470_v7 = vmul.u32.u64.low %v1261_v19, %v1260_v42  ;;  %v4471_v3 = vmul.u32.u64.high %v1261_v19, %v1260_v42, %v4470_v7  ;;  %vm1105_vm10 = vcmp.eq.s32.totalorder %v1100_v16, 2  ;;  %v1252_v37 = vsel %vm1246_vm6, %v1249_v1, %v1251_v31 }
 0x208   :  { %v2930_v57 = vadd.s32 4294967169, %v1423_v21  ;;  %v3186_v22 = vpop.eup %3185  ;;  %v548_v50 = vadd.s32 %v4368_v53, %v4375_v49  ;;  %vm2897_vm11 = vcmp.lt.s32.totalorder %v2896_v25, 0  ;;  %v578_v30 = vsub.s32 4, %v4428_v36 }
 0x209   :  { %v1419_v44 = vand.u32 2147483647, %v4411_v54  ;;  %v3188_v55 = vpop.eup %3187  ;;  %v1106_v26 = vxor.u32 2147483648, %v3186_v22  ;;  %v563_v8 = vsel %vm2897_vm11, 0, %v2896_v25  ;;  %v1271_v60 = vadd.s32 1, %v4467_v14 }
 0x20a   :  { %v1429_v52 = vadd.s32 1, %v2930_v57  ;;  %v1103_v6 = vxor.u32 2147483648, %v3188_v55  ;;  %v564_v56 = vsub.s32 32, %v563_v8  ;;  %v568_v34 = vsub.s32 4294967266, %v563_v8 }
 0x20b   :  { %v1268_v12 = vmul.u32 %v1261_v19, %v1252_v37  ;;  %v1107_v43 = vsel %vm1105_vm10, %v1106_v26, %v3188_v55  ;;  %v565_v28 = vshll.u32 %v4442_v41, %v563_v8  ;;  %vm1270_vm12 = vc.u32 %v4471_v3, %v4466_v48 }
 0x20c   :  { %vm1430_vm13 = vcmp.gt.s32.totalorder %v1429_v52, 0  ;;  %v1104_v53 = vsel %vm1102_vm9, %v3186_v22, %v1103_v6  ;;  %v566_v49 = vshrl.u32 %v548_v50, %v564_v56  ;;  %v569_v9 = vadd.s32 127, %v568_v34 }
 0x20d   :  { %v1272_v59 = vsel %vm1270_vm12, %v1271_v60, %v4467_v14  ;;  %v1108_v10 = vsel %vm1101_vm8, %v1104_v53, %v1107_v43  ;;  %v1426_v20 = vand.u32 8388607, %v1419_v44  ;;  %v1431_v19 = vsel %vm1430_vm13, %v1429_v52, 0 }
 0x20e   :  { %v1273_v27 = vadd.s32 %v1272_v59, %v1268_v12  ;;  %v1109_v41 = vsel %vm1099_vm7, nan, %v1108_v10  ;;  %v567_v1 = vor.u32 %v566_v49, %v565_v28  ;;  %v570_v39 = vshll.u32 %v569_v9, 23 }
 0x20f   :  { %v3002_v63 = vpack.c.bf16 %v1109_v41, %v4451_v45  ;;  %vm494_vm14 = vcmp.lt.s32.totalorder %v4236_v33, 0  ;;  %v1433_v31 = vand.u32 31, %v1431_v19  ;;  %vm4497_vm15 = vcmp.le.f32.partialorder %v492_v38, 0.7853982 }
 0x210   :  { %v1274_v51 = vadd.s32 536870912, %v1273_v27  ;;  %v571_v35 = vor.u32 4788187, %v570_v39  ;;  %v4504_v13 = vsel %vm494_vm14, %v578_v30, %v4428_v36  ;;  %v1427_v45 = vor.u32 8388608, %v1426_v20 }
 0x211   :  { %2842 = vst [vmem:[#allocation2 + $0x18] sm:$0xff] %v3002_v63  ;;  %v1434_v42 = vsub.s32 32, %v1433_v31  ;;  %v1319_v14 = vand.u32 2139095040, %v4447_v47  ;;  %v574_v25 = vcvt.s32.f32 %v567_v1  ;;  %v1432_v7 = vshrl.u32 %v1431_v19, 5 }
 0x212   :  { %v4506_v32 = vshrl.u32 %v1274_v51, 30  ;;  %v572_v21 = vand.u32 2147483647, %v571_v35  ;;  %v1436_v38 = vshll.u32 %v3267_v58, %v1433_v31  ;;  %v1439_v22 = vshll.u32 %v3268_v62, %v1433_v31 }
 0x213   :  { %v1437_v57 = vshrl.u32 %v3268_v62, %v1434_v42  ;;  %v1442_v36 = vshll.u32 %v3269_v0, %v1433_v31  ;;  %v1440_v30 = vshrl.u32 %v3269_v0, %v1434_v42  ;;  %v1443_v55 = vshrl.u32 %v3270_v2, %v1434_v42 }
 0x214   :  { %v1276_v37 = vshll.u32 %v4506_v32, 30  ;;  %v575_v50 = vmul.f32 %v574_v25, %v572_v21  ;;  %v1446_v26 = vshrl.u32 %v3271_v4, %v1434_v42  ;;  %v1445_v60 = vshll.u32 %v3270_v2, %v1433_v31 }
 0x215   :  { %v1448_v52 = vshll.u32 %v3271_v4, %v1433_v31  ;;  %v1449_v6 = vshrl.u32 %v3272_v11, %v1434_v42  ;;  %v1438_v34 = vor.u32 %v1437_v57, %v1436_v38  ;;  %v1441_v12 = vor.u32 %v1440_v30, %v1439_v22 }
 0x216   :  { %v4517_v8 = vsub.s32 %v1273_v27, %v1276_v37  ;;  %v576_v56 = vxor.u32 2147483648, %v575_v50  ;;  %v1444_v43 = vor.u32 %v1443_v55, %v1442_v36  ;;  %v1447_v53 = vor.u32 %v1446_v26, %v1445_v60 }
 0x217   :  { %v1467_v49 = vshll.u32 %v1427_v45, 8  ;;  %v1320_v9 = vshrl.u32 %v1319_v14, 23  ;;  %v1450_v10 = vor.u32 %v1449_v6, %v1448_v52  ;;  %vm1451_vm0 = vcmp.lt.s32.totalorder %v1432_v7, 1 }
 0x218   :  { %v1279_v28 = vsub.s32 0, %v4517_v8  ;;  %v577_v59 = vsel %vm494_vm14, %v576_v56, %v575_v50  ;;  %vm1452_vm1 = vcmp.lt.s32.totalorder %v1432_v7, 2  ;;  %v1435_v19 = vshrl.u32 %v3267_v58, %v1434_v42 }
 0x219   :  { %v580_v27 = vsel %vm4497_vm15, %v4236_v33, %v577_v59  ;;  %vm1454_vm2 = vcmp.lt.s32.totalorder %v1432_v7, 4  ;;  %vm1453_vm3 = vcmp.lt.s32.totalorder %v1432_v7, 3  ;;  %v1459_v1 = vsel %vm1451_vm0, %v1438_v34, %v1441_v12 }
 0x21a   :  { %v2923_v20 = vmin.u32 %v1279_v28, %v4517_v8  ;;  %3189 = vcosq.f32 %v580_v27  ;;  %v1456_v41 = vsel %vm1454_vm2, %v1444_v43, 2102212464  ;;  %v1455_v63 = vsel %vm1451_vm0, %v1435_v19, %v1438_v34 }
 0x21b   :  { %3191 = vsinq.f32 %v580_v27  ;;  %v1460_v51 = vsel %vm1454_vm2, %v1447_v53, 920167782  ;;  %v1457_v31 = vsel %vm1453_vm3, %v1441_v12, %v1456_v41  ;;  %v1463_v45 = vsel %vm1451_vm0, %v1441_v12, %v1444_v43 }
 0x21c   :  { %v1281_v39 = vclz %v2923_v20  ;;  %v1461_v35 = vsel %vm1453_vm3, %v1444_v43, %v1460_v51  ;;  %v1464_v14 = vsel %vm1454_vm2, %v1450_v10, 1326507024  ;;  %v581_v42 = vsel %vm4497_vm15, 0, %v4504_v13 }
 0x21d   :  { %v1462_v25 = vsel %vm1452_vm1, %v1459_v1, %v1461_v35  ;;  %v1465_v38 = vsel %vm1453_vm3, %v1447_v53, %v1464_v14  ;;  %v2926_v36 = vadd.s32 4294967169, %v1320_v9  ;;  %v1458_v50 = vsel %vm1452_vm1, %v1455_v63, %v1457_v31  ;;  %v4555_v9 = vpop.f32.mrb[10].mxu0 }
 0x21e   :  { %v2924_v21 = vadd.s32 4294967294, %v1281_v39  ;;  %v1466_v37 = vsel %vm1452_vm1, %v1463_v45, %v1465_v38  ;;  %v4538_v57 = vmul.u32.u64.low %v1467_v49, %v1462_v25  ;;  %v4539_v22 = vmul.u32.u64.high %v1467_v49, %v1462_v25, %v4538_v57 }
 0x21f   :  { %v4543_v30 = vmul.u32.u64.low %v1467_v49, %v1466_v37  ;;  %v4544_v55 = vmul.u32.u64.high %v1467_v49, %v1466_v37, %v4543_v30  ;;  %v1326_v16 = vadd.s32 1, %v2926_v36  ;;  %v1269_v13 = vadd.s32 %v4466_v48, %v4471_v3 }
 0x220   :  { %vm2925_vm4 = vcmp.lt.s32.totalorder %v2924_v21, 0  ;;  %v1316_v6 = vand.u32 2147483647, %v4447_v47  ;;  %v585_v56 = vand.u32 3, %v581_v42  ;;  %v1474_v34 = vmul.u32 %v1467_v49, %v1458_v50 }
 0x221   :  { %v1284_v26 = vsel %vm2925_vm4, 0, %v2924_v21  ;;  %v1477_v12 = vadd.s32 1, %v4539_v22  ;;  %vm1327_vm5 = vcmp.gt.s32.totalorder %v1326_v16, 0  ;;  %vm1476_vm6 = vc.u32 %v4544_v55, %v4538_v57 }
 0x222   :  { %v1285_v60 = vsub.s32 32, %v1284_v26  ;;  %v1289_v52 = vsub.s32 4294967266, %v1284_v26  ;;  %v1286_v7 = vshll.u32 %v4517_v8, %v1284_v26  ;;  %vm584_vm7 = vweird.f32 %v4236_v33 }
 0x223   :  { %v1478_v48 = vsel %vm1476_vm6, %v1477_v12, %v4539_v22  ;;  %v1328_v3 = vsel %vm1327_vm5, %v1326_v16, 0  ;;  %vm590_vm8 = vcmp.eq.s32.totalorder %v585_v56, 2  ;;  %v1323_v8 = vand.u32 8388607, %v1316_v6 }
 0x224   :  { %v1287_v43 = vshrl.u32 %v1269_v13, %v1285_v60  ;;  %v1290_v28 = vadd.s32 127, %v1289_v52  ;;  %v3190_v53 = vpop.eup %3189  ;;  %v1479_v20 = vadd.s32 %v1478_v48, %v1474_v34  ;;  %v1330_v41 = vand.u32 31, %v1328_v3 }
 0x225   :  { %v3192_v59 = vpop.eup %3191  ;;  %v591_v49 = vxor.u32 2147483648, %v3190_v53  ;;  %vm587_vm9 = vcmp.eq.s32.totalorder %v585_v56, 0  ;;  %vm586_vm10 = vcmp.lt.s32.totalorder %v585_v56, 2  ;;  %v4561_v35 = vadd.f32 %v4090_v46, %v4069_v24 }
 0x226   :  { %v1288_v10 = vor.u32 %v1287_v43, %v1286_v7  ;;  %v1291_v27 = vshll.u32 %v1290_v28, 23  ;;  %v588_v19 = vxor.u32 2147483648, %v3192_v59  ;;  %v1480_v63 = vadd.s32 536870912, %v1479_v20 }
 0x227   :  { %v592_v1 = vsel %vm590_vm8, %v591_v49, %v3192_v59  ;;  %v1331_v31 = vsub.s32 32, %v1330_v41  ;;  %vm1215_vm11 = vcmp.lt.s32.totalorder %v4252_v29, 0  ;;  %v1324_v38 = vor.u32 8388608, %v1323_v8 }
 0x228   :  { %v1292_v39 = vor.u32 4788187, %v1291_v27  ;;  %v589_v51 = vsel %vm587_vm9, %v3190_v53, %v588_v19  ;;  %v1295_v42 = vcvt.s32.f32 %v1288_v10  ;;  %v4563_v21 = vshrl.u32 %v1480_v63, 30 }
 0x229   :  { %v593_v45 = vsel %vm586_vm10, %v589_v51, %v592_v1  ;;  %v1334_v37 = vshrl.u32 %v3268_v62, %v1331_v31  ;;  %v1337_v46 = vshrl.u32 %v3269_v0, %v1331_v31  ;;  %v1333_v30 = vshll.u32 %v3267_v58, %v1330_v41 }
 0x22a   :  { %v1293_v14 = vand.u32 2147483647, %v1292_v39  ;;  %v594_v25 = vsel %vm584_vm7, nan, %v593_v45  ;;  %v1482_v50 = vshll.u32 %v4563_v21, 30  ;;  %v1336_v26 = vshll.u32 %v3268_v62, %v1330_v41 }
 0x22b   :  { %v2999_v22 = vpack.c.bf16 %v594_v25, %v594_v25  ;;  %v1340_v16 = vshrl.u32 %v3270_v2, %v1331_v31  ;;  %v1113_v33 = vand.u32 2139095040, %v4561_v35  ;;  %v1339_v52 = vshll.u32 %v3269_v0, %v1330_v41 }
 0x22c   :  { %v1296_v36 = vmul.f32 %v1295_v42, %v1293_v14  ;;  %v4575_v60 = vsub.s32 %v1479_v20, %v1482_v50  ;;  %v1343_v56 = vshrl.u32 %v3271_v4, %v1331_v31  ;;  %v1329_v34 = vshrl.u32 %v1328_v3, 5 }
 0x22d   :  { %2839 = vst [vmem:[#allocation2 + $0x8] sm:$0xf] %v2999_v22  ;;  %v1342_v12 = vshll.u32 %v3270_v2, %v1330_v41  ;;  %v1345_v7 = vshll.u32 %v3271_v4, %v1330_v41  ;;  %v1346_v43 = vshrl.u32 %v3272_v11, %v1331_v31  ;;  %v1335_v53 = vor.u32 %v1334_v37, %v1333_v30 }
 0x22e   :  { %v1297_v13 = vxor.u32 2147483648, %v1296_v36  ;;  %v1485_v28 = vsub.s32 0, %v4575_v60  ;;  %v1338_v48 = vor.u32 %v1337_v46, %v1336_v26  ;;  %v1341_v59 = vor.u32 %v1340_v16, %v1339_v52 }
 0x22f   :  { %vm4585_vm12 = vcmp.le.f32.partialorder %v1213_v5, 0.7853982  ;;  %v1344_v10 = vor.u32 %v1343_v56, %v1342_v12  ;;  %v1347_v27 = vor.u32 %v1346_v43, %v1345_v7  ;;  %v1299_v20 = vsub.s32 4, %v4506_v32 }
 0x230   :  { %v1298_v3 = vsel %vm1215_vm11, %v1297_v13, %v1296_v36  ;;  %vm1421_vm13 = vcmp.lt.s32.totalorder %v4411_v54, 0  ;;  %v2931_v19 = vmin.u32 %v1485_v28, %v4575_v60  ;;  %v1364_v8 = vshll.u32 %v1324_v38, 8  ;;  %v4609_v38 = vpop.f32.mrb[10].mxu1 }
 0x231   :  { %v1114_v41 = vshrl.u32 %v1113_v33, 23  ;;  %v1505_v1 = vsub.s32 4, %v4563_v21  ;;  %v1332_v5 = vshrl.u32 %v3267_v58, %v1331_v31  ;;  %vm1348_vm14 = vcmp.lt.s32.totalorder %v1329_v34, 1 }
 0x232   :  { %vm1351_vm15 = vcmp.lt.s32.totalorder %v1329_v34, 4  ;;  %v4599_v39 = vsel %vm4585_vm12, %v4252_v29, %v1298_v3  ;;  %v1487_v63 = vclz %v2931_v19  ;;  %v1356_v45 = vsel %vm1348_vm14, %v1335_v53, %v1338_v48 }
 0x233   :  { %v1353_v51 = vsel %vm1351_vm15, %v1341_v59, 2102212464  ;;  %vm4604_vm0 = vcmp.le.f32.partialorder %v1419_v44, 0.7853982  ;;  %vm1350_vm1 = vcmp.lt.s32.totalorder %v1329_v34, 3  ;;  %v1360_v31 = vsel %vm1348_vm14, %v1338_v48, %v1341_v59 }
 0x234   :  { %v1357_v42 = vsel %vm1351_vm15, %v1344_v10, 920167782  ;;  %v1361_v25 = vsel %vm1351_vm15, %v1347_v27, 1326507024  ;;  %v2932_v37 = vadd.s32 4294967294, %v1487_v63  ;;  %vm1349_vm2 = vcmp.lt.s32.totalorder %v1329_v34, 2 }
 0x235   :  { %v1358_v22 = vsel %vm1350_vm1, %v1341_v59, %v1357_v42  ;;  %v1362_v36 = vsel %vm1350_vm1, %v1344_v10, %v1361_v25  ;;  %v1352_v50 = vsel %vm1348_vm14, %v1332_v5, %v1335_v53  ;;  %v2918_v30 = vadd.s32 4294967169, %v1114_v41 }
 0x236   :  { %v1359_v46 = vsel %vm1349_vm2, %v1356_v45, %v1358_v22  ;;  %v1363_v44 = vsel %vm1349_vm2, %v1360_v31, %v1362_v36  ;;  %vm2933_vm3 = vcmp.lt.s32.totalorder %v2932_v37, 0  ;;  %v1354_v26 = vsel %vm1350_vm1, %v1338_v48, %v1353_v51 }
 0x237   :  { %v4614_v16 = vmul.u32.u64.low %v1364_v8, %v1363_v44  ;;  %v4615_v33 = vmul.u32.u64.high %v1364_v8, %v1363_v44, %v4614_v16  ;;  %v1490_v13 = vsel %vm2933_vm3, 0, %v2932_v37  ;;  %v1120_v12 = vadd.s32 1, %v2918_v30 }
 0x238   :  { %v4617_v52 = vmul.u32.u64.low %v1364_v8, %v1359_v46  ;;  %v4618_v56 = vmul.u32.u64.high %v1364_v8, %v1359_v46, %v4617_v52  ;;  %v1300_v7 = vsel %vm1215_vm11, %v1299_v20, %v4506_v32  ;;  %v1475_v43 = vadd.s32 %v4538_v57, %v4544_v55 }
 0x239   :  { %v1491_v28 = vsub.s32 32, %v1490_v13  ;;  %v1495_v53 = vsub.s32 4294967266, %v1490_v13  ;;  %3193 = vcosq.f32 %v4599_v39  ;;  %v1506_v48 = vsel %vm1421_vm13, %v1505_v1, %v4563_v21 }
 0x23a   :  { %v1355_v59 = vsel %vm1349_vm2, %v1352_v50, %v1354_v26  ;;  %vm1121_vm4 = vcmp.gt.s32.totalorder %v1120_v12, 0  ;;  %v1492_v3 = vshll.u32 %v4575_v60, %v1490_v13  ;;  %vm1373_vm5 = vc.u32 %v4615_v33, %v4617_v52 }
 0x23b   :  { %v1493_v10 = vshrl.u32 %v1475_v43, %v1491_v28  ;;  %v1496_v27 = vadd.s32 127, %v1495_v53  ;;  %v1302_v32 = vsel %vm4585_vm12, 0, %v1300_v7  ;;  %v1374_v57 = vadd.s32 1, %v4618_v56 }
 0x23c   :  { %v1110_v55 = vand.u32 2147483647, %v4561_v35  ;;  %v1122_v20 = vsel %vm1121_vm4, %v1120_v12, 0  ;;  %v1508_v34 = vsel %vm4604_vm0, 0, %v1506_v48  ;;  %v1371_v41 = vmul.u32 %v1364_v8, %v1355_v59 }
 0x23d   :  { %v1494_v19 = vor.u32 %v1493_v10, %v1492_v3  ;;  %v1497_v21 = vshll.u32 %v1496_v27, 23  ;;  %v1375_v60 = vsel %vm1373_vm5, %v1374_v57, %v4618_v56  ;;  %v1124_v1 = vand.u32 31, %v1122_v20 }
 0x23e   :  { %v1376_v63 = vadd.s32 %v1375_v60, %v1371_v41  ;;  %v4641_v51 = vand.u32 3, %v1302_v32  ;;  %v4643_v49 = vand.u32 3, %v1508_v34  ;;  %v1117_v37 = vand.u32 8388607, %v1110_v55 }
 0x23f   :  { %v1498_v5 = vor.u32 4788187, %v1497_v21  ;;  %v1125_v45 = vsub.s32 32, %v1124_v1  ;;  %v1501_v31 = vcvt.s32.f32 %v1494_v19  ;;  %v1127_v22 = vshll.u32 %v3267_v58, %v1124_v1 }
 0x240   :  { %v1377_v25 = vadd.s32 536870912, %v1376_v63  ;;  %v1130_v30 = vshll.u32 %v3268_v62, %v1124_v1  ;;  %3195 = vsinq.f32 %v4599_v39  ;;  %v1123_v13 = vshrl.u32 %v1122_v20, 5 }
 0x241   :  { %v1499_v42 = vand.u32 2147483647, %v1498_v5  ;;  %v1128_v8 = vshrl.u32 %v3268_v62, %v1125_v45  ;;  %v1131_v36 = vshrl.u32 %v3269_v0, %v1125_v45  ;;  %v1134_v50 = vshrl.u32 %v3270_v2, %v1125_v45 }
 0x242   :  { %v4651_v44 = vshrl.u32 %v1377_v25, 30  ;;  %v1137_v26 = vshrl.u32 %v3271_v4, %v1125_v45  ;;  %v1133_v56 = vshll.u32 %v3269_v0, %v1124_v1  ;;  %v1136_v12 = vshll.u32 %v3270_v2, %v1124_v1 }
 0x243   :  { %v1502_v46 = vmul.f32 %v1501_v31, %v1499_v42  ;;  %v4655_v16 = vpop.eup %3193  ;;  %v1129_v28 = vor.u32 %v1128_v8, %v1127_v22  ;;  %v1132_v53 = vor.u32 %v1131_v36, %v1130_v30  ;;  %v1139_v3 = vshll.u32 %v3271_v4, %v1124_v1 }
 0x244   :  { %v1379_v43 = vshll.u32 %v4651_v44, 30  ;;  %v1135_v48 = vor.u32 %v1134_v50, %v1133_v56  ;;  %v1138_v59 = vor.u32 %v1137_v26, %v1136_v12  ;;  %v1140_v10 = vshrl.u32 %v3272_v11, %v1125_v45 }
 0x245   :  { %v1503_v7 = vxor.u32 2147483648, %v1502_v46  ;;  %v1118_v32 = vor.u32 8388608, %v1117_v37  ;;  %v4669_v57 = vadd.f32 %v4166_v23, %v3352_v17  ;;  %vm1311_vm6 = vcmp.eq.s32.totalorder %v4641_v51, 2 }
 0x246   :  { %v4665_v39 = vsub.s32 %v1376_v63, %v1379_v43  ;;  %v1312_v20 = vxor.u32 2147483648, %v4655_v16  ;;  %v1126_v21 = vshrl.u32 %v3267_v58, %v1125_v45  ;;  %v1141_v34 = vor.u32 %v1140_v10, %v1139_v3 }
 0x247   :  { %v1504_v27 = vsel %vm1421_vm13, %v1503_v7, %v1502_v46  ;;  %vm1142_vm7 = vcmp.lt.s32.totalorder %v1123_v13, 1  ;;  %vm1145_vm8 = vcmp.lt.s32.totalorder %v1123_v13, 4  ;;  %vm1318_vm9 = vcmp.lt.s32.totalorder %v4447_v47, 0 }
 0x248   :  { %v1507_v19 = vsel %vm4604_vm0, %v4411_v54, %v1504_v27  ;;  %v1382_v41 = vsub.s32 0, %v4665_v39  ;;  %v1147_v23 = vsel %vm1145_vm8, %v1135_v48, 2102212464  ;;  %v1150_v60 = vsel %vm1142_vm7, %v1129_v28, %v1132_v53 }
 0x249   :  { %3197 = vcosq.f32 %v1507_v19  ;;  %v1151_v1 = vsel %vm1145_vm8, %v1138_v59, 920167782  ;;  %vm1143_vm10 = vcmp.lt.s32.totalorder %v1123_v13, 2  ;;  %vm1144_vm11 = vcmp.lt.s32.totalorder %v1123_v13, 3 }
 0x24a   :  { %3199 = vsinq.f32 %v1507_v19  ;;  %v2927_v5 = vmin.u32 %v1382_v41, %v4665_v39  ;;  %v1158_v14 = vshll.u32 %v1118_v32, 8  ;;  %v1146_v63 = vsel %vm1142_vm7, %v1126_v21, %v1129_v28  ;;  %v3196_v36 = vpop.eup %3195  ;;  %v4713_v19 = vpop.f32.mrb[11].mxu0 }
 0x24b   :  { %v1152_v42 = vsel %vm1144_vm11, %v1135_v48, %v1151_v1  ;;  %v1154_v45 = vsel %vm1142_vm7, %v1132_v53, %v1135_v48  ;;  %v1155_v31 = vsel %vm1145_vm8, %v1141_v34, 1326507024  ;;  %v1148_v37 = vsel %vm1144_vm11, %v1132_v53, %v1147_v23 }
 0x24c   :  { %v1384_v25 = vclz %v2927_v5  ;;  %v1153_v22 = vsel %vm1143_vm10, %v1150_v60, %v1152_v42  ;;  %v1156_v8 = vsel %vm1144_vm11, %v1138_v59, %v1155_v31  ;;  %vm1308_vm12 = vcmp.eq.s32.totalorder %v4641_v51, 0 }
 0x24d   :  { %vm1514_vm13 = vcmp.eq.s32.totalorder %v4643_v49, 0  ;;  %v1157_v50 = vsel %vm1143_vm10, %v1154_v45, %v1156_v8  ;;  %v4684_v46 = vmul.u32.u64.low %v1158_v14, %v1153_v22  ;;  %v4685_v30 = vmul.u32.u64.high %v1158_v14, %v1153_v22, %v4684_v46 }
 0x24e   :  { %vm1513_vm14 = vcmp.lt.s32.totalorder %v4643_v49, 2  ;;  %vm4691_vm15 = vcmp.le.f32.partialorder %v1316_v6, 0.7853982  ;;  %v2928_v56 = vadd.s32 4294967294, %v1384_v25  ;;  %v1402_v12 = vsub.s32 4, %v4651_v44 }
 0x24f   :  { %v4696_v7 = vmul.u32.u64.low %v1158_v14, %v1157_v50  ;;  %v4697_v43 = vmul.u32.u64.high %v1158_v14, %v1157_v50, %v4696_v7  ;;  %vm1511_vm0 = vweird.f32 %v4411_v54  ;;  %vm1517_vm1 = vcmp.eq.s32.totalorder %v4643_v49, 2 }
 0x250   :  { %v1149_v28 = vsel %vm1143_vm10, %v1146_v63, %v1148_v37  ;;  %v1525_v53 = vand.u32 2139095040, %v4669_v57  ;;  %v4705_v6 = vadd.f32 %v4261_v61, %v4069_v24  ;;  %v1309_v48 = vxor.u32 2147483648, %v3196_v36 }
 0x251   :  { %v1313_v59 = vsel %vm1311_vm6, %v1312_v20, %v3196_v36  ;;  %v1372_v3 = vadd.s32 %v4617_v52, %v4615_v33  ;;  %vm2929_vm2 = vcmp.lt.s32.totalorder %v2928_v56, 0  ;;  %v1168_v27 = vadd.s32 1, %v4685_v30 }
 0x252   :  { %v1387_v10 = vsel %vm2929_vm2, 0, %v2928_v56  ;;  %v1522_v13 = vand.u32 2147483647, %v4669_v57  ;;  %v1526_v32 = vshrl.u32 %v1525_v53, 23  ;;  %v1403_v41 = vsel %vm1318_vm9, %v1402_v12, %v4651_v44 }
 0x253   :  { %v3198_v21 = vpop.eup %3197  ;;  %v1388_v34 = vsub.s32 32, %v1387_v10  ;;  %v1392_v61 = vsub.s32 4294967266, %v1387_v10  ;;  %v1165_v20 = vmul.u32 %v1158_v14, %v1149_v28  ;;  %v1389_v33 = vshll.u32 %v4665_v39, %v1387_v10 }
 0x254   :  { %v3200_v23 = vpop.eup %3199  ;;  %v1518_v60 = vxor.u32 2147483648, %v3198_v21  ;;  %vm1167_vm3 = vc.u32 %v4697_v43, %v4684_v46  ;;  %v2934_v52 = vadd.s32 4294967169, %v1526_v32  ;;  %v1529_v44 = vand.u32 8388607, %v1522_v13 }
 0x255   :  { %v1515_v1 = vxor.u32 2147483648, %v3200_v23  ;;  %v1390_v5 = vshrl.u32 %v1372_v3, %v1388_v34  ;;  %v1393_v63 = vadd.s32 127, %v1392_v61  ;;  %v1169_v42 = vsel %vm1167_vm3, %v1168_v27, %v4685_v30 }
 0x256   :  { %v1519_v45 = vsel %vm1517_vm1, %v1518_v60, %v3200_v23  ;;  %v1170_v31 = vadd.s32 %v1169_v42, %v1165_v20  ;;  %v1532_v14 = vadd.s32 1, %v2934_v52  ;;  %v1310_v39 = vsel %vm1308_vm12, %v4655_v16, %v1309_v48 }
 0x257   :  { %v1516_v25 = vsel %vm1514_vm13, %v3198_v21, %v1515_v1  ;;  %v1391_v37 = vor.u32 %v1390_v5, %v1389_v33  ;;  %v1394_v22 = vshll.u32 %v1393_v63, 23  ;;  %v1405_v36 = vsel %vm4691_vm15, 0, %v1403_v41 }
 0x258   :  { %v1520_v8 = vsel %vm1513_vm14, %v1516_v25, %v1519_v45  ;;  %v1171_v50 = vadd.s32 536870912, %v1170_v31  ;;  %vm1533_vm4 = vcmp.gt.s32.totalorder %v1532_v14, 0  ;;  %v2040_v16 = vand.u32 2139095040, %v4705_v6 }
 0x259   :  { %v1521_v30 = vsel %vm1511_vm0, nan, %v1520_v8  ;;  %v1395_v56 = vor.u32 4788187, %v1394_v22  ;;  %v1534_v12 = vsel %vm1533_vm4, %v1532_v14, 0  ;;  %v1530_v53 = vor.u32 8388608, %v1529_v44 }
 0x25a   :  { %v3005_v7 = vpack.c.bf16 %v1521_v30, %v1521_v30  ;;  %v4738_v28 = vshrl.u32 %v1171_v50, 30  ;;  %v1536_v48 = vand.u32 31, %v1534_v12  ;;  %vm1307_vm5 = vcmp.lt.s32.totalorder %v4641_v51, 2 }
 0x25b   :  { %v1396_v49 = vand.u32 2147483647, %v1395_v56  ;;  %v1398_v3 = vcvt.s32.f32 %v1391_v37  ;;  %v1314_v10 = vsel %vm1307_vm5, %v1310_v39, %v1313_v59  ;;  %v4742_v21 = vand.u32 3, %v1405_v36 }
 0x25c   :  { %2845 = vst [vmem:[#allocation2 + $0x2c] sm:$0xf] %v3005_v7  ;;  %v1173_v27 = vshll.u32 %v4738_v28, 30  ;;  %v1537_v32 = vsub.s32 32, %v1536_v48  ;;  %v2037_v34 = vand.u32 2147483647, %v4705_v6  ;;  %v1539_v59 = vshll.u32 %v3267_v58, %v1536_v48 }
 0x25d   :  { %v1399_v54 = vmul.f32 %v1398_v3, %v1396_v49  ;;  %v2041_v61 = vshrl.u32 %v2040_v16, 23  ;;  %v4747_v20 = vshrl.u32 %v1534_v12, 5  ;;  %v4750_v51 = vshll.u32 %v1530_v53, 8 }
 0x25e   :  { %v4745_v41 = vsub.s32 %v1170_v31, %v1173_v27  ;;  %v1540_v23 = vshrl.u32 %v3268_v62, %v1537_v32  ;;  %v1543_v33 = vshrl.u32 %v3269_v0, %v1537_v32  ;;  %v1546_v52 = vshrl.u32 %v3270_v2, %v1537_v32 }
 0x25f   :  { %v1400_v60 = vxor.u32 2147483648, %v1399_v54  ;;  %v1542_v5 = vshll.u32 %v3268_v62, %v1536_v48  ;;  %v1545_v63 = vshll.u32 %v3269_v0, %v1536_v48  ;;  %v1549_v42 = vshrl.u32 %v3271_v4, %v1537_v32 }
 0x260   :  { %v1176_v1 = vsub.s32 0, %v4745_v41  ;;  %vm1305_vm6 = vweird.f32 %v4252_v29  ;;  %v1541_v31 = vor.u32 %v1540_v23, %v1539_v59  ;;  %v1548_v44 = vshll.u32 %v3270_v2, %v1536_v48  ;;  %v4776_v23 = vpop.f32.mrb[11].mxu1 }
 0x261   :  { %v1401_v45 = vsel %vm1318_vm9, %v1400_v60, %v1399_v54  ;;  %v2954_v14 = vadd.s32 4294967169, %v2041_v61  ;;  %v1544_v37 = vor.u32 %v1543_v33, %v1542_v5  ;;  %v1547_v22 = vor.u32 %v1546_v52, %v1545_v63 }
 0x262   :  { %v1404_v39 = vsel %vm4691_vm15, %v4447_v47, %v1401_v45  ;;  %v2919_v25 = vmin.u32 %v1176_v1, %v4745_v41  ;;  %v1550_v8 = vor.u32 %v1549_v42, %v1548_v44  ;;  %v1551_v36 = vshll.u32 %v3271_v4, %v1536_v48 }
 0x263   :  { %3201 = vcosq.f32 %v1404_v39  ;;  %v1552_v50 = vshrl.u32 %v3272_v11, %v1537_v32  ;;  %v1538_v56 = vshrl.u32 %v3267_v58, %v1537_v32  ;;  %vm1554_vm7 = vcmp.lt.s32.totalorder %v4747_v20, 1 }
 0x264   :  { %3203 = vsinq.f32 %v1404_v39  ;;  %v1178_v30 = vclz %v2919_v25  ;;  %vm1555_vm8 = vcmp.lt.s32.totalorder %v4747_v20, 2  ;;  %vm1556_vm9 = vcmp.lt.s32.totalorder %v4747_v20, 3 }
 0x265   :  { %v1553_v12 = vor.u32 %v1552_v50, %v1551_v36  ;;  %vm1557_vm10 = vcmp.lt.s32.totalorder %v4747_v20, 4  ;;  %v1562_v7 = vsel %vm1554_vm7, %v1541_v31, %v1544_v37  ;;  %v1558_v48 = vsel %vm1554_vm7, %v1538_v56, %v1541_v31 }
 0x266   :  { %v2920_v26 = vadd.s32 4294967294, %v1178_v30  ;;  %v1559_v16 = vsel %vm1557_vm10, %v1547_v22, 2102212464  ;;  %v1563_v53 = vsel %vm1557_vm10, %v1550_v8, 920167782  ;;  %v1566_v3 = vsel %vm1554_vm7, %v1544_v37, %v1547_v22 }
 0x267   :  { %v1564_v49 = vsel %vm1556_vm9, %v1547_v22, %v1563_v53  ;;  %v1567_v27 = vsel %vm1557_vm10, %v1553_v12, 1326507024  ;;  %v1560_v54 = vsel %vm1556_vm9, %v1544_v37, %v1559_v16  ;;  %vm1112_vm12 = vcmp.lt.s32.totalorder %v4561_v35, 0 }
 0x268   :  { %vm2921_vm11 = vcmp.lt.s32.totalorder %v2920_v26, 0  ;;  %v1565_v32 = vsel %vm1555_vm8, %v1562_v7, %v1564_v49  ;;  %v1568_v61 = vsel %vm1556_vm9, %v1550_v8, %v1567_v27  ;;  %v1315_v1 = vsel %vm1305_vm6, nan, %v1314_v10 }
 0x269   :  { %v1181_v60 = vsel %vm2921_vm11, 0, %v2920_v26  ;;  %v1569_v59 = vsel %vm1555_vm8, %v1566_v3, %v1568_v61  ;;  %v4782_v33 = vmul.u32.u64.low %v4750_v51, %v1565_v32  ;;  %v4783_v52 = vmul.u32.u64.high %v4750_v51, %v1565_v32, %v4782_v33 }
 0x26a   :  { %vm1408_vm13 = vweird.f32 %v4447_v47  ;;  %v1166_v5 = vadd.s32 %v4684_v46, %v4697_v43  ;;  %v1182_v63 = vsub.s32 32, %v1181_v60  ;;  %v1186_v42 = vsub.s32 4294967266, %v1181_v60 }
 0x26b   :  { %vm1410_vm14 = vcmp.lt.s32.totalorder %v4742_v21, 2  ;;  %v4793_v45 = vmul.u32.u64.low %v4750_v51, %v1569_v59  ;;  %v4794_v31 = vmul.u32.u64.high %v4750_v51, %v1569_v59, %v4793_v45  ;;  %v2047_v44 = vadd.s32 1, %v2954_v14 }
 0x26c   :  { %v1183_v39 = vshll.u32 %v4745_v41, %v1181_v60  ;;  %v1184_v25 = vshrl.u32 %v1166_v5, %v1182_v63  ;;  %v1187_v37 = vadd.s32 127, %v1186_v42  ;;  %v1561_v29 = vsel %vm1555_vm8, %v1558_v48, %v1560_v54 }
 0x26d   :  { %v3202_v10 = vpop.eup %3201  ;;  %v1196_v22 = vsub.s32 4, %v4738_v28  ;;  %v1580_v46 = vadd.s32 1, %v4783_v52  ;;  %v2044_v43 = vand.u32 8388607, %v2037_v34  ;;  %vm2048_vm15 = vcmp.gt.s32.totalorder %v2047_v44, 0 }
 0x26e   :  { %v3204_v8 = vpop.eup %3203  ;;  %v1415_v36 = vxor.u32 2147483648, %v3202_v10  ;;  %vm4805_vm0 = vcmp.le.f32.partialorder %v1110_v55, 0.7853982  ;;  %v1185_v14 = vor.u32 %v1184_v25, %v1183_v39  ;;  %v1188_v20 = vshll.u32 %v1187_v37, 23 }
 0x26f   :  { %v2049_v50 = vsel %vm2048_vm15, %v2047_v44, 0  ;;  %v1412_v30 = vxor.u32 2147483648, %v3204_v8  ;;  %vm1414_vm1 = vcmp.eq.s32.totalorder %v4742_v21, 2  ;;  %v1577_v56 = vmul.u32 %v4750_v51, %v1561_v29 }
 0x270   :  { %vm1579_vm2 = vc.u32 %v4794_v31, %v4782_v33  ;;  %vm1411_vm3 = vcmp.eq.s32.totalorder %v4742_v21, 0  ;;  %v1416_v12 = vsel %vm1414_vm1, %v1415_v36, %v3204_v8  ;;  %v1189_v26 = vor.u32 4788187, %v1188_v20 }
 0x271   :  { %v1581_v55 = vsel %vm1579_vm2, %v1580_v46, %v4783_v52  ;;  %v1413_v16 = vsel %vm1411_vm3, %v3202_v10, %v1412_v30  ;;  %v2045_v53 = vor.u32 8388608, %v2044_v43  ;;  %v2051_v48 = vand.u32 31, %v2049_v50 }
 0x272   :  { %v1582_v7 = vadd.s32 %v1581_v55, %v1577_v56  ;;  %v1417_v49 = vsel %vm1410_vm14, %v1413_v16, %v1416_v12  ;;  %v1190_v3 = vand.u32 2147483647, %v1189_v26  ;;  %v1192_v27 = vcvt.s32.f32 %v1185_v14 }
 0x273   :  { %v1197_v51 = vsel %vm1112_vm12, %v1196_v22, %v4738_v28  ;;  %v1418_v54 = vsel %vm1408_vm13, nan, %v1417_v49  ;;  %v2050_v61 = vshrl.u32 %v2049_v50, 5  ;;  %v2052_v60 = vsub.s32 32, %v2051_v48 }
 0x274   :  { %v1583_v32 = vadd.s32 536870912, %v1582_v7  ;;  %v3004_v59 = vpack.c.bf16 %v1418_v54, %v1315_v1  ;;  %v1193_v52 = vmul.f32 %v1192_v27, %v1190_v3  ;;  %v2054_v5 = vshll.u32 %v3267_v58, %v2051_v48 }
 0x275   :  { %v2057_v63 = vshll.u32 %v3268_v62, %v2051_v48  ;;  %v2055_v42 = vshrl.u32 %v3268_v62, %v2052_v60  ;;  %v2058_v45 = vshrl.u32 %v3269_v0, %v2052_v60  ;;  %v2060_v28 = vshll.u32 %v3269_v0, %v2051_v48 }
 0x276   :  { %v4824_v21 = vshrl.u32 %v1583_v32, 30  ;;  %2844 = vst [vmem:[#allocation2 + $0x24] sm:$0xff] %v3004_v59  ;;  %v1194_v47 = vxor.u32 2147483648, %v1193_v52  ;;  %v2061_v44 = vshrl.u32 %v3270_v2, %v2052_v60  ;;  %v2063_v39 = vshll.u32 %v3270_v2, %v2051_v48 }
 0x277   :  { %v2064_v1 = vshrl.u32 %v3271_v4, %v2052_v60  ;;  %v1199_v25 = vsel %vm4805_vm0, 0, %v1197_v51  ;;  %v2056_v29 = vor.u32 %v2055_v42, %v2054_v5  ;;  %v4837_v10 = vadd.f32 %v4354_v15, %v3354_v18 }
 0x278   :  { %v1585_v37 = vshll.u32 %v4824_v21, 30  ;;  %v1195_v22 = vsel %vm1112_vm12, %v1194_v47, %v1193_v52  ;;  %v2059_v46 = vor.u32 %v2058_v45, %v2057_v63  ;;  %v2062_v43 = vor.u32 %v2061_v44, %v2060_v28 }
 0x279   :  { %v2065_v8 = vor.u32 %v2064_v1, %v2063_v39  ;;  %v1198_v36 = vsel %vm4805_vm0, %v4561_v35, %v1195_v22  ;;  %v2066_v20 = vshll.u32 %v3271_v4, %v2051_v48  ;;  %v2067_v50 = vshrl.u32 %v3272_v11, %v2052_v60 }
 0x27a   :  { %v4844_v14 = vsub.s32 %v1582_v7, %v1585_v37  ;;  %3205 = vcosq.f32 %v1198_v36  ;;  %v1203_v30 = vand.u32 3, %v1199_v25  ;;  %vm2069_vm4 = vcmp.lt.s32.totalorder %v2050_v61, 1 }
 0x27b   :  { %v2085_v15 = vshll.u32 %v2045_v53, 8  ;;  %3207 = vsinq.f32 %v1198_v36  ;;  %v2068_v12 = vor.u32 %v2067_v50, %v2066_v20  ;;  %vm2072_vm5 = vcmp.lt.s32.totalorder %v2050_v61, 4 }
 0x27c   :  { %v1588_v56 = vsub.s32 0, %v4844_v14  ;;  %v2053_v26 = vshrl.u32 %v3267_v58, %v2052_v60  ;;  %v2074_v55 = vsel %vm2072_vm5, %v2062_v43, 2102212464  ;;  %v2077_v41 = vsel %vm2069_vm4, %v2056_v29, %v2059_v46 }
 0x27d   :  { %v2078_v16 = vsel %vm2072_vm5, %v2065_v8, 920167782  ;;  %vm2071_vm6 = vcmp.lt.s32.totalorder %v2050_v61, 3  ;;  %v2081_v48 = vsel %vm2069_vm4, %v2059_v46, %v2062_v43  ;;  %v1628_v49 = vand.u32 2139095040, %v4837_v10 }
 0x27e   :  { %v2935_v7 = vmin.u32 %v1588_v56, %v4844_v14  ;;  %vm2070_vm7 = vcmp.lt.s32.totalorder %v2050_v61, 2  ;;  %v2073_v3 = vsel %vm2069_vm4, %v2053_v26, %v2056_v29  ;;  %v2079_v27 = vsel %vm2071_vm6, %v2062_v43, %v2078_v16 }
 0x27f   :  { %v2082_v53 = vsel %vm2072_vm5, %v2068_v12, 1326507024  ;;  %v2075_v54 = vsel %vm2071_vm6, %v2059_v46, %v2074_v55  ;;  %v2080_v32 = vsel %vm2070_vm7, %v2077_v41, %v2079_v27  ;;  %v1629_v28 = vshrl.u32 %v1628_v49, 23 }
 0x280   :  { %v1590_v51 = vclz %v2935_v7  ;;  %v2083_v59 = vsel %vm2071_vm6, %v2065_v8, %v2082_v53  ;;  %v4852_v5 = vmul.u32.u64.low %v2085_v15, %v2080_v32  ;;  %v4853_v60 = vmul.u32.u64.high %v2085_v15, %v2080_v32, %v4852_v5 }
 0x281   :  { %v2084_v52 = vsel %vm2070_vm7, %v2081_v48, %v2083_v59  ;;  %vm1202_vm8 = vweird.f32 %v4561_v35  ;;  %v2076_v61 = vsel %vm2070_vm7, %v2073_v3, %v2075_v54  ;;  %vm1205_vm9 = vcmp.eq.s32.totalorder %v1203_v30, 0 }
 0x282   :  { %v2936_v63 = vadd.s32 4294967294, %v1590_v51  ;;  %v4856_v42 = vmul.u32.u64.low %v2085_v15, %v2084_v52  ;;  %v4857_v45 = vmul.u32.u64.high %v2085_v15, %v2084_v52, %v4856_v42  ;;  %vm1208_vm10 = vcmp.eq.s32.totalorder %v1203_v30, 2 }
 0x283   :  { %v2938_v47 = vadd.s32 4294967169, %v1629_v28  ;;  %v1578_v39 = vadd.s32 %v4782_v33, %v4794_v31  ;;  %v2095_v25 = vadd.s32 1, %v4853_v60  ;;  %v1625_v37 = vand.u32 2147483647, %v4837_v10 }
 0x284   :  { %vm2937_vm11 = vcmp.lt.s32.totalorder %v2936_v63, 0  ;;  %v3206_v44 = vpop.eup %3205  ;;  %v2092_v8 = vmul.u32 %v2085_v15, %v2076_v61  ;;  %vm2094_vm12 = vc.u32 %v4857_v45, %v4852_v5  ;;  %vm1204_vm13 = vcmp.lt.s32.totalorder %v1203_v30, 2 }
 0x285   :  { %v1593_v1 = vsel %vm2937_vm11, 0, %v2936_v63  ;;  %v3208_v29 = vpop.eup %3207  ;;  %v1209_v22 = vxor.u32 2147483648, %v3206_v44  ;;  %v1635_v50 = vadd.s32 1, %v2938_v47  ;;  %v2096_v12 = vsel %vm2094_vm12, %v2095_v25, %v4853_v60 }
 0x286   :  { %v1594_v46 = vsub.s32 32, %v1593_v1  ;;  %v1598_v43 = vsub.s32 4294967266, %v1593_v1  ;;  %v1206_v36 = vxor.u32 2147483648, %v3208_v29  ;;  %v1595_v20 = vshll.u32 %v4844_v14, %v1593_v1 }
 0x287   :  { %v1210_v56 = vsel %vm1208_vm10, %v1209_v22, %v3208_v29  ;;  %v2097_v55 = vadd.s32 %v2096_v12, %v2092_v8  ;;  %vm1636_vm14 = vcmp.gt.s32.totalorder %v1635_v50, 0  ;;  %v1632_v49 = vand.u32 8388607, %v1625_v37 }
 0x288   :  { %v1596_v33 = vshrl.u32 %v1578_v39, %v1594_v46  ;;  %v1599_v31 = vadd.s32 127, %v1598_v43  ;;  %v1207_v26 = vsel %vm1205_vm9, %v3206_v44, %v1206_v36  ;;  %v1637_v7 = vsel %vm1636_vm14, %v1635_v50, 0 }
 0x289   :  { %v1211_v41 = vsel %vm1204_vm13, %v1207_v26, %v1210_v56  ;;  %v2098_v48 = vadd.s32 536870912, %v2097_v55  ;;  %v1639_v3 = vand.u32 31, %v1637_v7  ;;  %v1633_v52 = vor.u32 8388608, %v1632_v49 }
 0x28a   :  { %v1597_v15 = vor.u32 %v1596_v33, %v1595_v20  ;;  %v1600_v16 = vshll.u32 %v1599_v31, 23  ;;  %v1212_v14 = vsel %vm1202_vm8, nan, %v1211_v41  ;;  %v1638_v25 = vshrl.u32 %v1637_v7, 5 }
 0x28b   :  { %v3003_v27 = vpack.c.bf16 %v1212_v14, %v1212_v14  ;;  %v4874_v51 = vshrl.u32 %v2098_v48, 30  ;;  %v1640_v30 = vsub.s32 32, %v1639_v3  ;;  %v1642_v60 = vshll.u32 %v3267_v58, %v1639_v3 }
 0x28c   :  { %v1601_v53 = vor.u32 4788187, %v1600_v16  ;;  %v1604_v32 = vcvt.s32.f32 %v1597_v15  ;;  %v1645_v44 = vshll.u32 %v3268_v62, %v1639_v3  ;;  %v1648_v39 = vshll.u32 %v3269_v0, %v1639_v3 }
 0x28d   :  { %2843 = vst [vmem:[#allocation2 + $0x20] sm:$0xf] %v3003_v27  ;;  %v2100_v59 = vshll.u32 %v4874_v51, 30  ;;  %v1643_v35 = vshrl.u32 %v3268_v62, %v1640_v30  ;;  %v1646_v42 = vshrl.u32 %v3269_v0, %v1640_v30  ;;  %v1649_v28 = vshrl.u32 %v3270_v2, %v1640_v30 }
 0x28e   :  { %v1602_v54 = vand.u32 2147483647, %v1601_v53  ;;  %v1652_v61 = vshrl.u32 %v3271_v4, %v1640_v30  ;;  %v1655_v1 = vshrl.u32 %v3272_v11, %v1640_v30  ;;  %v1651_v22 = vshll.u32 %v3270_v2, %v1639_v3 }
 0x28f   :  { %v4882_v47 = vsub.s32 %v2097_v55, %v2100_v59  ;;  %v1644_v29 = vor.u32 %v1643_v35, %v1642_v60  ;;  %v1654_v46 = vshll.u32 %v3271_v4, %v1639_v3  ;;  %v1647_v36 = vor.u32 %v1646_v42, %v1645_v44 }
 0x290   :  { %v1605_v63 = vmul.f32 %v1604_v32, %v1602_v54  ;;  %v1650_v20 = vor.u32 %v1649_v28, %v1648_v39  ;;  %v1653_v50 = vor.u32 %v1652_v61, %v1651_v22  ;;  %vm4892_vm15 = vcmp.le.f32.partialorder %v1522_v13, 0.7853982 }
 0x291   :  { %v2103_v8 = vsub.s32 0, %v4882_v47  ;;  %v1656_v56 = vor.u32 %v1655_v1, %v1654_v46  ;;  %vm1524_vm0 = vcmp.lt.s32.totalorder %v4669_v57, 0  ;;  %v1608_v31 = vsub.s32 4, %v4824_v21 }
 0x292   :  { %v1606_v43 = vxor.u32 2147483648, %v1605_v63  ;;  %v4901_v26 = vadd.f32 %v4473_v40, %v4069_v24  ;;  %v1641_v55 = vshrl.u32 %v3267_v58, %v1640_v30  ;;  %vm1657_vm1 = vcmp.lt.s32.totalorder %v1638_v25, 1 }
 0x293   :  { %v2955_v12 = vmin.u32 %v2103_v8, %v4882_v47  ;;  %vm1660_vm2 = vcmp.lt.s32.totalorder %v1638_v25, 4  ;;  %v1673_v41 = vshll.u32 %v1633_v52, 8  ;;  %vm2039_vm3 = vcmp.lt.s32.totalorder %v4705_v6, 0 }
 0x294   :  { %v1607_v13 = vsel %vm1524_vm0, %v1606_v43, %v1605_v63  ;;  %v1662_v16 = vsel %vm1660_vm2, %v1650_v20, 2102212464  ;;  %v1665_v7 = vsel %vm1657_vm1, %v1644_v29, %v1647_v36  ;;  %vm1659_vm4 = vcmp.lt.s32.totalorder %v1638_v25, 3 }
 0x295   :  { %v2105_v15 = vclz %v2955_v12  ;;  %v1666_v14 = vsel %vm1660_vm2, %v1653_v50, 920167782  ;;  %v1669_v48 = vsel %vm1657_vm1, %v1647_v36, %v1650_v20  ;;  %v1670_v40 = vsel %vm1660_vm2, %v1656_v56, 1326507024 }
 0x296   :  { %vm1658_vm5 = vcmp.lt.s32.totalorder %v1638_v25, 2  ;;  %v1667_v3 = vsel %vm1659_vm4, %v1650_v20, %v1666_v14  ;;  %v1671_v27 = vsel %vm1659_vm4, %v1653_v50, %v1670_v40  ;;  %v1661_v53 = vsel %vm1657_vm1, %v1641_v55, %v1644_v29 }
 0x297   :  { %v2956_v49 = vadd.s32 4294967294, %v2105_v15  ;;  %v1663_v30 = vsel %vm1659_vm4, %v1647_v36, %v1662_v16  ;;  %v1668_v54 = vsel %vm1658_vm5, %v1665_v7, %v1667_v3  ;;  %v1672_v32 = vsel %vm1658_vm5, %v1669_v48, %v1671_v27 }
 0x298   :  { %v4912_v59 = vmul.u32.u64.low %v1673_v41, %v1672_v32  ;;  %v4913_v52 = vmul.u32.u64.high %v1673_v41, %v1672_v32, %v4912_v59  ;;  %v1731_v60 = vand.u32 2139095040, %v4901_v26  ;;  %v2123_v63 = vsub.s32 4, %v4874_v51 }
 0x299   :  { %vm2957_vm6 = vcmp.lt.s32.totalorder %v2956_v49, 0  ;;  %v4917_v42 = vmul.u32.u64.low %v1673_v41, %v1668_v54  ;;  %v4918_v28 = vmul.u32.u64.high %v1673_v41, %v1668_v54, %v4917_v42  ;;  %v2093_v61 = vadd.s32 %v4852_v5, %v4857_v45 }
 0x29a   :  { %v2108_v35 = vsel %vm2957_vm6, 0, %v2956_v49  ;;  %v1732_v1 = vshrl.u32 %v1731_v60, 23  ;;  %v1609_v29 = vsel %vm1524_vm0, %v1608_v31, %v4824_v21  ;;  %v1610_v22 = vsel %vm4892_vm15, %v4669_v57, %v1607_v13 }
 0x29b   :  { %v2109_v44 = vsub.s32 32, %v2108_v35  ;;  %v2113_v39 = vsub.s32 4294967266, %v2108_v35  ;;  %v1664_v46 = vsel %vm1658_vm5, %v1661_v53, %v1663_v30  ;;  %v4931_v43 = vadd.f32 %v4555_v9, %v3352_v17 }
 0x29c   :  { %v2110_v8 = vshll.u32 %v4882_v47, %v2108_v35  ;;  %vm1682_vm7 = vc.u32 %v4913_v52, %v4917_v42  ;;  %v2124_v21 = vsel %vm2039_vm3, %v2123_v63, %v4874_v51  ;;  %v1683_v36 = vadd.s32 1, %v4918_v28 }
 0x29d   :  { %v2111_v5 = vshrl.u32 %v2093_v61, %v2109_v44  ;;  %v2114_v45 = vadd.s32 127, %v2113_v39  ;;  %v1728_v20 = vand.u32 2147483647, %v4901_v26  ;;  %v2942_v25 = vadd.s32 4294967169, %v1732_v1 }
 0x29e   :  { %3209 = vcosq.f32 %v1610_v22  ;;  %v1680_v17 = vmul.u32 %v1673_v41, %v1664_v46  ;;  %v1684_v9 = vsel %vm1682_vm7, %v1683_v36, %v4918_v28  ;;  %v1611_v31 = vsel %vm4892_vm15, 0, %v1609_v29 }
 0x29f   :  { %v2112_v50 = vor.u32 %v2111_v5, %v2110_v8  ;;  %v2115_v56 = vshll.u32 %v2114_v45, 23  ;;  %3211 = vsinq.f32 %v1610_v22  ;;  %v1738_v47 = vadd.s32 1, %v2942_v25 }
 0x2a0   :  { %vm4945_vm8 = vcmp.le.f32.partialorder %v2037_v34, 0.7853982  ;;  %v1685_v55 = vadd.s32 %v1684_v9, %v1680_v17  ;;  %v1735_v41 = vand.u32 8388607, %v1728_v20  ;;  %v1834_v15 = vand.u32 2139095040, %v4931_v43 }
 0x2a1   :  { %v2116_v12 = vor.u32 4788187, %v2115_v56  ;;  %v2126_v13 = vsel %vm4945_vm8, 0, %v2124_v21  ;;  %vm1739_vm9 = vcmp.gt.s32.totalorder %v1738_v47, 0  ;;  %v2119_v33 = vcvt.s32.f32 %v2112_v50 }
 0x2a2   :  { %v1686_v7 = vadd.s32 536870912, %v1685_v55  ;;  %v1740_v14 = vsel %vm1739_vm9, %v1738_v47, 0  ;;  %v4954_v34 = vand.u32 3, %v1611_v31  ;;  %v4956_v49 = vand.u32 3, %v2126_v13 }
 0x2a3   :  { %v2117_v16 = vand.u32 2147483647, %v2116_v12  ;;  %v1742_v48 = vand.u32 31, %v1740_v14  ;;  %v4961_v27 = vadd.s32 %v4917_v42, %v4913_v52  ;;  %v1736_v53 = vor.u32 8388608, %v1735_v41 }
 0x2a4   :  { %v4958_v3 = vshrl.u32 %v1686_v7, 30  ;;  %v1831_v54 = vand.u32 2147483647, %v4931_v43  ;;  %v1835_v35 = vshrl.u32 %v1834_v15, 23  ;;  %v1741_v8 = vshrl.u32 %v1740_v14, 5 }
 0x2a5   :  { %v2120_v40 = vmul.f32 %v2119_v33, %v2117_v16  ;;  %v1743_v30 = vsub.s32 32, %v1742_v48  ;;  %v1745_v60 = vshll.u32 %v3267_v58, %v1742_v48  ;;  %v1748_v28 = vshll.u32 %v3268_v62, %v1742_v48 }
 0x2a6   :  { %v1688_v59 = vshll.u32 %v4958_v3, 30  ;;  %v1751_v1 = vshll.u32 %v3269_v0, %v1742_v48  ;;  %v1754_v45 = vshll.u32 %v3270_v2, %v1742_v48  ;;  %v1757_v56 = vshll.u32 %v3271_v4, %v1742_v48 }
 0x2a7   :  { %v2121_v32 = vxor.u32 2147483648, %v2120_v40  ;;  %v1746_v63 = vshrl.u32 %v3268_v62, %v1743_v30  ;;  %v1749_v61 = vshrl.u32 %v3269_v0, %v1743_v30  ;;  %v1752_v44 = vshrl.u32 %v3270_v2, %v1743_v30 }
 0x2a8   :  { %v4970_v52 = vpop.eup %3209  ;;  %v4974_v39 = vsub.s32 %v1685_v55, %v1688_v59  ;;  %v1755_v29 = vshrl.u32 %v3271_v4, %v1743_v30  ;;  %v1758_v17 = vshrl.u32 %v3272_v11, %v1743_v30  ;;  %v4990_v51 = vshll.u32 %v1736_v53, 8 }
 0x2a9   :  { %v2122_v42 = vsel %vm2039_vm3, %v2121_v32, %v2120_v40  ;;  %v4978_v22 = vpop.eup %3211  ;;  %v1747_v5 = vor.u32 %v1746_v63, %v1745_v60  ;;  %v1750_v36 = vor.u32 %v1749_v61, %v1748_v28  ;;  %v1753_v25 = vor.u32 %v1752_v44, %v1751_v1 }
 0x2aa   :  { %v2125_v46 = vsel %vm4945_vm8, %v4705_v6, %v2122_v42  ;;  %v1691_v21 = vsub.s32 0, %v4974_v39  ;;  %v1756_v50 = vor.u32 %v1755_v29, %v1754_v45  ;;  %v1618_v9 = vxor.u32 2147483648, %v4978_v22 }
 0x2ab   :  { %3213 = vcosq.f32 %v2125_v46  ;;  %v1621_v47 = vxor.u32 2147483648, %v4970_v52  ;;  %v1744_v12 = vshrl.u32 %v3267_v58, %v1743_v30  ;;  %v1759_v55 = vor.u32 %v1758_v17, %v1757_v56 }
 0x2ac   :  { %3215 = vsinq.f32 %v2125_v46  ;;  %v2939_v31 = vmin.u32 %v1691_v21, %v4974_v39  ;;  %vm1760_vm10 = vcmp.lt.s32.totalorder %v1741_v8, 1  ;;  %v2946_v13 = vadd.s32 4294967169, %v1835_v35 }
 0x2ad   :  { %vm2135_vm11 = vcmp.eq.s32.totalorder %v4956_v49, 2  ;;  %vm1762_vm12 = vcmp.lt.s32.totalorder %v1741_v8, 3  ;;  %vm1763_vm13 = vcmp.lt.s32.totalorder %v1741_v8, 4  ;;  %v1768_v15 = vsel %vm1760_vm10, %v1747_v5, %v1750_v36 }
 0x2ae   :  { %v1693_v41 = vclz %v2939_v31  ;;  %vm2132_vm14 = vcmp.eq.s32.totalorder %v4956_v49, 0  ;;  %v1765_v16 = vsel %vm1763_vm13, %v1753_v25, 2102212464  ;;  %v1769_v33 = vsel %vm1763_vm13, %v1756_v50, 920167782 }
 0x2af   :  { %v1772_v7 = vsel %vm1760_vm10, %v1750_v36, %v1753_v25  ;;  %v1773_v14 = vsel %vm1763_vm13, %v1759_v55, 1326507024  ;;  %vm1617_vm15 = vcmp.eq.s32.totalorder %v4954_v34, 0  ;;  %vm1620_vm0 = vcmp.eq.s32.totalorder %v4954_v34, 2 }
 0x2b0   :  { %vm2131_vm1 = vcmp.lt.s32.totalorder %v4956_v49, 2  ;;  %v2940_v48 = vadd.s32 4294967294, %v1693_v41  ;;  %vm1761_vm2 = vcmp.lt.s32.totalorder %v1741_v8, 2  ;;  %v1770_v40 = vsel %vm1762_vm12, %v1753_v25, %v1769_v33 }
 0x2b1   :  { %v1774_v53 = vsel %vm1762_vm12, %v1756_v50, %v1773_v14  ;;  %vm2129_vm3 = vweird.f32 %v4705_v6  ;;  %vm1627_vm4 = vcmp.lt.s32.totalorder %v4837_v10, 0  ;;  %v1764_v30 = vsel %vm1760_vm10, %v1744_v12, %v1747_v5 }
 0x2b2   :  { %v1771_v32 = vsel %vm1761_vm2, %v1768_v15, %v1770_v40  ;;  %v1775_v59 = vsel %vm1761_vm2, %v1772_v7, %v1774_v53  ;;  %v1841_v60 = vadd.s32 1, %v2946_v13  ;;  %vm2941_vm5 = vcmp.lt.s32.totalorder %v2940_v48, 0 }
 0x2b3   :  { %v1766_v35 = vsel %vm1762_vm12, %v1750_v36, %v1765_v16  ;;  %v5009_v63 = vmul.u32.u64.low %v4990_v51, %v1775_v59  ;;  %v5010_v28 = vmul.u32.u64.high %v4990_v51, %v1775_v59, %v5009_v63  ;;  %v1696_v61 = vsel %vm2941_vm5, 0, %v2940_v48 }
 0x2b4   :  { %v5013_v44 = vmul.u32.u64.low %v4990_v51, %v1771_v32  ;;  %v5014_v42 = vmul.u32.u64.high %v4990_v51, %v1771_v32, %v5013_v44  ;;  %vm1842_vm6 = vcmp.gt.s32.totalorder %v1841_v60, 0  ;;  %v1697_v29 = vsub.s32 32, %v1696_v61 }
 0x2b5   :  { %v3214_v1 = vpop.eup %3213  ;;  %v1701_v46 = vsub.s32 4294967266, %v1696_v61  ;;  %v5019_v5 = vand.u32 8388607, %v1831_v54  ;;  %v1843_v45 = vsel %vm1842_vm6, %v1841_v60, 0  ;;  %v1711_v25 = vsub.s32 4, %v4958_v3 }
 0x2b6   :  { %v3216_v21 = vpop.eup %3215  ;;  %v2136_v36 = vxor.u32 2147483648, %v3214_v1  ;;  %v1767_v50 = vsel %vm1761_vm2, %v1764_v30, %v1766_v35  ;;  %v1845_v56 = vand.u32 31, %v1843_v45  ;;  %v1698_v31 = vshll.u32 %v4974_v39, %v1696_v61 }
 0x2b7   :  { %v2133_v17 = vxor.u32 2147483648, %v3216_v21  ;;  %v1699_v12 = vshrl.u32 %v4961_v27, %v1697_v29  ;;  %v1702_v55 = vadd.s32 127, %v1701_v46  ;;  %vm1785_vm7 = vc.u32 %v5010_v28, %v5013_v44 }
 0x2b8   :  { %v2137_v13 = vsel %vm2135_vm11, %v2136_v36, %v3216_v21  ;;  %v1786_v41 = vadd.s32 1, %v5014_v42  ;;  %v1846_v15 = vsub.s32 32, %v1845_v56  ;;  %vm1616_vm8 = vcmp.lt.s32.totalorder %v4954_v34, 2 }
 0x2b9   :  { %v2134_v8 = vsel %vm2132_vm14, %v3214_v1, %v2133_v17  ;;  %vm5035_vm9 = vcmp.le.f32.partialorder %v1625_v37, 0.7853982  ;;  %v1700_v27 = vor.u32 %v1699_v12, %v1698_v31  ;;  %v1703_v16 = vshll.u32 %v1702_v55, 23 }
 0x2ba   :  { %v1783_v33 = vmul.u32 %v4990_v51, %v1767_v50  ;;  %v1619_v7 = vsel %vm1617_vm15, %v4970_v52, %v1618_v9  ;;  %v1622_v14 = vsel %vm1620_vm0, %v1621_v47, %v4978_v22  ;;  %v2138_v37 = vsel %vm2131_vm1, %v2134_v8, %v2137_v13 }
 0x2bb   :  { %v1787_v48 = vsel %vm1785_vm7, %v1786_v41, %v5014_v42  ;;  %v2139_v51 = vsel %vm2129_vm3, nan, %v2138_v37  ;;  %v1704_v40 = vor.u32 4788187, %v1703_v16  ;;  %v1712_v53 = vsel %vm1627_vm4, %v1711_v25, %v4958_v3 }
 0x2bc   :  { %v1788_v9 = vadd.s32 %v1787_v48, %v1783_v33  ;;  %v3009_v30 = vpack.c.bf16 %v2139_v51, %v2139_v51  ;;  %v1707_v32 = vcvt.s32.f32 %v1700_v27  ;;  %v1844_v52 = vshrl.u32 %v1843_v45, 5 }
 0x2bd   :  { %v1849_v59 = vshrl.u32 %v3268_v62, %v1846_v15  ;;  %v1705_v22 = vand.u32 2147483647, %v1704_v40  ;;  %v1852_v49 = vshrl.u32 %v3269_v0, %v1846_v15  ;;  %v1855_v60 = vshrl.u32 %v3270_v2, %v1846_v15 }
 0x2be   :  { %v1789_v47 = vadd.s32 536870912, %v1788_v9  ;;  %2849 = vst [vmem:[#allocation2 + $0x44] sm:$0xf] %v3009_v30  ;;  %v1848_v6 = vshll.u32 %v3267_v58, %v1845_v56  ;;  %v1851_v35 = vshll.u32 %v3268_v62, %v1845_v56  ;;  %v1857_v63 = vshll.u32 %v3270_v2, %v1845_v56 }
 0x2bf   :  { %v1858_v3 = vshrl.u32 %v3271_v4, %v1846_v15  ;;  %v1708_v61 = vmul.f32 %v1707_v32, %v1705_v22  ;;  %v1854_v1 = vshll.u32 %v3269_v0, %v1845_v56  ;;  %v1861_v29 = vshrl.u32 %v3272_v11, %v1846_v15 }
 0x2c0   :  { %v5065_v42 = vshrl.u32 %v1789_v47, 30  ;;  %v1850_v46 = vor.u32 %v1849_v59, %v1848_v6  ;;  %v1860_v21 = vshll.u32 %v3271_v4, %v1845_v56  ;;  %v5072_v36 = vadd.f32 %v4609_v38, %v4069_v24 }
 0x2c1   :  { %v1859_v45 = vor.u32 %v1858_v3, %v1857_v63  ;;  %v1709_v25 = vxor.u32 2147483648, %v1708_v61  ;;  %v1853_v17 = vor.u32 %v1852_v49, %v1851_v35  ;;  %v1856_v31 = vor.u32 %v1855_v60, %v1854_v1 }
 0x2c2   :  { %v1791_v50 = vshll.u32 %v5065_v42, 30  ;;  %v1623_v12 = vsel %vm1616_vm8, %v1619_v7, %v1622_v14  ;;  %v1714_v55 = vsel %vm5035_vm9, 0, %v1712_v53  ;;  %v1839_v13 = vor.u32 8388608, %v5019_v5 }
 0x2c3   :  { %v1862_v41 = vor.u32 %v1861_v29, %v1860_v21  ;;  %v1710_v56 = vsel %vm1627_vm4, %v1709_v25, %v1708_v61  ;;  %v1847_v38 = vshrl.u32 %v3267_v58, %v1846_v15  ;;  %vm1866_vm10 = vcmp.lt.s32.totalorder %v1844_v52, 4 }
 0x2c4   :  { %v5082_v8 = vsub.s32 %v1788_v9, %v1791_v50  ;;  %v1713_v27 = vsel %vm5035_vm9, %v4837_v10, %v1710_v56  ;;  %vm1863_vm11 = vcmp.lt.s32.totalorder %v1844_v52, 1  ;;  %vm1865_vm12 = vcmp.lt.s32.totalorder %v1844_v52, 3 }
 0x2c5   :  { %v1872_v34 = vsel %vm1866_vm10, %v1859_v45, 920167782  ;;  %3217 = vcosq.f32 %v1713_v27  ;;  %v1868_v5 = vsel %vm1866_vm10, %v1856_v31, 2102212464  ;;  %v1871_v33 = vsel %vm1863_vm11, %v1850_v46, %v1853_v17 }
 0x2c6   :  { %v1794_v16 = vsub.s32 0, %v5082_v8  ;;  %3219 = vsinq.f32 %v1713_v27  ;;  %v1873_v7 = vsel %vm1865_vm12, %v1856_v31, %v1872_v34  ;;  %v1875_v14 = vsel %vm1863_vm11, %v1853_v17, %v1856_v31 }
 0x2c7   :  { %v1876_v37 = vsel %vm1866_vm10, %v1862_v41, 1326507024  ;;  %v1718_v48 = vand.u32 3, %v1714_v55  ;;  %vm1864_vm13 = vcmp.lt.s32.totalorder %v1844_v52, 2  ;;  %v1879_v51 = vshll.u32 %v1839_v13, 8 }
 0x2c8   :  { %v2943_v15 = vmin.u32 %v1794_v16, %v5082_v8  ;;  %v1867_v39 = vsel %vm1863_vm11, %v1847_v38, %v1850_v46  ;;  %v1869_v40 = vsel %vm1865_vm12, %v1853_v17, %v1868_v5  ;;  %v1874_v53 = vsel %vm1864_vm13, %v1871_v33, %v1873_v7 }
 0x2c9   :  { %v1877_v9 = vsel %vm1865_vm12, %v1859_v45, %v1876_v37  ;;  %v5093_v59 = vmul.u32.u64.low %v1879_v51, %v1874_v53  ;;  %v5094_v22 = vmul.u32.u64.high %v1879_v51, %v1874_v53, %v5093_v59  ;;  %v2658_v60 = vand.u32 2139095040, %v5072_v36 }
 0x2ca   :  { %v1796_v30 = vclz %v2943_v15  ;;  %v1878_v32 = vsel %vm1864_vm13, %v1875_v14, %v1877_v9  ;;  %vm1614_vm14 = vweird.f32 %v4669_v57  ;;  %v1870_v35 = vsel %vm1864_vm13, %v1867_v39, %v1869_v40 }
 0x2cb   :  { %v5097_v47 = vmul.u32.u64.low %v1879_v51, %v1878_v32  ;;  %v5098_v49 = vmul.u32.u64.high %v1879_v51, %v1878_v32, %v5097_v47  ;;  %v1624_v63 = vsel %vm1614_vm14, nan, %v1623_v12  ;;  %vm1717_vm15 = vweird.f32 %v4837_v10 }
 0x2cc   :  { %v2944_v6 = vadd.s32 4294967294, %v1796_v30  ;;  %v2659_v52 = vshrl.u32 %v2658_v60, 23  ;;  %v5105_v3 = vadd.f32 %v4713_v19, %v3354_v18  ;;  %vm1719_vm0 = vcmp.lt.s32.totalorder %v1718_v48, 2 }
 0x2cd   :  { %vm1720_vm1 = vcmp.eq.s32.totalorder %v1718_v48, 0  ;;  %v1889_v61 = vadd.s32 1, %v5094_v22  ;;  %v1886_v29 = vmul.u32 %v1879_v51, %v1870_v35  ;;  %vm1888_vm3 = vc.u32 %v5098_v49, %v5093_v59 }
 0x2ce   :  { %vm2945_vm2 = vcmp.lt.s32.totalorder %v2944_v6, 0  ;;  %v2978_v57 = vadd.s32 4294967169, %v2659_v52  ;;  %v1784_v45 = vadd.s32 %v5013_v44, %v5010_v28  ;;  %vm1723_vm4 = vcmp.eq.s32.totalorder %v1718_v48, 2 }
 0x2cf   :  { %v1799_v1 = vsel %vm2945_vm2, 0, %v2944_v6  ;;  %v3218_v46 = vpop.eup %3217  ;;  %v1890_v18 = vsel %vm1888_vm3, %v1889_v61, %v5094_v22  ;;  %v2655_v27 = vand.u32 2147483647, %v5072_v36  ;;  %v1814_v33 = vsub.s32 4, %v5065_v42 }
 0x2d0   :  { %v1800_v21 = vsub.s32 32, %v1799_v1  ;;  %v1804_v25 = vsub.s32 4294967266, %v1799_v1  ;;  %v3220_v19 = vpop.eup %3219  ;;  %v1724_v50 = vxor.u32 2147483648, %v3218_v46  ;;  %v1891_v17 = vadd.s32 %v1890_v18, %v1886_v29 }
 0x2d1   :  { %v2665_v31 = vadd.s32 1, %v2978_v57  ;;  %v1721_v12 = vxor.u32 2147483648, %v3220_v19  ;;  %v1801_v55 = vshll.u32 %v5082_v8, %v1799_v1  ;;  %v1937_v15 = vand.u32 2139095040, %v5105_v3 }
 0x2d2   :  { %v1802_v13 = vshrl.u32 %v1784_v45, %v1800_v21  ;;  %v1805_v41 = vadd.s32 127, %v1804_v25  ;;  %v1725_v56 = vsel %vm1723_vm4, %v1724_v50, %v3220_v19  ;;  %v1892_v38 = vadd.s32 536870912, %v1891_v17 }
 0x2d3   :  { %vm2666_vm5 = vcmp.gt.s32.totalorder %v2665_v31, 0  ;;  %v1722_v28 = vsel %vm1720_vm1, %v3218_v46, %v1721_v12  ;;  %vm5126_vm6 = vcmp.le.f32.partialorder %v1728_v20, 0.7853982  ;;  %vm1730_vm7 = vcmp.lt.s32.totalorder %v4901_v26, 0 }
 0x2d4   :  { %v1803_v44 = vor.u32 %v1802_v13, %v1801_v55  ;;  %v1806_v34 = vshll.u32 %v1805_v41, 23  ;;  %v2667_v16 = vsel %vm2666_vm5, %v2665_v31, 0  ;;  %v1726_v5 = vsel %vm1719_vm0, %v1722_v28, %v1725_v56 }
 0x2d5   :  { %v5118_v7 = vshrl.u32 %v1892_v38, 30  ;;  %v2669_v14 = vand.u32 31, %v2667_v16  ;;  %v1727_v8 = vsel %vm1717_vm15, nan, %v1726_v5  ;;  %v1815_v10 = vsel %vm1730_vm7, %v1814_v33, %v5065_v42 }
 0x2d6   :  { %v1807_v37 = vor.u32 4788187, %v1806_v34  ;;  %v3006_v51 = vpack.c.bf16 %v1727_v8, %v1624_v63  ;;  %v1810_v9 = vcvt.s32.f32 %v1803_v44  ;;  %v2662_v32 = vand.u32 8388607, %v2655_v27 }
 0x2d7   :  { %v1894_v39 = vshll.u32 %v5118_v7, 30  ;;  %v2670_v40 = vsub.s32 32, %v2669_v14  ;;  %v1938_v6 = vshrl.u32 %v1937_v15, 23  ;;  %v2672_v63 = vshll.u32 %v3267_v58, %v2669_v14 }
 0x2d8   :  { %v1808_v53 = vand.u32 2147483647, %v1807_v37  ;;  %2846 = vst [vmem:[#allocation2 + $0x30] sm:$0xff] %v3006_v51  ;;  %v2675_v52 = vshll.u32 %v3268_v62, %v2669_v14  ;;  %v2678_v42 = vshll.u32 %v3269_v0, %v2669_v14  ;;  %v2668_v1 = vshrl.u32 %v2667_v16, 5 }
 0x2d9   :  { %v5134_v30 = vsub.s32 %v1891_v17, %v1894_v39  ;;  %v2673_v22 = vshrl.u32 %v3268_v62, %v2670_v40  ;;  %v2676_v47 = vshrl.u32 %v3269_v0, %v2670_v40  ;;  %v2679_v60 = vshrl.u32 %v3270_v2, %v2670_v40 }
 0x2da   :  { %v1811_v20 = vmul.f32 %v1810_v9, %v1808_v53  ;;  %v2681_v29 = vshll.u32 %v3270_v2, %v2669_v14  ;;  %v2682_v57 = vshrl.u32 %v3271_v4, %v2670_v40  ;;  %v2684_v50 = vshll.u32 %v3271_v4, %v2669_v14 }
 0x2db   :  { %v1897_v35 = vsub.s32 0, %v5134_v30  ;;  %v2674_v45 = vor.u32 %v2673_v22, %v2672_v63  ;;  %v2677_v21 = vor.u32 %v2676_v47, %v2675_v52  ;;  %v2680_v25 = vor.u32 %v2679_v60, %v2678_v42 }
 0x2dc   :  { %v1812_v61 = vxor.u32 2147483648, %v1811_v20  ;;  %v2683_v19 = vor.u32 %v2682_v57, %v2681_v29  ;;  %v2685_v17 = vshrl.u32 %v3272_v11, %v2670_v40  ;;  %v1817_v12 = vsel %vm5126_vm6, 0, %v1815_v10 }
 0x2dd   :  { %v2947_v46 = vmin.u32 %v1897_v35, %v5134_v30  ;;  %v2663_v13 = vor.u32 8388608, %v2662_v32  ;;  %vm2687_vm8 = vcmp.lt.s32.totalorder %v2668_v1, 1  ;;  %v2950_v56 = vadd.s32 4294967169, %v1938_v6 }
 0x2de   :  { %v1813_v18 = vsel %vm1730_vm7, %v1812_v61, %v1811_v20  ;;  %v2686_v41 = vor.u32 %v2685_v17, %v2684_v50  ;;  %vm2689_vm9 = vcmp.lt.s32.totalorder %v2668_v1, 3  ;;  %vm2690_vm10 = vcmp.lt.s32.totalorder %v2668_v1, 4 }
 0x2df   :  { %v1816_v31 = vsel %vm5126_vm6, %v4901_v26, %v1813_v18  ;;  %v1899_v55 = vclz %v2947_v46  ;;  %v2692_v28 = vsel %vm2690_vm10, %v2680_v25, 2102212464  ;;  %v2695_v44 = vsel %vm2687_vm8, %v2674_v45, %v2677_v21 }
 0x2e0   :  { %3221 = vcosq.f32 %v1816_v31  ;;  %v2696_v34 = vsel %vm2690_vm10, %v2683_v19, 920167782  ;;  %v2699_v16 = vsel %vm2687_vm8, %v2677_v21, %v2680_v25  ;;  %v2671_v5 = vshrl.u32 %v3267_v58, %v2670_v40 }
 0x2e1   :  { %3223 = vsinq.f32 %v1816_v31  ;;  %v2948_v38 = vadd.s32 4294967294, %v1899_v55  ;;  %vm2688_vm11 = vcmp.lt.s32.totalorder %v2668_v1, 2  ;;  %v2697_v33 = vsel %vm2689_vm9, %v2680_v25, %v2696_v34 }
 0x2e2   :  { %v2700_v14 = vsel %vm2690_vm10, %v2686_v41, 1326507024  ;;  %v2698_v8 = vsel %vm2688_vm11, %v2695_v44, %v2697_v33  ;;  %v2703_v15 = vshll.u32 %v2663_v13, 8  ;;  %v2691_v51 = vsel %vm2687_vm8, %v2671_v5, %v2674_v45 }
 0x2e3   :  { %vm2949_vm12 = vcmp.lt.s32.totalorder %v2948_v38, 0  ;;  %v2701_v37 = vsel %vm2689_vm9, %v2683_v19, %v2700_v14  ;;  %v2693_v39 = vsel %vm2689_vm9, %v2677_v21, %v2692_v28  ;;  %v1821_v40 = vand.u32 3, %v1817_v12 }
 0x2e4   :  { %v2702_v48 = vsel %vm2688_vm11, %v2699_v16, %v2701_v37  ;;  %v5166_v10 = vmul.u32.u64.low %v2703_v15, %v2698_v8  ;;  %v5167_v32 = vmul.u32.u64.high %v2703_v15, %v2698_v8, %v5166_v10  ;;  %v1902_v22 = vsel %vm2949_vm12, 0, %v2948_v38 }
 0x2e5   :  { %v5163_v53 = vmul.u32.u64.low %v2703_v15, %v2702_v48  ;;  %v5164_v9 = vmul.u32.u64.high %v2703_v15, %v2702_v48, %v5163_v53  ;;  %v1934_v20 = vand.u32 2147483647, %v5105_v3  ;;  %v1944_v47 = vadd.s32 1, %v2950_v56 }
 0x2e6   :  { %v2694_v60 = vsel %vm2688_vm11, %v2691_v51, %v2693_v39  ;;  %v5174_v6 = vadd.f32 %v4776_v23, %v4069_v24  ;;  %v1907_v63 = vsub.s32 4294967266, %v1902_v22  ;;  %v2713_v52 = vadd.s32 1, %v5167_v32 }
 0x2e7   :  { %vm1945_vm13 = vcmp.gt.s32.totalorder %v1944_v47, 0  ;;  %vm2712_vm14 = vc.u32 %v5164_v9, %v5166_v10  ;;  %vm1826_vm15 = vcmp.eq.s32.totalorder %v1821_v40, 2  ;;  %v2710_v57 = vmul.u32 %v2703_v15, %v2694_v60 }
 0x2e8   :  { %v1946_v42 = vsel %vm1945_vm13, %v1944_v47, 0  ;;  %v1941_v1 = vand.u32 8388607, %v1934_v20  ;;  %v1903_v45 = vsub.s32 32, %v1902_v22  ;;  %v2714_v24 = vsel %vm2712_vm14, %v2713_v52, %v5167_v32 }
 0x2e9   :  { %v1948_v23 = vand.u32 31, %v1946_v42  ;;  %vm1822_vm0 = vcmp.lt.s32.totalorder %v1821_v40, 2  ;;  %vm1823_vm1 = vcmp.eq.s32.totalorder %v1821_v40, 0  ;;  %v2715_v25 = vadd.s32 %v2714_v24, %v2710_v57 }
 0x2ea   :  { %v3222_v35 = vpop.eup %3221  ;;  %v1887_v19 = vadd.s32 %v5093_v59, %v5098_v49  ;;  %v1908_v50 = vadd.s32 127, %v1907_v63  ;;  %vm1820_vm2 = vweird.f32 %v4901_v26  ;;  %v1942_v55 = vor.u32 8388608, %v1941_v1 }
 0x2eb   :  { %v3224_v61 = vpop.eup %3223  ;;  %v1827_v29 = vxor.u32 2147483648, %v3222_v35  ;;  %v1949_v17 = vsub.s32 32, %v1948_v23  ;;  %v2716_v12 = vadd.s32 536870912, %v2715_v25  ;;  %v1951_v34 = vshll.u32 %v3267_v58, %v1948_v23 }
 0x2ec   :  { %v1824_v46 = vxor.u32 2147483648, %v3224_v61  ;;  %v1905_v41 = vshrl.u32 %v1887_v19, %v1903_v45  ;;  %v1909_v49 = vshll.u32 %v1908_v50, 23  ;;  %v1954_v16 = vshll.u32 %v3268_v62, %v1948_v23 }
 0x2ed   :  { %v1828_v21 = vsel %vm1826_vm15, %v1827_v29, %v3224_v61  ;;  %v1952_v56 = vshrl.u32 %v3268_v62, %v1949_v17  ;;  %v1955_v38 = vshrl.u32 %v3269_v0, %v1949_v17  ;;  %v5187_v44 = vshrl.u32 %v2716_v12, 30 }
 0x2ee   :  { %v1825_v18 = vsel %vm1823_vm1, %v3222_v35, %v1824_v46  ;;  %v1958_v59 = vshrl.u32 %v3270_v2, %v1949_v17  ;;  %v1960_v26 = vshll.u32 %v3270_v2, %v1948_v23  ;;  %v1961_v5 = vshrl.u32 %v3271_v4, %v1949_v17 }
 0x2ef   :  { %v1829_v31 = vsel %vm1822_vm0, %v1825_v18, %v1828_v21  ;;  %v2718_v33 = vshll.u32 %v5187_v44, 30  ;;  %v1947_v14 = vshrl.u32 %v1946_v42, 5  ;;  %v1953_v8 = vor.u32 %v1952_v56, %v1951_v34 }
 0x2f0   :  { %v1830_v13 = vsel %vm1820_vm2, nan, %v1829_v31  ;;  %v1957_v37 = vshll.u32 %v3269_v0, %v1948_v23  ;;  %v1956_v15 = vor.u32 %v1955_v38, %v1954_v16  ;;  %v1962_v51 = vor.u32 %v1961_v5, %v1960_v26 }
 0x2f1   :  { %v3007_v28 = vpack.c.bf16 %v1830_v13, %v1830_v13  ;;  %v1963_v39 = vshll.u32 %v3271_v4, %v1948_v23  ;;  %v1964_v48 = vshrl.u32 %v3272_v11, %v1949_v17  ;;  %v1904_v53 = vshll.u32 %v5134_v30, %v1902_v22 }
 0x2f2   :  { %v2719_v32 = vsub.s32 %v2715_v25, %v2718_v33  ;;  %v1959_v40 = vor.u32 %v1958_v59, %v1957_v37  ;;  %v1982_v60 = vshll.u32 %v1942_v55, 8  ;;  %v2349_v35 = vand.u32 2139095040, %v5174_v6 }
 0x2f3   :  { %2847 = vst [vmem:[#allocation2 + $0x38] sm:$0xf] %v3007_v28  ;;  %v1965_v47 = vor.u32 %v1964_v48, %v1963_v39  ;;  %v1906_v63 = vor.u32 %v1905_v41, %v1904_v53  ;;  %vm1966_vm3 = vcmp.lt.s32.totalorder %v1947_v14, 1  ;;  %vm1969_vm4 = vcmp.lt.s32.totalorder %v1947_v14, 4 }
 0x2f4   :  { %v2721_v52 = vsub.s32 0, %v2719_v32  ;;  %v1910_v42 = vor.u32 4788187, %v1909_v49  ;;  %v1950_v61 = vshrl.u32 %v3267_v58, %v1949_v17  ;;  %v1974_v29 = vsel %vm1966_vm3, %v1953_v8, %v1956_v15 }
 0x2f5   :  { %v1975_v57 = vsel %vm1969_vm4, %v1962_v51, 920167782  ;;  %vm1968_vm5 = vcmp.lt.s32.totalorder %v1947_v14, 3  ;;  %v1971_v46 = vsel %vm1969_vm4, %v1959_v40, 2102212464  ;;  %v1978_v45 = vsel %vm1966_vm3, %v1956_v15, %v1959_v40 }
 0x2f6   :  { %v2979_v1 = vmin.u32 %v2721_v52, %v2719_v32  ;;  %vm1967_vm6 = vcmp.lt.s32.totalorder %v1947_v14, 2  ;;  %v1976_v30 = vsel %vm1968_vm5, %v1959_v40, %v1975_v57  ;;  %v1979_v22 = vsel %vm1969_vm4, %v1965_v47, 1326507024 }
 0x2f7   :  { %v2350_v24 = vshrl.u32 %v2349_v35, 23  ;;  %v1970_v21 = vsel %vm1966_vm3, %v1950_v61, %v1953_v8  ;;  %v1977_v25 = vsel %vm1967_vm6, %v1974_v29, %v1976_v30  ;;  %v1980_v18 = vsel %vm1968_vm5, %v1962_v51, %v1979_v22 }
 0x2f8   :  { %v2723_v23 = vclz %v2979_v1  ;;  %v1972_v19 = vsel %vm1968_vm5, %v1956_v15, %v1971_v46  ;;  %v1981_v50 = vsel %vm1967_vm6, %v1978_v45, %v1980_v18  ;;  %v1911_v56 = vand.u32 2147483647, %v1910_v42 }
 0x2f9   :  { %v5203_v31 = vmul.u32.u64.low %v1982_v60, %v1977_v25  ;;  %v5204_v17 = vmul.u32.u64.high %v1982_v60, %v1977_v25, %v5203_v31  ;;  %v5207_v55 = vmul.u32.u64.low %v1982_v60, %v1981_v50  ;;  %v5208_v13 = vmul.u32.u64.high %v1982_v60, %v1981_v50, %v5207_v55 }
 0x2fa   :  { %v2980_v12 = vadd.s32 4294967294, %v2723_v23  ;;  %v2966_v41 = vadd.s32 4294967169, %v2350_v24  ;;  %v1973_v38 = vsel %vm1967_vm6, %v1970_v21, %v1972_v19  ;;  %v1913_v34 = vcvt.s32.f32 %v1906_v63 }
 0x2fb   :  { %v1992_v49 = vadd.s32 1, %v5204_v17  ;;  %v2346_v16 = vand.u32 2147483647, %v5174_v6  ;;  %v2711_v26 = vadd.s32 %v5166_v10, %v5164_v9  ;;  %v1989_v37 = vmul.u32 %v1982_v60, %v1973_v38 }
 0x2fc   :  { %vm2981_vm7 = vcmp.lt.s32.totalorder %v2980_v12, 0  ;;  %v2356_v28 = vadd.s32 1, %v2966_v41  ;;  %v5215_v8 = vmul.f32 %v1913_v34, %v1911_v56  ;;  %vm1991_vm8 = vc.u32 %v5208_v13, %v5203_v31 }
 0x2fd   :  { %v2726_v59 = vsel %vm2981_vm7, 0, %v2980_v12  ;;  %v1993_v39 = vsel %vm1991_vm8, %v1992_v49, %v5204_v17  ;;  %v2353_v53 = vand.u32 8388607, %v2346_v16  ;;  %vm5225_vm10 = vcmp.le.f32.partialorder %v2655_v27, 0.7853982 }
 0x2fe   :  { %v2727_v5 = vsub.s32 32, %v2726_v59  ;;  %v2731_v33 = vsub.s32 4294967266, %v2726_v59  ;;  %vm2357_vm9 = vcmp.gt.s32.totalorder %v2356_v28, 0  ;;  %v2728_v14 = vshll.u32 %v2719_v32, %v2726_v59 }
 0x2ff   :  { %v1994_v48 = vadd.s32 %v1993_v39, %v1989_v37  ;;  %v2358_v40 = vsel %vm2357_vm9, %v2356_v28, 0  ;;  %v1915_v60 = vxor.u32 2147483648, %v5215_v8  ;;  %vm2657_vm11 = vcmp.lt.s32.totalorder %v5072_v36, 0 }
 0x300   :  { %v2729_v15 = vshrl.u32 %v2711_v26, %v2727_v5  ;;  %v2732_v51 = vadd.s32 127, %v2731_v33  ;;  %v2360_v35 = vand.u32 31, %v2358_v40  ;;  %v2741_v52 = vsub.s32 4, %v5187_v44 }
 0x301   :  { %v1995_v47 = vadd.s32 536870912, %v1994_v48  ;;  %v2354_v61 = vor.u32 8388608, %v2353_v53  ;;  %v2359_v46 = vshrl.u32 %v2358_v40, 5  ;;  %vm1833_vm12 = vcmp.lt.s32.totalorder %v4931_v43, 0 }
 0x302   :  { %v2730_v9 = vor.u32 %v2729_v15, %v2728_v14  ;;  %v2733_v10 = vshll.u32 %v2732_v51, 23  ;;  %v2361_v29 = vsub.s32 32, %v2360_v35  ;;  %v2363_v45 = vshll.u32 %v3267_v58, %v2360_v35 }
 0x303   :  { %v5231_v42 = vshrl.u32 %v1995_v47, 30  ;;  %v2366_v22 = vshll.u32 %v3268_v62, %v2360_v35  ;;  %v2369_v24 = vshll.u32 %v3269_v0, %v2360_v35  ;;  %v2372_v50 = vshll.u32 %v3270_v2, %v2360_v35 }
 0x304   :  { %v2734_v32 = vor.u32 4788187, %v2733_v10  ;;  %v2737_v1 = vcvt.s32.f32 %v2730_v9  ;;  %v2364_v27 = vshrl.u32 %v3268_v62, %v2361_v29  ;;  %v2367_v21 = vshrl.u32 %v3269_v0, %v2361_v29 }
 0x305   :  { %v1997_v30 = vshll.u32 %v5231_v42, 30  ;;  %v2370_v25 = vshrl.u32 %v3270_v2, %v2361_v29  ;;  %v2373_v18 = vshrl.u32 %v3271_v4, %v2361_v29  ;;  %v2375_v17 = vshll.u32 %v3271_v4, %v2360_v35 }
 0x306   :  { %v2735_v57 = vand.u32 2147483647, %v2734_v32  ;;  %v2376_v12 = vshrl.u32 %v3272_v11, %v2361_v29  ;;  %v2365_v55 = vor.u32 %v2364_v27, %v2363_v45  ;;  %v2368_v41 = vor.u32 %v2367_v21, %v2366_v22 }
 0x307   :  { %v5242_v19 = vsub.s32 %v1994_v48, %v1997_v30  ;;  %v2371_v56 = vor.u32 %v2370_v25, %v2369_v24  ;;  %v2742_v0 = vsel %vm2657_vm11, %v2741_v52, %v5187_v44  ;;  %v2374_v28 = vor.u32 %v2373_v18, %v2372_v50 }
 0x308   :  { %v2738_v23 = vmul.f32 %v2737_v1, %v2735_v57  ;;  %v2394_v34 = vshll.u32 %v2354_v61, 8  ;;  %v2377_v2 = vor.u32 %v2376_v12, %v2375_v17  ;;  %vm2378_vm13 = vcmp.lt.s32.totalorder %v2359_v46, 1 }
 0x309   :  { %v2000_v38 = vsub.s32 0, %v5242_v19  ;;  %vm2379_vm14 = vcmp.lt.s32.totalorder %v2359_v46, 2  ;;  %v2362_v49 = vshrl.u32 %v3267_v58, %v2361_v29  ;;  %vm2381_vm15 = vcmp.lt.s32.totalorder %v2359_v46, 4 }
 0x30a   :  { %v2739_v62 = vxor.u32 2147483648, %v2738_v23  ;;  %vm2380_vm0 = vcmp.lt.s32.totalorder %v2359_v46, 3  ;;  %v2383_v44 = vsel %vm2381_vm15, %v2371_v56, 2102212464  ;;  %v2386_v26 = vsel %vm2378_vm13, %v2365_v55, %v2368_v41 }
 0x30b   :  { %v2951_v11 = vmin.u32 %v2000_v38, %v5242_v19  ;;  %v2382_v33 = vsel %vm2378_vm13, %v2362_v49, %v2365_v55  ;;  %v2387_v37 = vsel %vm2381_vm15, %v2374_v28, 920167782  ;;  %v2384_v14 = vsel %vm2380_vm0, %v2368_v41, %v2383_v44 }
 0x30c   :  { %v2740_v59 = vsel %vm2657_vm11, %v2739_v62, %v2738_v23  ;;  %v2388_v15 = vsel %vm2380_vm0, %v2371_v56, %v2387_v37  ;;  %v2390_v51 = vsel %vm2378_vm13, %v2368_v41, %v2371_v56  ;;  %v2391_v39 = vsel %vm2381_vm15, %v2377_v2, 1326507024 }
 0x30d   :  { %v2743_v4 = vsel %vm5225_vm10, %v5072_v36, %v2740_v59  ;;  %v2002_v5 = vclz %v2951_v11  ;;  %v1916_v58 = vsel %vm1833_vm12, %v1915_v60, %v5215_v8  ;;  %v2389_v53 = vsel %vm2379_vm14, %v2386_v26, %v2388_v15 }
 0x30e   :  { %3225 = vcosq.f32 %v2743_v4  ;;  %v2392_v40 = vsel %vm2380_vm0, %v2374_v28, %v2391_v39  ;;  %v2744_v9 = vsel %vm5225_vm10, 0, %v2742_v0  ;;  %v2385_v32 = vsel %vm2379_vm14, %v2382_v33, %v2384_v14 }
 0x30f   :  { %3227 = vsinq.f32 %v2743_v4  ;;  %v2952_v48 = vadd.s32 4294967294, %v2002_v5  ;;  %v2393_v10 = vsel %vm2379_vm14, %v2390_v51, %v2392_v40  ;;  %vm5278_vm2 = vcmp.le.f32.partialorder %v1831_v54, 0.7853982 }
 0x310   :  { %v5268_v47 = vmul.u32.u64.low %v2394_v34, %v2389_v53  ;;  %v5269_v35 = vmul.u32.u64.high %v2394_v34, %v2389_v53, %v5268_v47  ;;  %v5273_v52 = vmul.u32.u64.low %v2394_v34, %v2393_v10  ;;  %v5274_v61 = vmul.u32.u64.high %v2394_v34, %v2393_v10, %v5273_v52 }
 0x311   :  { %vm2953_vm1 = vcmp.lt.s32.totalorder %v2952_v48, 0  ;;  %v1919_v63 = vsel %vm5278_vm2, %v4931_v43, %v1916_v58  ;;  %v1990_v29 = vadd.s32 %v5203_v31, %v5208_v13  ;;  %v2748_v46 = vand.u32 3, %v2744_v9 }
 0x312   :  { %v2005_v60 = vsel %vm2953_vm1, 0, %v2952_v48  ;;  %v2401_v45 = vmul.u32 %v2394_v34, %v2385_v32  ;;  %v2404_v30 = vadd.s32 1, %v5269_v35  ;;  %vm2403_vm3 = vc.u32 %v5274_v61, %v5268_v47 }
 0x313   :  { %v2006_v57 = vsub.s32 32, %v2005_v60  ;;  %v2010_v1 = vsub.s32 4294967266, %v2005_v60  ;;  %v2007_v27 = vshll.u32 %v5242_v19, %v2005_v60  ;;  %3229 = vcosq.f32 %v1919_v63 }
 0x314   :  { %v2405_v23 = vsel %vm2403_vm3, %v2404_v30, %v5269_v35  ;;  %3231 = vsinq.f32 %v1919_v63  ;;  %vm2753_vm4 = vcmp.eq.s32.totalorder %v2748_v46, 2  ;;  %vm2750_vm5 = vcmp.eq.s32.totalorder %v2748_v46, 0 }
 0x315   :  { %v2008_v54 = vshrl.u32 %v1990_v29, %v2006_v57  ;;  %v2011_v22 = vadd.s32 127, %v2010_v1  ;;  %v2406_v18 = vadd.s32 %v2405_v23, %v2401_v45  ;;  %v1917_v62 = vsub.s32 4, %v5118_v7 }
 0x316   :  { %vm2747_vm6 = vweird.f32 %v5072_v36  ;;  %vm2749_vm7 = vcmp.lt.s32.totalorder %v2748_v46, 2  ;;  %vm1936_vm8 = vcmp.lt.s32.totalorder %v5105_v3, 0  ;;  %vm5303_vm9 = vcmp.le.f32.partialorder %v1934_v20, 0.7853982 }
 0x317   :  { %v2009_v31 = vor.u32 %v2008_v54, %v2007_v27  ;;  %v2012_v13 = vshll.u32 %v2011_v22, 23  ;;  %v2407_v12 = vadd.s32 536870912, %v2406_v18  ;;  %v1918_v4 = vsel %vm1833_vm12, %v1917_v62, %v5118_v7 }
 0x318   :  { %v3226_v24 = vpop.eup %3225  ;;  %v2020_v5 = vsub.s32 4, %v5231_v42  ;;  %v1920_v7 = vsel %vm5278_vm2, 0, %v1918_v4  ;;  %v2402_v52 = vadd.s32 %v5268_v47, %v5274_v61  ;;  %vm1923_vm15 = vweird.f32 %v4931_v43 }
 0x319   :  { %v3228_v21 = vpop.eup %3227  ;;  %v2754_v25 = vxor.u32 2147483648, %v3226_v24  ;;  %v2013_v19 = vor.u32 4788187, %v2012_v13  ;;  %v2016_v0 = vcvt.s32.f32 %v2009_v31  ;;  %v5294_v38 = vshrl.u32 %v2407_v12, 30 }
 0x31a   :  { %v2751_v50 = vxor.u32 2147483648, %v3228_v21  ;;  %v1924_v51 = vand.u32 3, %v1920_v7  ;;  %v2021_v20 = vsel %vm1936_vm8, %v2020_v5, %v5231_v42  ;;  %vm2026_vm2 = vweird.f32 %v5105_v3 }
 0x31b   :  { %v2755_v17 = vsel %vm2753_vm4, %v2754_v25, %v3228_v21  ;;  %v2014_v56 = vand.u32 2147483647, %v2013_v19  ;;  %v2409_v2 = vshll.u32 %v5294_v38, 30  ;;  %v2023_v40 = vsel %vm5303_vm9, 0, %v2021_v20 }
 0x31c   :  { %v2752_v55 = vsel %vm2750_vm5, %v3226_v24, %v2751_v50  ;;  %vm1926_vm10 = vcmp.eq.s32.totalorder %v1924_v51, 0  ;;  %vm1929_vm11 = vcmp.eq.s32.totalorder %v1924_v51, 2  ;;  %v2027_v32 = vand.u32 3, %v2023_v40 }
 0x31d   :  { %v2756_v41 = vsel %vm2749_vm7, %v2752_v55, %v2755_v17  ;;  %v2017_v59 = vmul.f32 %v2016_v0, %v2014_v56  ;;  %v2410_v49 = vsub.s32 %v2406_v18, %v2409_v2  ;;  %v3230_v36 = vpop.eup %3229  ;;  %vm1925_vm13 = vcmp.lt.s32.totalorder %v1924_v51, 2 }
 0x31e   :  { %v2757_v28 = vsel %vm2747_vm6, nan, %v2756_v41  ;;  %v3232_v37 = vpop.eup %3231  ;;  %v1930_v48 = vxor.u32 2147483648, %v3230_v36  ;;  %vm2032_vm14 = vcmp.eq.s32.totalorder %v2027_v32, 2  ;;  %vm2029_vm0 = vcmp.eq.s32.totalorder %v2027_v32, 0 }
 0x31f   :  { %v3013_v34 = vpack.c.bf16 %v2757_v28, %v2757_v28  ;;  %v2018_v11 = vxor.u32 2147483648, %v2017_v59  ;;  %v2412_v33 = vsub.s32 0, %v2410_v49  ;;  %v1927_v58 = vxor.u32 2147483648, %v3232_v37 }
 0x320   :  { %v1931_v10 = vsel %vm1929_vm11, %v1930_v48, %v3232_v37  ;;  %vm2028_vm1 = vcmp.lt.s32.totalorder %v2027_v32, 2  ;;  %vm2348_vm3 = vcmp.lt.s32.totalorder %v5174_v6, 0  ;;  %vm2347_vm4 = vcmp.le.f32.partialorder %v2346_v16, 0.7853982 }
 0x321   :  { %2853 = vst [vmem:[#allocation2 + $0x5c] sm:$0xf] %v3013_v34  ;;  %v2019_v26 = vsel %vm1936_vm8, %v2018_v11, %v2017_v59  ;;  %v2967_v15 = vmin.u32 %v2412_v33, %v2410_v49  ;;  %v1928_v9 = vsel %vm1926_vm10, %v3230_v36, %v1927_v58  ;;  %v2432_v17 = vsub.s32 4, %v5294_v38 }
 0x322   :  { %v2022_v14 = vsel %vm5303_vm9, %v5105_v3, %v2019_v26  ;;  %v1932_v46 = vsel %vm1925_vm13, %v1928_v9, %v1931_v10  ;;  %vm2438_vm8 = vweird.f32 %v5174_v6 }
 0x323   :  { %3233 = vcosq.f32 %v2022_v14  ;;  %v2414_v39 = vclz %v2967_v15  ;;  %v1933_v24 = vsel %vm1923_vm15, nan, %v1932_v46  ;;  %v2433_v3 = vsel %vm2348_vm3, %v2432_v17, %v5294_v38 }
 0x324   :  { %3235 = vsinq.f32 %v2022_v14  ;;  %v2435_v12 = vsel %vm2347_vm4, 0, %v2433_v3 }
 0x325   :  { %v2968_v53 = vadd.s32 4294967294, %v2414_v39  ;;  %v2439_v62 = vand.u32 3, %v2435_v12 }
 0x327   :  { %vm2969_vm12 = vcmp.lt.s32.totalorder %v2968_v53, 0  ;;  %vm2444_vm5 = vcmp.eq.s32.totalorder %v2439_v62, 2  ;;  %vm2441_vm6 = vcmp.eq.s32.totalorder %v2439_v62, 0  ;;  %vm2440_vm7 = vcmp.lt.s32.totalorder %v2439_v62, 2 }
 0x328   :  { %v2417_v35 = vsel %vm2969_vm12, 0, %v2968_v53 }
 0x329   :  { %v2418_v8 = vsub.s32 32, %v2417_v35  ;;  %v2422_v60 = vsub.s32 4294967266, %v2417_v35  ;;  %v2419_v63 = vshll.u32 %v2410_v49, %v2417_v35 }
 0x32b   :  { %v2420_v29 = vshrl.u32 %v2402_v52, %v2418_v8  ;;  %v2423_v57 = vadd.s32 127, %v2422_v60 }
 0x32d   :  { %v3234_v42 = vpop.eup %3233  ;;  %v2421_v27 = vor.u32 %v2420_v29, %v2419_v63  ;;  %v2424_v54 = vshll.u32 %v2423_v57, 23 }
 0x32e   :  { %v3236_v1 = vpop.eup %3235  ;;  %v2033_v45 = vxor.u32 2147483648, %v3234_v42 }
 0x32f   :  { %v2030_v30 = vxor.u32 2147483648, %v3236_v1  ;;  %v2425_v61 = vor.u32 4788187, %v2424_v54  ;;  %v2428_v31 = vcvt.s32.f32 %v2421_v27 }
 0x330   :  { %v2034_v22 = vsel %vm2032_vm14, %v2033_v45, %v3236_v1 }
 0x331   :  { %v2031_v47 = vsel %vm2029_vm0, %v3234_v42, %v2030_v30  ;;  %v2426_v25 = vand.u32 2147483647, %v2425_v61 }
 0x332   :  { %v2035_v23 = vsel %vm2028_vm1, %v2031_v47, %v2034_v22 }
 0x333   :  { %v2036_v21 = vsel %vm2026_vm2, nan, %v2035_v23  ;;  %v2429_v18 = vmul.f32 %v2428_v31, %v2426_v25 }
 0x334   :  { %v3008_v13 = vpack.c.bf16 %v2036_v21, %v1933_v24 }
 0x335   :  { %v2430_v50 = vxor.u32 2147483648, %v2429_v18 }
 0x336   :  { %2848 = vst [vmem:[#allocation2 + $0x3c] sm:$0xff] %v3008_v13 }
 0x337   :  { %v2431_v43 = vsel %vm2348_vm3, %v2430_v50, %v2429_v18 }
 0x338   :  { %v2434_v19 = vsel %vm2347_vm4, %v5174_v6, %v2431_v43 }
 0x339   :  { %3237 = vcosq.f32 %v2434_v19 }
 0x33a   :  { %3239 = vsinq.f32 %v2434_v19 }
 0x343   :  { %v3238_v55 = vpop.eup %3237 }
 0x344   :  { %v3240_v41 = vpop.eup %3239  ;;  %v2445_v56 = vxor.u32 2147483648, %v3238_v55 }
 0x345   :  { %v2442_v0 = vxor.u32 2147483648, %v3240_v41 }
 0x346   :  { %v2446_v28 = vsel %vm2444_vm5, %v2445_v56, %v3240_v41 }
 0x347   :  { %v2443_v16 = vsel %vm2441_vm6, %v3238_v55, %v2442_v0 }
 0x348   :  { %v2447_v34 = vsel %vm2440_vm7, %v2443_v16, %v2446_v28 }
 0x349   :  { %v2448_v59 = vsel %vm2438_vm8, nan, %v2447_v34 }
 0x34a   :  { %v3011_v2 = vpack.c.bf16 %v2448_v59, %v2448_v59 }
 0x34c   :  { %2851 = vst [vmem:[#allocation2 + $0x50] sm:$0xf] %v3011_v2 }
 0x34d   :  { %3253 = shalt.err (!%p3250_p4)
}
 0x34e   :  { %s3254_s13 = scalar_lea.hbm %s5342_s3, 1536 }
 0x34f   :  { %p3255_p5 = scmp.ne.s32.totalorder %s5342_s3, %s3254_s13  ;;  %p3258_p6 = scmp.lt.u32.totalorder %s3254_s13, %s5342_s3 }
 0x351   :  { %p3260_p7 = pnand %p3258_p6, %p3255_p5 }
 0x353   :  { %3263 = shalt.err (!%p3260_p7)
}
 0x354   :  { %s3274_s18 = smov 192   ;;  %s3275_s19 = smov 12  }
 0x355   :  { %2865 = dma.vmem_to_hbm [thread:$0]  %s2860_s9, 1536, %s5342_s3, [#allocation3], %s3274_s18, %s3274_s18, %s3275_s19  }
 0x356   :  { %3264 = dma.done.wait [#allocation3], 1536  }
 0x357   :  { %3265 = vsyncadd [#allocation3], 4294965760 }
 0x358   :  { %2869 = vsyncpa [#allocation3], 1 }

</bundles_post_ra>
